<compile_context>
chip_gen: v6e
topology: v6e:2x2x1
jax: 0.10.0
libtpu: 0.0.40
codegen_flags: <defaults>
</compile_context>

<pallas_src>
import functools

import jax
import jax.numpy as jnp
from jax import lax
from jax.experimental import pallas as pl
from jax.experimental.pallas import tpu as pltpu


KSIZE = 5      # both convs: kernel 5x5
STRIDE = 2     # both convs: stride 2
PAD = 2        # both convs: padding 2
C1OUT = 32     # conv1 output channels (fixed by the module)
LANE = 128


def _round_up(x, m):
    return (x + m - 1) // m * m


def _pick_bblk(B, rows_per_img):
    """Batch-block size: aim for conv2 matmul M ~ 256 rows, keep >= 2 grid
    steps when the batch allows (v7x has 2 TensorCores), and keep the output
    block row count a multiple of 8 (or the full array)."""
    target = max(1, 256 // max(1, rows_per_img))
    best = B  # fallback: whole batch in one step (block == full array -> OK)
    for d in range(1, B + 1):
        if B % d:
            continue
        rows = d * rows_per_img
        if d <= target and rows % 8 == 0 and (B // d >= 2 or B == 1):
            best = d
    return best


# ---------------------------------------------------------------------------
# Fused kernel: conv1+ReLU -> conv2+ReLU for a block of Bblk images.
# All ref accesses are full loads/stores or static contiguous slices.
# ---------------------------------------------------------------------------
def _fused_caps_kernel(x_ref, w1_ref, b1_ref, w2_ref, b2_ref, o_ref, h1s_ref,
                       *, bblk, cin, h1, w1h, h2, w2, cpad):
    """
    x_ref  : (bblk, 2, 4, Hp2, Wp4, cin) phase-split padded input
             x_ref[b, ry, rx, i, j, c] == x_pad[b, 2*i+ry, 4*j+rx, c]
    w1_ref : (25*cin, 32)    rows ordered (dy, dx, ci)
    b1_ref : (1, 32)
    w2_ref : (25*32, cpad)   rows ordered (dy, dx, ci), out-channels padded
    b2_ref : (1, cpad)
    o_ref  : (bblk*h2*w2, cpad)  lane-dense output rows, ordered (b, oy2, ox2)
    h1s_ref: (bblk, 2, h1+4, w1h+2, 32) scratch: conv1 activation, padded,
             split by output-column parity (plane px holds padded cols of
             parity px at in-plane index col//2).
    """
    # ---------------- conv1: one im2col matmul (K = 25*cin) -----------------
    xv = x_ref[...]
    w1 = w1_ref[...]
    phase_rows = []
    for px in range(2):                      # conv1 output-column parity
        taps = []
        for dy in range(KSIZE):
            ry, ay = dy % 2, dy // 2
            for dx in range(KSIZE):
                s = 2 * px + dx              # padded-col offset within 4-phase
                rx, ax = s % 4, s // 4
                # (bblk, h1, w1h, cin): contiguous static slices only.
                taps.append(xv[:, ry, rx, ay:ay + h1, ax:ax + w1h, :])
        phase_rows.append(jnp.concatenate(taps, axis=-1))   # (bblk,h1,w1h,25*cin)
    patches1 = jnp.stack(phase_rows, axis=1)                 # (bblk,2,h1,w1h,K1)
    patches1 = patches1.reshape(bblk * 2 * h1 * w1h, KSIZE * KSIZE * cin)
    a1 = jnp.dot(patches1, w1, preferred_element_type=jnp.float32)
    a1 = jnp.maximum(a1 + b1_ref[...], 0.0)                  # (M1, 32)
    a1 = a1.reshape(bblk, 2, h1, w1h, C1OUT)

    # ------------- stage conv1 activation in VMEM (zero border only) --------
    zrow = jnp.zeros((bblk, 2, PAD, w1h + 2, C1OUT), jnp.float32)
    zcol = jnp.zeros((bblk, 2, h1 + 2 * PAD, 1, C1OUT), jnp.float32)
    h1s_ref[:, :, 0:PAD, :, :] = zrow
    h1s_ref[:, :, PAD + h1:h1 + 2 * PAD, :, :] = zrow
    h1s_ref[:, :, :, 0:1, :] = zcol
    h1s_ref[:, :, :, w1h + 1:w1h + 2, :] = zcol
    h1s_ref[:, :, PAD:PAD + h1, 1:1 + w1h, :] = a1

    # ---------------- conv2: one im2col matmul (K = 800) --------------------
    h1v = h1s_ref[...]                      # (bblk, 2, h1+4, w1h+2, 32)
    taps2 = []
    for dy in range(KSIZE):
        for dx in range(KSIZE):
            px, ax = dx % 2, dx // 2
            blk = h1v[:, px, dy:dy + 2 * h2, ax:ax + w2, :]   # (bblk, 2*h2, w2, 32)
            blk = blk.reshape(bblk, h2, 2, w2, C1OUT)         # leading-dim split
            taps2.append(blk[:, :, 0, :, :])                  # rows dy, dy+2, ...
    patches2 = jnp.concatenate(taps2, axis=-1)                # (bblk, h2, w2, 800)
    patches2 = patches2.reshape(bblk * h2 * w2, KSIZE * KSIZE * C1OUT)
    a2 = jnp.dot(patches2, w2_ref[...], preferred_element_type=jnp.float32)
    o_ref[...] = jnp.maximum(a2 + b2_ref[...], 0.0)


def _fused_primary_caps_conv(x_nchw, w1_mat, b1_row, w2_mat, b2_row):
    """Runs the fused double-conv. Returns (B*H2*W2, CPAD) lane-dense rows."""
    B, Cin, H, W = x_nchw.shape
    assert H % 4 == 0 and W % 4 == 0, "two stride-2 convs need H, W % 4 == 0"
    H1, W1 = H // 2, W // 2
    H2, W2 = H1 // 2, W1 // 2
    W1h = W1 // 2                     # == W2
    CPAD = w2_mat.shape[1]
    Hp, Wp = H + 2 * PAD, W + 2 * PAD
    Hp2, Wp4 = Hp // 2, Wp // 4

    # Layout work in XLA: NCHW -> NHWC, conv1 zero-pad, then split into
    # (row%2, col%4) phase planes so every in-kernel tap read is contiguous.
    x_pad = jnp.pad(jnp.transpose(x_nchw, (0, 2, 3, 1)),
                    ((0, 0), (PAD, PAD), (PAD, PAD), (0, 0)))
    x_ph = x_pad.reshape(B, Hp2, 2, Wp4, 4, Cin).transpose(0, 2, 4, 1, 3, 5)
    # x_ph[b, ry, rx, i, j, c] == x_pad[b, 2*i+ry, 4*j+rx, c]

    Bblk = _pick_bblk(B, H2 * W2)
    grid = (B // Bblk,)

    kernel = functools.partial(_fused_caps_kernel, bblk=Bblk, cin=Cin,
                               h1=H1, w1h=W1h, h2=H2, w2=W2, cpad=CPAD)

    flops = 2 * B * (H1 * W1 * (KSIZE * KSIZE * Cin) * C1OUT
                     + H2 * W2 * (KSIZE * KSIZE * C1OUT) * CPAD)
    bytes_accessed = 4 * (x_ph.size + w1_mat.size + b1_row.size
                          + w2_mat.size + b2_row.size + B * H2 * W2 * CPAD)

    out_flat = pl.pallas_call(
        kernel,
        out_shape=jax.ShapeDtypeStruct((B * H2 * W2, CPAD), jnp.float32),
        grid_spec=pltpu.PrefetchScalarGridSpec(
            num_scalar_prefetch=0,
            grid=grid,
            in_specs=[
                pl.BlockSpec((Bblk, 2, 4, Hp2, Wp4, Cin),
                             lambda b: (b, 0, 0, 0, 0, 0)),
                pl.BlockSpec(w1_mat.shape, lambda b: (0, 0)),
                pl.BlockSpec(b1_row.shape, lambda b: (0, 0)),
                pl.BlockSpec(w2_mat.shape, lambda b: (0, 0)),
                pl.BlockSpec(b2_row.shape, lambda b: (0, 0)),
            ],
            out_specs=pl.BlockSpec((Bblk * H2 * W2, CPAD), lambda b: (b, 0)),
            scratch_shapes=[
                pltpu.VMEM((Bblk, 2, H1 + 2 * PAD, W1h + 2, C1OUT), jnp.float32)],
        ),
        compiler_params=pltpu.CompilerParams(
            dimension_semantics=("parallel",)),
        cost_estimate=pl.CostEstimate(flops=flops, transcendentals=0,
                                      bytes_accessed=bytes_accessed),
    )(x_ph, w1_mat, b1_row, w2_mat, b2_row)
    return out_flat, H2, W2


# ---------------------------------------------------------------------------
# Get_Primary_Caps forward.
# ---------------------------------------------------------------------------
class GetPrimaryCapsPallas:
    def __init__(self, input_channels, caps1_n_maps, caps1_caps_grid_ydim,
                 caps1_caps_grid_xdim, caps1_n_dims, key):
        self.input_channels = input_channels
        self.caps1_n_maps = caps1_n_maps
        self.caps1_caps_grid_ydim = caps1_caps_grid_ydim
        self.caps1_caps_grid_xdim = caps1_caps_grid_xdim
        self.caps1_n_dims = caps1_n_dims

        k1, k2, k3, k4 = jax.random.split(key, 4)
        # conv1: in -> 32, k=5, s=2, p=2   (PyTorch-style uniform +-1/sqrt(fan_in))
        c1_out, c1_in = C1OUT, input_channels
        bound1 = 1.0 / (c1_in * KSIZE * KSIZE) ** 0.5
        self.w1 = jax.random.uniform(k1, (c1_out, c1_in, KSIZE, KSIZE),
                                     jnp.float32, -bound1, bound1)
        self.b1 = jax.random.uniform(k2, (c1_out,), jnp.float32, -bound1, bound1)
        # conv2: 32 -> n_dims * n_maps, k=5, s=2, p=2
        c2_out, c2_in = caps1_n_dims * caps1_n_maps, C1OUT
        bound2 = 1.0 / (c2_in * KSIZE * KSIZE) ** 0.5
        self.w2 = jax.random.uniform(k3, (c2_out, c2_in, KSIZE, KSIZE),
                                     jnp.float32, -bound2, bound2)
        self.b2 = jax.random.uniform(k4, (c2_out,), jnp.float32, -bound2, bound2)

        # Kernel-side parameter layouts, prepared once:
        #   OIHW -> (dy, dx, ci, co) -> ((dy*5+dx)*ci, co); conv2 N padded to 128.
        self.cout = c2_out
        self.cpad = _round_up(c2_out, LANE)
        self.w1_mat = jnp.transpose(self.w1, (2, 3, 1, 0)).reshape(
            KSIZE * KSIZE * input_channels, C1OUT)
        self.b1_row = self.b1.reshape(1, C1OUT)
        w2_m = jnp.transpose(self.w2, (2, 3, 1, 0)).reshape(
            KSIZE * KSIZE * C1OUT, c2_out)
        self.w2_mat = jnp.pad(w2_m, ((0, 0), (0, self.cpad - c2_out)))
        self.b2_row = jnp.pad(self.b2, (0, self.cpad - c2_out)).reshape(1, self.cpad)

    def __call__(self, x):
        # x: (B, input_channels, H, W)  NCHW
        out_flat, H2, W2 = _fused_primary_caps_conv(
            x, self.w1_mat, self.b1_row, self.w2_mat, self.b2_row)
        assert H2 == self.caps1_caps_grid_ydim and W2 == self.caps1_caps_grid_xdim, \
            (H2, W2, self.caps1_caps_grid_ydim, self.caps1_caps_grid_xdim)
        B = x.shape[0]
        # Strip lane padding, then apply the module's capsule view/permute:
        # NHWC channel c = m*n_dims + d  ->  (B, n_maps, y, x, n_dims)
        y = out_flat.reshape(B, H2, W2, self.cpad)[:, :, :, :self.cout]
        y = y.reshape(B, H2, W2, self.caps1_n_maps, self.caps1_n_dims)
        y = jnp.transpose(y, (0, 3, 1, 2, 4))
        return y


# ---------------------------------------------------------------------------
# Pure-JAX reference (lax.conv) for correctness check.
# ---------------------------------------------------------------------------
def _reference(x, mod):
    def conv(x, w, b):
        y = lax.conv_general_dilated(
            x, w, window_strides=(STRIDE, STRIDE),
            padding=((PAD, PAD), (PAD, PAD)),
            dimension_numbers=("NCHW", "OIHW", "NCHW"))
        return jnp.maximum(y + b[None, :, None, None], 0.0)
    y = conv(x, mod.w1, mod.b1)
    y = conv(y, mod.w2, mod.b2)
    B = y.shape[0]
    y = y.reshape(B, mod.caps1_n_maps, mod.caps1_n_dims,
                  mod.caps1_caps_grid_ydim, mod.caps1_caps_grid_xdim)
    return jnp.transpose(y, (0, 1, 3, 4, 2))


if __name__ == "__main__":
    key = jax.random.PRNGKey(0)
    k_param, k_x = jax.random.split(key)

    # Small config: 3-channel 16x16 input -> conv s2 -> 8x8 -> conv s2 -> 4x4 grid.
    B, C_in, H, W = 2, 3, 16, 16
    caps1_n_maps, caps1_n_dims = 8, 8           # conv2 out channels = 64
    grid_y, grid_x = 4, 4

    module = GetPrimaryCapsPallas(C_in, caps1_n_maps, grid_y, grid_x,
                                  caps1_n_dims, k_param)
    x = jax.random.normal(k_x, (B, C_in, H, W), jnp.float32)

    out = jax.block_until_ready(module(x))
    assert out.shape == (B, caps1_n_maps, grid_y, grid_x, caps1_n_dims), out.shape

    ref = jax.block_until_ready(_reference(x, module))
    assert jnp.allclose(out, ref, atol=2e-4, rtol=2e-4), \
        "mismatch vs lax.conv reference"

    print("KERNEL_OK")
</pallas_src>

<mosaic_0001>
module attributes {stable_mosaic.version = 11 : i64} {
  func.func @_fused_caps_kernel(%arg0: i32, %arg1: memref<1x2x4x10x5x3xf32, #tpu.memory_space<vmem>>, %arg2: memref<75x32xf32, #tpu.memory_space<vmem>>, %arg3: memref<1x32xf32, #tpu.memory_space<vmem>>, %arg4: memref<800x128xf32, #tpu.memory_space<vmem>>, %arg5: memref<1x128xf32, #tpu.memory_space<vmem>>, %arg6: memref<16x128xf32, #tpu.memory_space<vmem>>, %arg7: memref<1x2x12x6x32xf32, #tpu.memory_space<vmem>>) attributes {dimension_semantics = [#tpu.dimension_semantics<parallel>], iteration_bounds = array<i64: 2>, scalar_prefetch = 0 : i64, scratch_operands = 1 : i64, tpu.core_type = #tpu.core_type<tc>, window_params = [{transform_indices = @transform_0, window_bounds = array<i64: 1, 2, 4, 10, 5, 3>}, {pipeline_mode = #tpu.pipeline_mode<synchronous>, transform_indices = @transform_1, window_bounds = array<i64: 75, 32>}, {pipeline_mode = #tpu.pipeline_mode<synchronous>, transform_indices = @transform_2, window_bounds = array<i64: 1, 32>}, {pipeline_mode = #tpu.pipeline_mode<synchronous>, transform_indices = @transform_3, window_bounds = array<i64: 800, 128>}, {pipeline_mode = #tpu.pipeline_mode<synchronous>, transform_indices = @transform_4, window_bounds = array<i64: 1, 128>}, {transform_indices = @transform_5, window_bounds = array<i64: 16, 128>}]} {
    %c0 = arith.constant 0 : index
    %c0_0 = arith.constant 0 : index
    %c0_1 = arith.constant 0 : index
    %c0_2 = arith.constant 0 : index
    %c0_3 = arith.constant 0 : index
    %c0_4 = arith.constant 0 : index
    %0 = vector.load %arg1[%c0, %c0_0, %c0_1, %c0_2, %c0_3, %c0_4] : memref<1x2x4x10x5x3xf32, #tpu.memory_space<vmem>>, vector<1x2x4x10x5x3xf32>
    %c0_5 = arith.constant 0 : index
    %c0_6 = arith.constant 0 : index
    %1 = vector.load %arg2[%c0_5, %c0_6] : memref<75x32xf32, #tpu.memory_space<vmem>>, vector<75x32xf32>
    %2 = vector.extract_strided_slice %0 {offsets = [0, 0, 0, 0, 0, 0], sizes = [1, 1, 1, 8, 4, 3], strides = [1, 1, 1, 1, 1, 1]} : vector<1x2x4x10x5x3xf32> to vector<1x1x1x8x4x3xf32>
    %3 = vector.shape_cast %2 : vector<1x1x1x8x4x3xf32> to vector<1x8x4x3xf32>
    %4 = vector.extract_strided_slice %0 {offsets = [0, 0, 1, 0, 0, 0], sizes = [1, 1, 1, 8, 4, 3], strides = [1, 1, 1, 1, 1, 1]} : vector<1x2x4x10x5x3xf32> to vector<1x1x1x8x4x3xf32>
    %5 = vector.shape_cast %4 : vector<1x1x1x8x4x3xf32> to vector<1x8x4x3xf32>
    %6 = vector.extract_strided_slice %0 {offsets = [0, 0, 2, 0, 0, 0], sizes = [1, 1, 1, 8, 4, 3], strides = [1, 1, 1, 1, 1, 1]} : vector<1x2x4x10x5x3xf32> to vector<1x1x1x8x4x3xf32>
    %7 = vector.shape_cast %6 : vector<1x1x1x8x4x3xf32> to vector<1x8x4x3xf32>
    %8 = vector.extract_strided_slice %0 {offsets = [0, 0, 3, 0, 0, 0], sizes = [1, 1, 1, 8, 4, 3], strides = [1, 1, 1, 1, 1, 1]} : vector<1x2x4x10x5x3xf32> to vector<1x1x1x8x4x3xf32>
    %9 = vector.shape_cast %8 : vector<1x1x1x8x4x3xf32> to vector<1x8x4x3xf32>
    %10 = vector.extract_strided_slice %0 {offsets = [0, 0, 0, 0, 1, 0], sizes = [1, 1, 1, 8, 4, 3], strides = [1, 1, 1, 1, 1, 1]} : vector<1x2x4x10x5x3xf32> to vector<1x1x1x8x4x3xf32>
    %11 = vector.shape_cast %10 : vector<1x1x1x8x4x3xf32> to vector<1x8x4x3xf32>
    %12 = vector.extract_strided_slice %0 {offsets = [0, 1, 0, 0, 0, 0], sizes = [1, 1, 1, 8, 4, 3], strides = [1, 1, 1, 1, 1, 1]} : vector<1x2x4x10x5x3xf32> to vector<1x1x1x8x4x3xf32>
    %13 = vector.shape_cast %12 : vector<1x1x1x8x4x3xf32> to vector<1x8x4x3xf32>
    %14 = vector.extract_strided_slice %0 {offsets = [0, 1, 1, 0, 0, 0], sizes = [1, 1, 1, 8, 4, 3], strides = [1, 1, 1, 1, 1, 1]} : vector<1x2x4x10x5x3xf32> to vector<1x1x1x8x4x3xf32>
    %15 = vector.shape_cast %14 : vector<1x1x1x8x4x3xf32> to vector<1x8x4x3xf32>
    %16 = vector.extract_strided_slice %0 {offsets = [0, 1, 2, 0, 0, 0], sizes = [1, 1, 1, 8, 4, 3], strides = [1, 1, 1, 1, 1, 1]} : vector<1x2x4x10x5x3xf32> to vector<1x1x1x8x4x3xf32>
    %17 = vector.shape_cast %16 : vector<1x1x1x8x4x3xf32> to vector<1x8x4x3xf32>
    %18 = vector.extract_strided_slice %0 {offsets = [0, 1, 3, 0, 0, 0], sizes = [1, 1, 1, 8, 4, 3], strides = [1, 1, 1, 1, 1, 1]} : vector<1x2x4x10x5x3xf32> to vector<1x1x1x8x4x3xf32>
    %19 = vector.shape_cast %18 : vector<1x1x1x8x4x3xf32> to vector<1x8x4x3xf32>
    %20 = vector.extract_strided_slice %0 {offsets = [0, 1, 0, 0, 1, 0], sizes = [1, 1, 1, 8, 4, 3], strides = [1, 1, 1, 1, 1, 1]} : vector<1x2x4x10x5x3xf32> to vector<1x1x1x8x4x3xf32>
    %21 = vector.shape_cast %20 : vector<1x1x1x8x4x3xf32> to vector<1x8x4x3xf32>
    %22 = vector.extract_strided_slice %0 {offsets = [0, 0, 0, 1, 0, 0], sizes = [1, 1, 1, 8, 4, 3], strides = [1, 1, 1, 1, 1, 1]} : vector<1x2x4x10x5x3xf32> to vector<1x1x1x8x4x3xf32>
    %23 = vector.shape_cast %22 : vector<1x1x1x8x4x3xf32> to vector<1x8x4x3xf32>
    %24 = vector.extract_strided_slice %0 {offsets = [0, 0, 1, 1, 0, 0], sizes = [1, 1, 1, 8, 4, 3], strides = [1, 1, 1, 1, 1, 1]} : vector<1x2x4x10x5x3xf32> to vector<1x1x1x8x4x3xf32>
    %25 = vector.shape_cast %24 : vector<1x1x1x8x4x3xf32> to vector<1x8x4x3xf32>
    %26 = vector.extract_strided_slice %0 {offsets = [0, 0, 2, 1, 0, 0], sizes = [1, 1, 1, 8, 4, 3], strides = [1, 1, 1, 1, 1, 1]} : vector<1x2x4x10x5x3xf32> to vector<1x1x1x8x4x3xf32>
    %27 = vector.shape_cast %26 : vector<1x1x1x8x4x3xf32> to vector<1x8x4x3xf32>
    %28 = vector.extract_strided_slice %0 {offsets = [0, 0, 3, 1, 0, 0], sizes = [1, 1, 1, 8, 4, 3], strides = [1, 1, 1, 1, 1, 1]} : vector<1x2x4x10x5x3xf32> to vector<1x1x1x8x4x3xf32>
    %29 = vector.shape_cast %28 : vector<1x1x1x8x4x3xf32> to vector<1x8x4x3xf32>
    %30 = vector.extract_strided_slice %0 {offsets = [0, 0, 0, 1, 1, 0], sizes = [1, 1, 1, 8, 4, 3], strides = [1, 1, 1, 1, 1, 1]} : vector<1x2x4x10x5x3xf32> to vector<1x1x1x8x4x3xf32>
    %31 = vector.shape_cast %30 : vector<1x1x1x8x4x3xf32> to vector<1x8x4x3xf32>
    %32 = vector.extract_strided_slice %0 {offsets = [0, 1, 0, 1, 0, 0], sizes = [1, 1, 1, 8, 4, 3], strides = [1, 1, 1, 1, 1, 1]} : vector<1x2x4x10x5x3xf32> to vector<1x1x1x8x4x3xf32>
    %33 = vector.shape_cast %32 : vector<1x1x1x8x4x3xf32> to vector<1x8x4x3xf32>
    %34 = vector.extract_strided_slice %0 {offsets = [0, 1, 1, 1, 0, 0], sizes = [1, 1, 1, 8, 4, 3], strides = [1, 1, 1, 1, 1, 1]} : vector<1x2x4x10x5x3xf32> to vector<1x1x1x8x4x3xf32>
    %35 = vector.shape_cast %34 : vector<1x1x1x8x4x3xf32> to vector<1x8x4x3xf32>
    %36 = vector.extract_strided_slice %0 {offsets = [0, 1, 2, 1, 0, 0], sizes = [1, 1, 1, 8, 4, 3], strides = [1, 1, 1, 1, 1, 1]} : vector<1x2x4x10x5x3xf32> to vector<1x1x1x8x4x3xf32>
    %37 = vector.shape_cast %36 : vector<1x1x1x8x4x3xf32> to vector<1x8x4x3xf32>
    %38 = vector.extract_strided_slice %0 {offsets = [0, 1, 3, 1, 0, 0], sizes = [1, 1, 1, 8, 4, 3], strides = [1, 1, 1, 1, 1, 1]} : vector<1x2x4x10x5x3xf32> to vector<1x1x1x8x4x3xf32>
    %39 = vector.shape_cast %38 : vector<1x1x1x8x4x3xf32> to vector<1x8x4x3xf32>
    %40 = vector.extract_strided_slice %0 {offsets = [0, 1, 0, 1, 1, 0], sizes = [1, 1, 1, 8, 4, 3], strides = [1, 1, 1, 1, 1, 1]} : vector<1x2x4x10x5x3xf32> to vector<1x1x1x8x4x3xf32>
    %41 = vector.shape_cast %40 : vector<1x1x1x8x4x3xf32> to vector<1x8x4x3xf32>
    %42 = vector.extract_strided_slice %0 {offsets = [0, 0, 0, 2, 0, 0], sizes = [1, 1, 1, 8, 4, 3], strides = [1, 1, 1, 1, 1, 1]} : vector<1x2x4x10x5x3xf32> to vector<1x1x1x8x4x3xf32>
    %43 = vector.shape_cast %42 : vector<1x1x1x8x4x3xf32> to vector<1x8x4x3xf32>
    %44 = vector.extract_strided_slice %0 {offsets = [0, 0, 1, 2, 0, 0], sizes = [1, 1, 1, 8, 4, 3], strides = [1, 1, 1, 1, 1, 1]} : vector<1x2x4x10x5x3xf32> to vector<1x1x1x8x4x3xf32>
    %45 = vector.shape_cast %44 : vector<1x1x1x8x4x3xf32> to vector<1x8x4x3xf32>
    %46 = vector.extract_strided_slice %0 {offsets = [0, 0, 2, 2, 0, 0], sizes = [1, 1, 1, 8, 4, 3], strides = [1, 1, 1, 1, 1, 1]} : vector<1x2x4x10x5x3xf32> to vector<1x1x1x8x4x3xf32>
    %47 = vector.shape_cast %46 : vector<1x1x1x8x4x3xf32> to vector<1x8x4x3xf32>
    %48 = vector.extract_strided_slice %0 {offsets = [0, 0, 3, 2, 0, 0], sizes = [1, 1, 1, 8, 4, 3], strides = [1, 1, 1, 1, 1, 1]} : vector<1x2x4x10x5x3xf32> to vector<1x1x1x8x4x3xf32>
    %49 = vector.shape_cast %48 : vector<1x1x1x8x4x3xf32> to vector<1x8x4x3xf32>
    %50 = vector.extract_strided_slice %0 {offsets = [0, 0, 0, 2, 1, 0], sizes = [1, 1, 1, 8, 4, 3], strides = [1, 1, 1, 1, 1, 1]} : vector<1x2x4x10x5x3xf32> to vector<1x1x1x8x4x3xf32>
    %51 = vector.shape_cast %50 : vector<1x1x1x8x4x3xf32> to vector<1x8x4x3xf32>
    %52 = tpu.concatenate %3, %5, %7, %9, %11, %13, %15, %17, %19, %21, %23, %25, %27, %29, %31, %33 in 3 : vector<1x8x4x3xf32>, vector<1x8x4x3xf32>, vector<1x8x4x3xf32>, vector<1x8x4x3xf32>, vector<1x8x4x3xf32>, vector<1x8x4x3xf32>, vector<1x8x4x3xf32>, vector<1x8x4x3xf32>, vector<1x8x4x3xf32>, vector<1x8x4x3xf32>, vector<1x8x4x3xf32>, vector<1x8x4x3xf32>, vector<1x8x4x3xf32>, vector<1x8x4x3xf32>, vector<1x8x4x3xf32>, vector<1x8x4x3xf32> -> vector<1x8x4x48xf32>
    %53 = tpu.concatenate %35, %37, %39, %41, %43, %45, %47, %49, %51 in 3 : vector<1x8x4x3xf32>, vector<1x8x4x3xf32>, vector<1x8x4x3xf32>, vector<1x8x4x3xf32>, vector<1x8x4x3xf32>, vector<1x8x4x3xf32>, vector<1x8x4x3xf32>, vector<1x8x4x3xf32>, vector<1x8x4x3xf32> -> vector<1x8x4x27xf32>
    %54 = tpu.concatenate %52, %53 in 3 : vector<1x8x4x48xf32>, vector<1x8x4x27xf32> -> vector<1x8x4x75xf32>
    %55 = vector.extract_strided_slice %0 {offsets = [0, 0, 2, 0, 0, 0], sizes = [1, 1, 1, 8, 4, 3], strides = [1, 1, 1, 1, 1, 1]} : vector<1x2x4x10x5x3xf32> to vector<1x1x1x8x4x3xf32>
    %56 = vector.shape_cast %55 : vector<1x1x1x8x4x3xf32> to vector<1x8x4x3xf32>
    %57 = vector.extract_strided_slice %0 {offsets = [0, 0, 3, 0, 0, 0], sizes = [1, 1, 1, 8, 4, 3], strides = [1, 1, 1, 1, 1, 1]} : vector<1x2x4x10x5x3xf32> to vector<1x1x1x8x4x3xf32>
    %58 = vector.shape_cast %57 : vector<1x1x1x8x4x3xf32> to vector<1x8x4x3xf32>
    %59 = vector.extract_strided_slice %0 {offsets = [0, 0, 0, 0, 1, 0], sizes = [1, 1, 1, 8, 4, 3], strides = [1, 1, 1, 1, 1, 1]} : vector<1x2x4x10x5x3xf32> to vector<1x1x1x8x4x3xf32>
    %60 = vector.shape_cast %59 : vector<1x1x1x8x4x3xf32> to vector<1x8x4x3xf32>
    %61 = vector.extract_strided_slice %0 {offsets = [0, 0, 1, 0, 1, 0], sizes = [1, 1, 1, 8, 4, 3], strides = [1, 1, 1, 1, 1, 1]} : vector<1x2x4x10x5x3xf32> to vector<1x1x1x8x4x3xf32>
    %62 = vector.shape_cast %61 : vector<1x1x1x8x4x3xf32> to vector<1x8x4x3xf32>
    %63 = vector.extract_strided_slice %0 {offsets = [0, 0, 2, 0, 1, 0], sizes = [1, 1, 1, 8, 4, 3], strides = [1, 1, 1, 1, 1, 1]} : vector<1x2x4x10x5x3xf32> to vector<1x1x1x8x4x3xf32>
    %64 = vector.shape_cast %63 : vector<1x1x1x8x4x3xf32> to vector<1x8x4x3xf32>
    %65 = vector.extract_strided_slice %0 {offsets = [0, 1, 2, 0, 0, 0], sizes = [1, 1, 1, 8, 4, 3], strides = [1, 1, 1, 1, 1, 1]} : vector<1x2x4x10x5x3xf32> to vector<1x1x1x8x4x3xf32>
    %66 = vector.shape_cast %65 : vector<1x1x1x8x4x3xf32> to vector<1x8x4x3xf32>
    %67 = vector.extract_strided_slice %0 {offsets = [0, 1, 3, 0, 0, 0], sizes = [1, 1, 1, 8, 4, 3], strides = [1, 1, 1, 1, 1, 1]} : vector<1x2x4x10x5x3xf32> to vector<1x1x1x8x4x3xf32>
    %68 = vector.shape_cast %67 : vector<1x1x1x8x4x3xf32> to vector<1x8x4x3xf32>
    %69 = vector.extract_strided_slice %0 {offsets = [0, 1, 0, 0, 1, 0], sizes = [1, 1, 1, 8, 4, 3], strides = [1, 1, 1, 1, 1, 1]} : vector<1x2x4x10x5x3xf32> to vector<1x1x1x8x4x3xf32>
    %70 = vector.shape_cast %69 : vector<1x1x1x8x4x3xf32> to vector<1x8x4x3xf32>
    %71 = vector.extract_strided_slice %0 {offsets = [0, 1, 1, 0, 1, 0], sizes = [1, 1, 1, 8, 4, 3], strides = [1, 1, 1, 1, 1, 1]} : vector<1x2x4x10x5x3xf32> to vector<1x1x1x8x4x3xf32>
    %72 = vector.shape_cast %71 : vector<1x1x1x8x4x3xf32> to vector<1x8x4x3xf32>
    %73 = vector.extract_strided_slice %0 {offsets = [0, 1, 2, 0, 1, 0], sizes = [1, 1, 1, 8, 4, 3], strides = [1, 1, 1, 1, 1, 1]} : vector<1x2x4x10x5x3xf32> to vector<1x1x1x8x4x3xf32>
    %74 = vector.shape_cast %73 : vector<1x1x1x8x4x3xf32> to vector<1x8x4x3xf32>
    %75 = vector.extract_strided_slice %0 {offsets = [0, 0, 2, 1, 0, 0], sizes = [1, 1, 1, 8, 4, 3], strides = [1, 1, 1, 1, 1, 1]} : vector<1x2x4x10x5x3xf32> to vector<1x1x1x8x4x3xf32>
    %76 = vector.shape_cast %75 : vector<1x1x1x8x4x3xf32> to vector<1x8x4x3xf32>
    %77 = vector.extract_strided_slice %0 {offsets = [0, 0, 3, 1, 0, 0], sizes = [1, 1, 1, 8, 4, 3], strides = [1, 1, 1, 1, 1, 1]} : vector<1x2x4x10x5x3xf32> to vector<1x1x1x8x4x3xf32>
    %78 = vector.shape_cast %77 : vector<1x1x1x8x4x3xf32> to vector<1x8x4x3xf32>
    %79 = vector.extract_strided_slice %0 {offsets = [0, 0, 0, 1, 1, 0], sizes = [1, 1, 1, 8, 4, 3], strides = [1, 1, 1, 1, 1, 1]} : vector<1x2x4x10x5x3xf32> to vector<1x1x1x8x4x3xf32>
    %80 = vector.shape_cast %79 : vector<1x1x1x8x4x3xf32> to vector<1x8x4x3xf32>
    %81 = vector.extract_strided_slice %0 {offsets = [0, 0, 1, 1, 1, 0], sizes = [1, 1, 1, 8, 4, 3], strides = [1, 1, 1, 1, 1, 1]} : vector<1x2x4x10x5x3xf32> to vector<1x1x1x8x4x3xf32>
    %82 = vector.shape_cast %81 : vector<1x1x1x8x4x3xf32> to vector<1x8x4x3xf32>
    %83 = vector.extract_strided_slice %0 {offsets = [0, 0, 2, 1, 1, 0], sizes = [1, 1, 1, 8, 4, 3], strides = [1, 1, 1, 1, 1, 1]} : vector<1x2x4x10x5x3xf32> to vector<1x1x1x8x4x3xf32>
    %84 = vector.shape_cast %83 : vector<1x1x1x8x4x3xf32> to vector<1x8x4x3xf32>
    %85 = vector.extract_strided_slice %0 {offsets = [0, 1, 2, 1, 0, 0], sizes = [1, 1, 1, 8, 4, 3], strides = [1, 1, 1, 1, 1, 1]} : vector<1x2x4x10x5x3xf32> to vector<1x1x1x8x4x3xf32>
    %86 = vector.shape_cast %85 : vector<1x1x1x8x4x3xf32> to vector<1x8x4x3xf32>
    %87 = vector.extract_strided_slice %0 {offsets = [0, 1, 3, 1, 0, 0], sizes = [1, 1, 1, 8, 4, 3], strides = [1, 1, 1, 1, 1, 1]} : vector<1x2x4x10x5x3xf32> to vector<1x1x1x8x4x3xf32>
    %88 = vector.shape_cast %87 : vector<1x1x1x8x4x3xf32> to vector<1x8x4x3xf32>
    %89 = vector.extract_strided_slice %0 {offsets = [0, 1, 0, 1, 1, 0], sizes = [1, 1, 1, 8, 4, 3], strides = [1, 1, 1, 1, 1, 1]} : vector<1x2x4x10x5x3xf32> to vector<1x1x1x8x4x3xf32>
    %90 = vector.shape_cast %89 : vector<1x1x1x8x4x3xf32> to vector<1x8x4x3xf32>
    %91 = vector.extract_strided_slice %0 {offsets = [0, 1, 1, 1, 1, 0], sizes = [1, 1, 1, 8, 4, 3], strides = [1, 1, 1, 1, 1, 1]} : vector<1x2x4x10x5x3xf32> to vector<1x1x1x8x4x3xf32>
    %92 = vector.shape_cast %91 : vector<1x1x1x8x4x3xf32> to vector<1x8x4x3xf32>
    %93 = vector.extract_strided_slice %0 {offsets = [0, 1, 2, 1, 1, 0], sizes = [1, 1, 1, 8, 4, 3], strides = [1, 1, 1, 1, 1, 1]} : vector<1x2x4x10x5x3xf32> to vector<1x1x1x8x4x3xf32>
    %94 = vector.shape_cast %93 : vector<1x1x1x8x4x3xf32> to vector<1x8x4x3xf32>
    %95 = vector.extract_strided_slice %0 {offsets = [0, 0, 2, 2, 0, 0], sizes = [1, 1, 1, 8, 4, 3], strides = [1, 1, 1, 1, 1, 1]} : vector<1x2x4x10x5x3xf32> to vector<1x1x1x8x4x3xf32>
    %96 = vector.shape_cast %95 : vector<1x1x1x8x4x3xf32> to vector<1x8x4x3xf32>
    %97 = vector.extract_strided_slice %0 {offsets = [0, 0, 3, 2, 0, 0], sizes = [1, 1, 1, 8, 4, 3], strides = [1, 1, 1, 1, 1, 1]} : vector<1x2x4x10x5x3xf32> to vector<1x1x1x8x4x3xf32>
    %98 = vector.shape_cast %97 : vector<1x1x1x8x4x3xf32> to vector<1x8x4x3xf32>
    %99 = vector.extract_strided_slice %0 {offsets = [0, 0, 0, 2, 1, 0], sizes = [1, 1, 1, 8, 4, 3], strides = [1, 1, 1, 1, 1, 1]} : vector<1x2x4x10x5x3xf32> to vector<1x1x1x8x4x3xf32>
    %100 = vector.shape_cast %99 : vector<1x1x1x8x4x3xf32> to vector<1x8x4x3xf32>
    %101 = vector.extract_strided_slice %0 {offsets = [0, 0, 1, 2, 1, 0], sizes = [1, 1, 1, 8, 4, 3], strides = [1, 1, 1, 1, 1, 1]} : vector<1x2x4x10x5x3xf32> to vector<1x1x1x8x4x3xf32>
    %102 = vector.shape_cast %101 : vector<1x1x1x8x4x3xf32> to vector<1x8x4x3xf32>
    %103 = vector.extract_strided_slice %0 {offsets = [0, 0, 2, 2, 1, 0], sizes = [1, 1, 1, 8, 4, 3], strides = [1, 1, 1, 1, 1, 1]} : vector<1x2x4x10x5x3xf32> to vector<1x1x1x8x4x3xf32>
    %104 = vector.shape_cast %103 : vector<1x1x1x8x4x3xf32> to vector<1x8x4x3xf32>
    %105 = tpu.concatenate %56, %58, %60, %62, %64, %66, %68, %70, %72, %74, %76, %78, %80, %82, %84, %86 in 3 : vector<1x8x4x3xf32>, vector<1x8x4x3xf32>, vector<1x8x4x3xf32>, vector<1x8x4x3xf32>, vector<1x8x4x3xf32>, vector<1x8x4x3xf32>, vector<1x8x4x3xf32>, vector<1x8x4x3xf32>, vector<1x8x4x3xf32>, vector<1x8x4x3xf32>, vector<1x8x4x3xf32>, vector<1x8x4x3xf32>, vector<1x8x4x3xf32>, vector<1x8x4x3xf32>, vector<1x8x4x3xf32>, vector<1x8x4x3xf32> -> vector<1x8x4x48xf32>
    %106 = tpu.concatenate %88, %90, %92, %94, %96, %98, %100, %102, %104 in 3 : vector<1x8x4x3xf32>, vector<1x8x4x3xf32>, vector<1x8x4x3xf32>, vector<1x8x4x3xf32>, vector<1x8x4x3xf32>, vector<1x8x4x3xf32>, vector<1x8x4x3xf32>, vector<1x8x4x3xf32>, vector<1x8x4x3xf32> -> vector<1x8x4x27xf32>
    %107 = tpu.concatenate %105, %106 in 3 : vector<1x8x4x48xf32>, vector<1x8x4x27xf32> -> vector<1x8x4x75xf32>
    %108 = vector.shape_cast %54 : vector<1x8x4x75xf32> to vector<1x1x8x4x75xf32>
    %109 = vector.shape_cast %107 : vector<1x8x4x75xf32> to vector<1x1x8x4x75xf32>
    %110 = tpu.concatenate %108, %109 in 1 : vector<1x1x8x4x75xf32>, vector<1x1x8x4x75xf32> -> vector<1x2x8x4x75xf32>
    %111 = vector.shape_cast %110 : vector<1x2x8x4x75xf32> to vector<64x75xf32>
    %cst = arith.constant dense<0.000000e+00> : vector<64x32xf32>
    %112 = tpu.matmul %111, %1, %cst {dimension_numbers = #tpu.dot_dimension_numbers<[1], [0], [0], [1], [0, 0, 1, 1], [], []>} : vector<64x75xf32>, vector<75x32xf32>, vector<64x32xf32> -> vector<64x32xf32>
    %c0_7 = arith.constant 0 : index
    %c0_8 = arith.constant 0 : index
    %113 = vector.load %arg3[%c0_7, %c0_8] : memref<1x32xf32, #tpu.memory_space<vmem>>, vector<1x32xf32>
    %114 = vector.broadcast %113 : vector<1x32xf32> to vector<64x32xf32>
    %115 = arith.addf %112, %114 : vector<64x32xf32>
    %cst_9 = arith.constant 0.000000e+00 : f32
    %116 = vector.broadcast %cst_9 : f32 to vector<64x32xf32>
    %117 = arith.maximumf %115, %116 : vector<64x32xf32>
    %118 = vector.shape_cast %117 : vector<64x32xf32> to vector<1x2x8x4x32xf32>
    %cst_10 = arith.constant 0.000000e+00 : f32
    %119 = vector.broadcast %cst_10 : f32 to vector<1x2x2x6x32xf32>
    %cst_11 = arith.constant 0.000000e+00 : f32
    %120 = vector.broadcast %cst_11 : f32 to vector<1x2x12x1x32xf32>
    %c0_12 = arith.constant 0 : index
    %c0_13 = arith.constant 0 : index
    %c0_14 = arith.constant 0 : index
    %c0_15 = arith.constant 0 : index
    %c0_16 = arith.constant 0 : index
    %121 = vector.load %arg7[%c0_12, %c0_13, %c0_14, %c0_15, %c0_16] : memref<1x2x12x6x32xf32, #tpu.memory_space<vmem>>, vector<1x2x2x6x32xf32>
    tpu.vector_store %arg7[%c0_12, %c0_13, %c0_14, %c0_15, %c0_16], %119 {strides = array<i32>} : memref<1x2x12x6x32xf32, #tpu.memory_space<vmem>>, vector<1x2x2x6x32xf32>,
    %c0_17 = arith.constant 0 : index
    %c0_18 = arith.constant 0 : index
    %c10 = arith.constant 10 : index
    %c0_19 = arith.constant 0 : index
    %c0_20 = arith.constant 0 : index
    %122 = vector.load %arg7[%c0_17, %c0_18, %c10, %c0_19, %c0_20] : memref<1x2x12x6x32xf32, #tpu.memory_space<vmem>>, vector<1x2x2x6x32xf32>
    tpu.vector_store %arg7[%c0_17, %c0_18, %c10, %c0_19, %c0_20], %119 {strides = array<i32>} : memref<1x2x12x6x32xf32, #tpu.memory_space<vmem>>, vector<1x2x2x6x32xf32>,
    %c0_21 = arith.constant 0 : index
    %c0_22 = arith.constant 0 : index
    %c0_23 = arith.constant 0 : index
    %c0_24 = arith.constant 0 : index
    %c0_25 = arith.constant 0 : index
    %123 = vector.load %arg7[%c0_21, %c0_22, %c0_23, %c0_24, %c0_25] : memref<1x2x12x6x32xf32, #tpu.memory_space<vmem>>, vector<1x2x12x1x32xf32>
    tpu.vector_store %arg7[%c0_21, %c0_22, %c0_23, %c0_24, %c0_25], %120 {strides = array<i32>} : memref<1x2x12x6x32xf32, #tpu.memory_space<vmem>>, vector<1x2x12x1x32xf32>,
    %c0_26 = arith.constant 0 : index
    %c0_27 = arith.constant 0 : index
    %c0_28 = arith.constant 0 : index
    %c5 = arith.constant 5 : index
    %c0_29 = arith.constant 0 : index
    %124 = vector.load %arg7[%c0_26, %c0_27, %c0_28, %c5, %c0_29] : memref<1x2x12x6x32xf32, #tpu.memory_space<vmem>>, vector<1x2x12x1x32xf32>
    tpu.vector_store %arg7[%c0_26, %c0_27, %c0_28, %c5, %c0_29], %120 {strides = array<i32>} : memref<1x2x12x6x32xf32, #tpu.memory_space<vmem>>, vector<1x2x12x1x32xf32>,
    %c0_30 = arith.constant 0 : index
    %c0_31 = arith.constant 0 : index
    %c2 = arith.constant 2 : index
    %c1 = arith.constant 1 : index
    %c0_32 = arith.constant 0 : index
    %125 = vector.load %arg7[%c0_30, %c0_31, %c2, %c1, %c0_32] : memref<1x2x12x6x32xf32, #tpu.memory_space<vmem>>, vector<1x2x8x4x32xf32>
    tpu.vector_store %arg7[%c0_30, %c0_31, %c2, %c1, %c0_32], %118 {strides = array<i32>} : memref<1x2x12x6x32xf32, #tpu.memory_space<vmem>>, vector<1x2x8x4x32xf32>,
    %c0_33 = arith.constant 0 : index
    %c0_34 = arith.constant 0 : index
    %c0_35 = arith.constant 0 : index
    %c0_36 = arith.constant 0 : index
    %c0_37 = arith.constant 0 : index
    %126 = vector.load %arg7[%c0_33, %c0_34, %c0_35, %c0_36, %c0_37] : memref<1x2x12x6x32xf32, #tpu.memory_space<vmem>>, vector<1x2x12x6x32xf32>
    %127 = vector.extract_strided_slice %126 {offsets = [0, 0, 0, 0, 0], sizes = [1, 1, 8, 4, 32], strides = [1, 1, 1, 1, 1]} : vector<1x2x12x6x32xf32> to vector<1x1x8x4x32xf32>
    %128 = vector.shape_cast %127 : vector<1x1x8x4x32xf32> to vector<1x8x4x32xf32>
    %129 = vector.shape_cast %128 : vector<1x8x4x32xf32> to vector<1x4x2x4x32xf32>
    %130 = vector.extract_strided_slice %129 {offsets = [0, 0, 0, 0, 0], sizes = [1, 4, 1, 4, 32], strides = [1, 1, 1, 1, 1]} : vector<1x4x2x4x32xf32> to vector<1x4x1x4x32xf32>
    %131 = vector.shape_cast %130 : vector<1x4x1x4x32xf32> to vector<1x4x4x32xf32>
    %132 = vector.extract_strided_slice %126 {offsets = [0, 1, 0, 0, 0], sizes = [1, 1, 8, 4, 32], strides = [1, 1, 1, 1, 1]} : vector<1x2x12x6x32xf32> to vector<1x1x8x4x32xf32>
    %133 = vector.shape_cast %132 : vector<1x1x8x4x32xf32> to vector<1x8x4x32xf32>
    %134 = vector.shape_cast %133 : vector<1x8x4x32xf32> to vector<1x4x2x4x32xf32>
    %135 = vector.extract_strided_slice %134 {offsets = [0, 0, 0, 0, 0], sizes = [1, 4, 1, 4, 32], strides = [1, 1, 1, 1, 1]} : vector<1x4x2x4x32xf32> to vector<1x4x1x4x32xf32>
    %136 = vector.shape_cast %135 : vector<1x4x1x4x32xf32> to vector<1x4x4x32xf32>
    %137 = vector.extract_strided_slice %126 {offsets = [0, 0, 0, 1, 0], sizes = [1, 1, 8, 4, 32], strides = [1, 1, 1, 1, 1]} : vector<1x2x12x6x32xf32> to vector<1x1x8x4x32xf32>
    %138 = vector.shape_cast %137 : vector<1x1x8x4x32xf32> to vector<1x8x4x32xf32>
    %139 = vector.shape_cast %138 : vector<1x8x4x32xf32> to vector<1x4x2x4x32xf32>
    %140 = vector.extract_strided_slice %139 {offsets = [0, 0, 0, 0, 0], sizes = [1, 4, 1, 4, 32], strides = [1, 1, 1, 1, 1]} : vector<1x4x2x4x32xf32> to vector<1x4x1x4x32xf32>
    %141 = vector.shape_cast %140 : vector<1x4x1x4x32xf32> to vector<1x4x4x32xf32>
    %142 = vector.extract_strided_slice %126 {offsets = [0, 1, 0, 1, 0], sizes = [1, 1, 8, 4, 32], strides = [1, 1, 1, 1, 1]} : vector<1x2x12x6x32xf32> to vector<1x1x8x4x32xf32>
    %143 = vector.shape_cast %142 : vector<1x1x8x4x32xf32> to vector<1x8x4x32xf32>
    %144 = vector.shape_cast %143 : vector<1x8x4x32xf32> to vector<1x4x2x4x32xf32>
    %145 = vector.extract_strided_slice %144 {offsets = [0, 0, 0, 0, 0], sizes = [1, 4, 1, 4, 32], strides = [1, 1, 1, 1, 1]} : vector<1x4x2x4x32xf32> to vector<1x4x1x4x32xf32>
    %146 = vector.shape_cast %145 : vector<1x4x1x4x32xf32> to vector<1x4x4x32xf32>
    %147 = vector.extract_strided_slice %126 {offsets = [0, 0, 0, 2, 0], sizes = [1, 1, 8, 4, 32], strides = [1, 1, 1, 1, 1]} : vector<1x2x12x6x32xf32> to vector<1x1x8x4x32xf32>
    %148 = vector.shape_cast %147 : vector<1x1x8x4x32xf32> to vector<1x8x4x32xf32>
    %149 = vector.shape_cast %148 : vector<1x8x4x32xf32> to vector<1x4x2x4x32xf32>
    %150 = vector.extract_strided_slice %149 {offsets = [0, 0, 0, 0, 0], sizes = [1, 4, 1, 4, 32], strides = [1, 1, 1, 1, 1]} : vector<1x4x2x4x32xf32> to vector<1x4x1x4x32xf32>
    %151 = vector.shape_cast %150 : vector<1x4x1x4x32xf32> to vector<1x4x4x32xf32>
    %152 = vector.extract_strided_slice %126 {offsets = [0, 0, 1, 0, 0], sizes = [1, 1, 8, 4, 32], strides = [1, 1, 1, 1, 1]} : vector<1x2x12x6x32xf32> to vector<1x1x8x4x32xf32>
    %153 = vector.shape_cast %152 : vector<1x1x8x4x32xf32> to vector<1x8x4x32xf32>
    %154 = vector.shape_cast %153 : vector<1x8x4x32xf32> to vector<1x4x2x4x32xf32>
    %155 = vector.extract_strided_slice %154 {offsets = [0, 0, 0, 0, 0], sizes = [1, 4, 1, 4, 32], strides = [1, 1, 1, 1, 1]} : vector<1x4x2x4x32xf32> to vector<1x4x1x4x32xf32>
    %156 = vector.shape_cast %155 : vector<1x4x1x4x32xf32> to vector<1x4x4x32xf32>
    %157 = vector.extract_strided_slice %126 {offsets = [0, 1, 1, 0, 0], sizes = [1, 1, 8, 4, 32], strides = [1, 1, 1, 1, 1]} : vector<1x2x12x6x32xf32> to vector<1x1x8x4x32xf32>
    %158 = vector.shape_cast %157 : vector<1x1x8x4x32xf32> to vector<1x8x4x32xf32>
    %159 = vector.shape_cast %158 : vector<1x8x4x32xf32> to vector<1x4x2x4x32xf32>
    %160 = vector.extract_strided_slice %159 {offsets = [0, 0, 0, 0, 0], sizes = [1, 4, 1, 4, 32], strides = [1, 1, 1, 1, 1]} : vector<1x4x2x4x32xf32> to vector<1x4x1x4x32xf32>
    %161 = vector.shape_cast %160 : vector<1x4x1x4x32xf32> to vector<1x4x4x32xf32>
    %162 = vector.extract_strided_slice %126 {offsets = [0, 0, 1, 1, 0], sizes = [1, 1, 8, 4, 32], strides = [1, 1, 1, 1, 1]} : vector<1x2x12x6x32xf32> to vector<1x1x8x4x32xf32>
    %163 = vector.shape_cast %162 : vector<1x1x8x4x32xf32> to vector<1x8x4x32xf32>
    %164 = vector.shape_cast %163 : vector<1x8x4x32xf32> to vector<1x4x2x4x32xf32>
    %165 = vector.extract_strided_slice %164 {offsets = [0, 0, 0, 0, 0], sizes = [1, 4, 1, 4, 32], strides = [1, 1, 1, 1, 1]} : vector<1x4x2x4x32xf32> to vector<1x4x1x4x32xf32>
    %166 = vector.shape_cast %165 : vector<1x4x1x4x32xf32> to vector<1x4x4x32xf32>
    %167 = vector.extract_strided_slice %126 {offsets = [0, 1, 1, 1, 0], sizes = [1, 1, 8, 4, 32], strides = [1, 1, 1, 1, 1]} : vector<1x2x12x6x32xf32> to vector<1x1x8x4x32xf32>
    %168 = vector.shape_cast %167 : vector<1x1x8x4x32xf32> to vector<1x8x4x32xf32>
    %169 = vector.shape_cast %168 : vector<1x8x4x32xf32> to vector<1x4x2x4x32xf32>
    %170 = vector.extract_strided_slice %169 {offsets = [0, 0, 0, 0, 0], sizes = [1, 4, 1, 4, 32], strides = [1, 1, 1, 1, 1]} : vector<1x4x2x4x32xf32> to vector<1x4x1x4x32xf32>
    %171 = vector.shape_cast %170 : vector<1x4x1x4x32xf32> to vector<1x4x4x32xf32>
    %172 = vector.extract_strided_slice %126 {offsets = [0, 0, 1, 2, 0], sizes = [1, 1, 8, 4, 32], strides = [1, 1, 1, 1, 1]} : vector<1x2x12x6x32xf32> to vector<1x1x8x4x32xf32>
    %173 = vector.shape_cast %172 : vector<1x1x8x4x32xf32> to vector<1x8x4x32xf32>
    %174 = vector.shape_cast %173 : vector<1x8x4x32xf32> to vector<1x4x2x4x32xf32>
    %175 = vector.extract_strided_slice %174 {offsets = [0, 0, 0, 0, 0], sizes = [1, 4, 1, 4, 32], strides = [1, 1, 1, 1, 1]} : vector<1x4x2x4x32xf32> to vector<1x4x1x4x32xf32>
    %176 = vector.shape_cast %175 : vector<1x4x1x4x32xf32> to vector<1x4x4x32xf32>
    %177 = vector.extract_strided_slice %126 {offsets = [0, 0, 2, 0, 0], sizes = [1, 1, 8, 4, 32], strides = [1, 1, 1, 1, 1]} : vector<1x2x12x6x32xf32> to vector<1x1x8x4x32xf32>
    %178 = vector.shape_cast %177 : vector<1x1x8x4x32xf32> to vector<1x8x4x32xf32>
    %179 = vector.shape_cast %178 : vector<1x8x4x32xf32> to vector<1x4x2x4x32xf32>
    %180 = vector.extract_strided_slice %179 {offsets = [0, 0, 0, 0, 0], sizes = [1, 4, 1, 4, 32], strides = [1, 1, 1, 1, 1]} : vector<1x4x2x4x32xf32> to vector<1x4x1x4x32xf32>
    %181 = vector.shape_cast %180 : vector<1x4x1x4x32xf32> to vector<1x4x4x32xf32>
    %182 = vector.extract_strided_slice %126 {offsets = [0, 1, 2, 0, 0], sizes = [1, 1, 8, 4, 32], strides = [1, 1, 1, 1, 1]} : vector<1x2x12x6x32xf32> to vector<1x1x8x4x32xf32>
    %183 = vector.shape_cast %182 : vector<1x1x8x4x32xf32> to vector<1x8x4x32xf32>
    %184 = vector.shape_cast %183 : vector<1x8x4x32xf32> to vector<1x4x2x4x32xf32>
    %185 = vector.extract_strided_slice %184 {offsets = [0, 0, 0, 0, 0], sizes = [1, 4, 1, 4, 32], strides = [1, 1, 1, 1, 1]} : vector<1x4x2x4x32xf32> to vector<1x4x1x4x32xf32>
    %186 = vector.shape_cast %185 : vector<1x4x1x4x32xf32> to vector<1x4x4x32xf32>
    %187 = vector.extract_strided_slice %126 {offsets = [0, 0, 2, 1, 0], sizes = [1, 1, 8, 4, 32], strides = [1, 1, 1, 1, 1]} : vector<1x2x12x6x32xf32> to vector<1x1x8x4x32xf32>
    %188 = vector.shape_cast %187 : vector<1x1x8x4x32xf32> to vector<1x8x4x32xf32>
    %189 = vector.shape_cast %188 : vector<1x8x4x32xf32> to vector<1x4x2x4x32xf32>
    %190 = vector.extract_strided_slice %189 {offsets = [0, 0, 0, 0, 0], sizes = [1, 4, 1, 4, 32], strides = [1, 1, 1, 1, 1]} : vector<1x4x2x4x32xf32> to vector<1x4x1x4x32xf32>
    %191 = vector.shape_cast %190 : vector<1x4x1x4x32xf32> to vector<1x4x4x32xf32>
    %192 = vector.extract_strided_slice %126 {offsets = [0, 1, 2, 1, 0], sizes = [1, 1, 8, 4, 32], strides = [1, 1, 1, 1, 1]} : vector<1x2x12x6x32xf32> to vector<1x1x8x4x32xf32>
    %193 = vector.shape_cast %192 : vector<1x1x8x4x32xf32> to vector<1x8x4x32xf32>
    %194 = vector.shape_cast %193 : vector<1x8x4x32xf32> to vector<1x4x2x4x32xf32>
    %195 = vector.extract_strided_slice %194 {offsets = [0, 0, 0, 0, 0], sizes = [1, 4, 1, 4, 32], strides = [1, 1, 1, 1, 1]} : vector<1x4x2x4x32xf32> to vector<1x4x1x4x32xf32>
    %196 = vector.shape_cast %195 : vector<1x4x1x4x32xf32> to vector<1x4x4x32xf32>
    %197 = vector.extract_strided_slice %126 {offsets = [0, 0, 2, 2, 0], sizes = [1, 1, 8, 4, 32], strides = [1, 1, 1, 1, 1]} : vector<1x2x12x6x32xf32> to vector<1x1x8x4x32xf32>
    %198 = vector.shape_cast %197 : vector<1x1x8x4x32xf32> to vector<1x8x4x32xf32>
    %199 = vector.shape_cast %198 : vector<1x8x4x32xf32> to vector<1x4x2x4x32xf32>
    %200 = vector.extract_strided_slice %199 {offsets = [0, 0, 0, 0, 0], sizes = [1, 4, 1, 4, 32], strides = [1, 1, 1, 1, 1]} : vector<1x4x2x4x32xf32> to vector<1x4x1x4x32xf32>
    %201 = vector.shape_cast %200 : vector<1x4x1x4x32xf32> to vector<1x4x4x32xf32>
    %202 = vector.extract_strided_slice %126 {offsets = [0, 0, 3, 0, 0], sizes = [1, 1, 8, 4, 32], strides = [1, 1, 1, 1, 1]} : vector<1x2x12x6x32xf32> to vector<1x1x8x4x32xf32>
    %203 = vector.shape_cast %202 : vector<1x1x8x4x32xf32> to vector<1x8x4x32xf32>
    %204 = vector.shape_cast %203 : vector<1x8x4x32xf32> to vector<1x4x2x4x32xf32>
    %205 = vector.extract_strided_slice %204 {offsets = [0, 0, 0, 0, 0], sizes = [1, 4, 1, 4, 32], strides = [1, 1, 1, 1, 1]} : vector<1x4x2x4x32xf32> to vector<1x4x1x4x32xf32>
    %206 = vector.shape_cast %205 : vector<1x4x1x4x32xf32> to vector<1x4x4x32xf32>
    %207 = vector.extract_strided_slice %126 {offsets = [0, 1, 3, 0, 0], sizes = [1, 1, 8, 4, 32], strides = [1, 1, 1, 1, 1]} : vector<1x2x12x6x32xf32> to vector<1x1x8x4x32xf32>
    %208 = vector.shape_cast %207 : vector<1x1x8x4x32xf32> to vector<1x8x4x32xf32>
    %209 = vector.shape_cast %208 : vector<1x8x4x32xf32> to vector<1x4x2x4x32xf32>
    %210 = vector.extract_strided_slice %209 {offsets = [0, 0, 0, 0, 0], sizes = [1, 4, 1, 4, 32], strides = [1, 1, 1, 1, 1]} : vector<1x4x2x4x32xf32> to vector<1x4x1x4x32xf32>
    %211 = vector.shape_cast %210 : vector<1x4x1x4x32xf32> to vector<1x4x4x32xf32>
    %212 = vector.extract_strided_slice %126 {offsets = [0, 0, 3, 1, 0], sizes = [1, 1, 8, 4, 32], strides = [1, 1, 1, 1, 1]} : vector<1x2x12x6x32xf32> to vector<1x1x8x4x32xf32>
    %213 = vector.shape_cast %212 : vector<1x1x8x4x32xf32> to vector<1x8x4x32xf32>
    %214 = vector.shape_cast %213 : vector<1x8x4x32xf32> to vector<1x4x2x4x32xf32>
    %215 = vector.extract_strided_slice %214 {offsets = [0, 0, 0, 0, 0], sizes = [1, 4, 1, 4, 32], strides = [1, 1, 1, 1, 1]} : vector<1x4x2x4x32xf32> to vector<1x4x1x4x32xf32>
    %216 = vector.shape_cast %215 : vector<1x4x1x4x32xf32> to vector<1x4x4x32xf32>
    %217 = vector.extract_strided_slice %126 {offsets = [0, 1, 3, 1, 0], sizes = [1, 1, 8, 4, 32], strides = [1, 1, 1, 1, 1]} : vector<1x2x12x6x32xf32> to vector<1x1x8x4x32xf32>
    %218 = vector.shape_cast %217 : vector<1x1x8x4x32xf32> to vector<1x8x4x32xf32>
    %219 = vector.shape_cast %218 : vector<1x8x4x32xf32> to vector<1x4x2x4x32xf32>
    %220 = vector.extract_strided_slice %219 {offsets = [0, 0, 0, 0, 0], sizes = [1, 4, 1, 4, 32], strides = [1, 1, 1, 1, 1]} : vector<1x4x2x4x32xf32> to vector<1x4x1x4x32xf32>
    %221 = vector.shape_cast %220 : vector<1x4x1x4x32xf32> to vector<1x4x4x32xf32>
    %222 = vector.extract_strided_slice %126 {offsets = [0, 0, 3, 2, 0], sizes = [1, 1, 8, 4, 32], strides = [1, 1, 1, 1, 1]} : vector<1x2x12x6x32xf32> to vector<1x1x8x4x32xf32>
    %223 = vector.shape_cast %222 : vector<1x1x8x4x32xf32> to vector<1x8x4x32xf32>
    %224 = vector.shape_cast %223 : vector<1x8x4x32xf32> to vector<1x4x2x4x32xf32>
    %225 = vector.extract_strided_slice %224 {offsets = [0, 0, 0, 0, 0], sizes = [1, 4, 1, 4, 32], strides = [1, 1, 1, 1, 1]} : vector<1x4x2x4x32xf32> to vector<1x4x1x4x32xf32>
    %226 = vector.shape_cast %225 : vector<1x4x1x4x32xf32> to vector<1x4x4x32xf32>
    %227 = vector.extract_strided_slice %126 {offsets = [0, 0, 4, 0, 0], sizes = [1, 1, 8, 4, 32], strides = [1, 1, 1, 1, 1]} : vector<1x2x12x6x32xf32> to vector<1x1x8x4x32xf32>
    %228 = vector.shape_cast %227 : vector<1x1x8x4x32xf32> to vector<1x8x4x32xf32>
    %229 = vector.shape_cast %228 : vector<1x8x4x32xf32> to vector<1x4x2x4x32xf32>
    %230 = vector.extract_strided_slice %229 {offsets = [0, 0, 0, 0, 0], sizes = [1, 4, 1, 4, 32], strides = [1, 1, 1, 1, 1]} : vector<1x4x2x4x32xf32> to vector<1x4x1x4x32xf32>
    %231 = vector.shape_cast %230 : vector<1x4x1x4x32xf32> to vector<1x4x4x32xf32>
    %232 = vector.extract_strided_slice %126 {offsets = [0, 1, 4, 0, 0], sizes = [1, 1, 8, 4, 32], strides = [1, 1, 1, 1, 1]} : vector<1x2x12x6x32xf32> to vector<1x1x8x4x32xf32>
    %233 = vector.shape_cast %232 : vector<1x1x8x4x32xf32> to vector<1x8x4x32xf32>
    %234 = vector.shape_cast %233 : vector<1x8x4x32xf32> to vector<1x4x2x4x32xf32>
    %235 = vector.extract_strided_slice %234 {offsets = [0, 0, 0, 0, 0], sizes = [1, 4, 1, 4, 32], strides = [1, 1, 1, 1, 1]} : vector<1x4x2x4x32xf32> to vector<1x4x1x4x32xf32>
    %236 = vector.shape_cast %235 : vector<1x4x1x4x32xf32> to vector<1x4x4x32xf32>
    %237 = vector.extract_strided_slice %126 {offsets = [0, 0, 4, 1, 0], sizes = [1, 1, 8, 4, 32], strides = [1, 1, 1, 1, 1]} : vector<1x2x12x6x32xf32> to vector<1x1x8x4x32xf32>
    %238 = vector.shape_cast %237 : vector<1x1x8x4x32xf32> to vector<1x8x4x32xf32>
    %239 = vector.shape_cast %238 : vector<1x8x4x32xf32> to vector<1x4x2x4x32xf32>
    %240 = vector.extract_strided_slice %239 {offsets = [0, 0, 0, 0, 0], sizes = [1, 4, 1, 4, 32], strides = [1, 1, 1, 1, 1]} : vector<1x4x2x4x32xf32> to vector<1x4x1x4x32xf32>
    %241 = vector.shape_cast %240 : vector<1x4x1x4x32xf32> to vector<1x4x4x32xf32>
    %242 = vector.extract_strided_slice %126 {offsets = [0, 1, 4, 1, 0], sizes = [1, 1, 8, 4, 32], strides = [1, 1, 1, 1, 1]} : vector<1x2x12x6x32xf32> to vector<1x1x8x4x32xf32>
    %243 = vector.shape_cast %242 : vector<1x1x8x4x32xf32> to vector<1x8x4x32xf32>
    %244 = vector.shape_cast %243 : vector<1x8x4x32xf32> to vector<1x4x2x4x32xf32>
    %245 = vector.extract_strided_slice %244 {offsets = [0, 0, 0, 0, 0], sizes = [1, 4, 1, 4, 32], strides = [1, 1, 1, 1, 1]} : vector<1x4x2x4x32xf32> to vector<1x4x1x4x32xf32>
    %246 = vector.shape_cast %245 : vector<1x4x1x4x32xf32> to vector<1x4x4x32xf32>
    %247 = vector.extract_strided_slice %126 {offsets = [0, 0, 4, 2, 0], sizes = [1, 1, 8, 4, 32], strides = [1, 1, 1, 1, 1]} : vector<1x2x12x6x32xf32> to vector<1x1x8x4x32xf32>
    %248 = vector.shape_cast %247 : vector<1x1x8x4x32xf32> to vector<1x8x4x32xf32>
    %249 = vector.shape_cast %248 : vector<1x8x4x32xf32> to vector<1x4x2x4x32xf32>
    %250 = vector.extract_strided_slice %249 {offsets = [0, 0, 0, 0, 0], sizes = [1, 4, 1, 4, 32], strides = [1, 1, 1, 1, 1]} : vector<1x4x2x4x32xf32> to vector<1x4x1x4x32xf32>
    %251 = vector.shape_cast %250 : vector<1x4x1x4x32xf32> to vector<1x4x4x32xf32>
    %252 = tpu.concatenate %131, %136, %141, %146, %151, %156, %161, %166, %171, %176, %181, %186, %191, %196, %201, %206 in 3 : vector<1x4x4x32xf32>, vector<1x4x4x32xf32>, vector<1x4x4x32xf32>, vector<1x4x4x32xf32>, vector<1x4x4x32xf32>, vector<1x4x4x32xf32>, vector<1x4x4x32xf32>, vector<1x4x4x32xf32>, vector<1x4x4x32xf32>, vector<1x4x4x32xf32>, vector<1x4x4x32xf32>, vector<1x4x4x32xf32>, vector<1x4x4x32xf32>, vector<1x4x4x32xf32>, vector<1x4x4x32xf32>, vector<1x4x4x32xf32> -> vector<1x4x4x512xf32>
    %253 = tpu.concatenate %211, %216, %221, %226, %231, %236, %241, %246, %251 in 3 : vector<1x4x4x32xf32>, vector<1x4x4x32xf32>, vector<1x4x4x32xf32>, vector<1x4x4x32xf32>, vector<1x4x4x32xf32>, vector<1x4x4x32xf32>, vector<1x4x4x32xf32>, vector<1x4x4x32xf32>, vector<1x4x4x32xf32> -> vector<1x4x4x288xf32>
    %254 = tpu.concatenate %252, %253 in 3 : vector<1x4x4x512xf32>, vector<1x4x4x288xf32> -> vector<1x4x4x800xf32>
    %255 = vector.shape_cast %254 : vector<1x4x4x800xf32> to vector<16x800xf32>
    %c0_38 = arith.constant 0 : index
    %c0_39 = arith.constant 0 : index
    %256 = vector.load %arg4[%c0_38, %c0_39] : memref<800x128xf32, #tpu.memory_space<vmem>>, vector<800x128xf32>
    %cst_40 = arith.constant dense<0.000000e+00> : vector<16x128xf32>
    %257 = tpu.matmul %255, %256, %cst_40 {dimension_numbers = #tpu.dot_dimension_numbers<[1], [0], [0], [1], [0, 0, 1, 1], [], []>} : vector<16x800xf32>, vector<800x128xf32>, vector<16x128xf32> -> vector<16x128xf32>
    %c0_41 = arith.constant 0 : index
    %c0_42 = arith.constant 0 : index
    %258 = vector.load %arg5[%c0_41, %c0_42] : memref<1x128xf32, #tpu.memory_space<vmem>>, vector<1x128xf32>
    %259 = vector.broadcast %258 : vector<1x128xf32> to vector<16x128xf32>
    %260 = arith.addf %257, %259 : vector<16x128xf32>
    %cst_43 = arith.constant 0.000000e+00 : f32
    %261 = vector.broadcast %cst_43 : f32 to vector<16x128xf32>
    %262 = arith.maximumf %260, %261 : vector<16x128xf32>
    %c0_44 = arith.constant 0 : index
    %c0_45 = arith.constant 0 : index
    %263 = vector.load %arg6[%c0_44, %c0_45] : memref<16x128xf32, #tpu.memory_space<vmem>>, vector<16x128xf32>
    tpu.vector_store %arg6[%c0_44, %c0_45], %262 {strides = array<i32>} : memref<16x128xf32, #tpu.memory_space<vmem>>, vector<16x128xf32>,
    return
  }
  func.func @transform_0(%arg0: i32) -> (i32, i32, i32, i32, i32, i32) {
    %c0_i32 = arith.constant 0 : i32
    %c0_i32_0 = arith.constant 0 : i32
    %c0_i32_1 = arith.constant 0 : i32
    %c0_i32_2 = arith.constant 0 : i32
    %c0_i32_3 = arith.constant 0 : i32
    %c0_i32_4 = arith.constant 0 : i32
    return %arg0, %c0_i32, %c0_i32_0, %c0_i32_1, %c0_i32_2, %c0_i32_3 : i32, i32, i32, i32, i32, i32
  }
  func.func @transform_1(%arg0: i32) -> (i32, i32) {
    %c0_i32 = arith.constant 0 : i32
    %c0_i32_0 = arith.constant 0 : i32
    %c0_i32_1 = arith.constant 0 : i32
    return %c0_i32, %c0_i32_0 : i32, i32
  }
  func.func @transform_2(%arg0: i32) -> (i32, i32) {
    %c0_i32 = arith.constant 0 : i32
    %c0_i32_0 = arith.constant 0 : i32
    %c0_i32_1 = arith.constant 0 : i32
    return %c0_i32, %c0_i32_0 : i32, i32
  }
  func.func @transform_3(%arg0: i32) -> (i32, i32) {
    %c0_i32 = arith.constant 0 : i32
    %c0_i32_0 = arith.constant 0 : i32
    %c0_i32_1 = arith.constant 0 : i32
    return %c0_i32, %c0_i32_0 : i32, i32
  }
  func.func @transform_4(%arg0: i32) -> (i32, i32) {
    %c0_i32 = arith.constant 0 : i32
    %c0_i32_0 = arith.constant 0 : i32
    %c0_i32_1 = arith.constant 0 : i32
    return %c0_i32, %c0_i32_0 : i32, i32
  }
  func.func @transform_5(%arg0: i32) -> (i32, i32) {
    %c0_i32 = arith.constant 0 : i32
    %c0_i32_0 = arith.constant 0 : i32
    return %arg0, %c0_i32 : i32, i32
  }
}

</mosaic_0001>

<bundles_post_ra>
// kernel: tpu_custom_call.1
= control target key start
LH: loop header
LB: loop body
LE: loop exit
PB: predicated region body
PF: predicated region fallthrough
CT: control target
= control target key end

     0   :  { %10 = vsyncpa [#allocation4], 0  ;;  %s7099_s0 = inlined_call_operand.vmem [shape: f32[2,2,4,10,5,3], index: 0, kind: input, shape index: {}]   ;;  %s7100_s1 = inlined_call_operand.vmem [shape: f32[75,32], index: 1, kind: input, shape index: {}]   ;;  %s7101_s2 = inlined_call_operand.vmem [shape: f32[1,32], index: 2, kind: input, shape index: {}]   ;;  %s7102_s3 = inlined_call_operand.vmem [shape: f32[800,128], index: 3, kind: input, shape index: {}]   ;;  %s7103_s4 = inlined_call_operand.vmem [shape: f32[1,128], index: 4, kind: input, shape index: {}]   ;;  %s7104_s5 = inlined_call_operand.hbm [shape: f32[32,128], index: 5, kind: output, shape index: {}]  }
   0x1   :  { %12 = vsyncpa [#allocation4 + $0x1], 0  ;;  %s3640_s18 = smov 0   ;;  %s3642_s19 = smov 0  }
   0x2   :  { %s3644_s20 = smov 0   ;;  %s3646_s21 = smov 0  }
   0x3 LB: > { %s3661_s22 = sadd.s32 4294967295, %s3585_s21   ;;  %s3184_s23 = sadd.s32 4294967294, %s3585_s21   ;;  %s3585_s21 = sphi %s3646_s21, %s7855_s21   ;;  %s3581_s20 = sphi %s3644_s20, %s7854_s20   ;;  %s3577_s19 = sphi %s3642_s19, %s7853_s19   ;;  %s3573_s18 = sphi %s3640_s18, %s7852_s18  }
   0x4   : > { %s3665_s24 = sadd.s32 1, %s3585_s21   ;;  %s135_s25 = sadd.s32 1, %s3581_s20 }
   0x5   : > { %s132_s26 = ssub.s32 %s3585_s21, %s3665_s24  ;;  %p145_p0 = scmp.ne.s32.totalorder %s3581_s20, %s3577_s19 }
   0x6   : > { %p133_p1 = scmp.eq.s32.totalorder %s132_s26, 0  ;;  %p146_p2 = scmp.eq.s32.totalorder %s3661_s22, 1 }
   0x7   : > { %p151_p3 = scmp.ne.s32.totalorder %s3577_s19, %s3573_s18  ;;  %p152_p4 = scmp.eq.s32.totalorder %s3184_s23, 1 }
   0x8   : > { %s3676_s27 = scalar_select %p133_p1, %s3581_s20, %s135_s25  }
   0x9   : > { %p3678_p5 = por %p146_p2, %p145_p0  ;;  %p3682_p6 = por %p152_p4, %p151_p3 }
   0xa   : > { %p3187_p7 = scmp.ge.s32.totalorder %s3585_s21, 1  ;;  %p190_p8 = scmp.lt.s32.totalorder %s3585_s21, 3 }
   0xc   : > { %p191_p9 = pnand %p3187_p7, %p190_p8 }
   0xe   : > { %194 = sbr.rel (%p191_p9) target bundleno = 1566 (0x61e), region = 40 }
  0x13   : > { %p218_p10 = scmp.lt.s32.totalorder %s3661_s22, 1  ;;  %s7203_s10 = smov 3   ;;  %vm2059_vm0 = vcmask 1042432   ;;  %vm756_vm1 = vcmask 23552   ;;  %vm7210_vm2 = vcmask 48128   ;;  %vm774_vm3 = vcmask 72704  }
  0x14   : > { %s7198_s11 = smov 6   ;;  %s7196_s12 = smov 9   ;;  %vm783_vm4 = vcmask 97280   ;;  %vm792_vm5 = vcmask 121856   ;;  %vm801_vm6 = vcmask 146432   ;;  %vm810_vm7 = vcmask 171008  }
  0x15   : > { %s219_s30 = scalar_select %p218_p10, %s3661_s22, 1  ;;  %vm819_vm8 = vcmask 195584   ;;  %vm828_vm9 = vcmask 220160   ;;  %vm837_vm10 = vcmask 244736   ;;  %vm846_vm11 = vcmask 269312  }
  0x16   : > { %s7201_s13 = smov 12   ;;  %s3591_s14 = smov 15   ;;  %vm7222_vm12 = vcmask 293888   ;;  %vm7221_vm13 = vcmask 318464   ;;  %vm7220_vm14 = vcmask 343040   ;;  %vm882_vm15 = vcmask 367616  }
  0x17   : > { %s3402_s6 = smul.u32 640, %s219_s30  ;;  %s7208_s15 = smov 18  }
  0x18   : > { %s3593_s16 = smov 21   ;;  %s3594_s17 = smov 24  }
  0x19   : > { %s3693_s9 = scalar_lea.vmem %s7099_s0, %s3402_s6  ;;  %s3595_s23 = smov 27  }
  0x1a   : > { %v3696_v0 = vld [vmem:[%s3693_s9 + $0x60] sm:$0x1f]  ;;  %v234_v1 = vld [vmem:[%s3693_s9 + $0x50] sm:$0x1f]  ;;  %v3703_v2 = vld [vmem:[%s3693_s9 + $0x68] sm:$0x1f] }
  0x1b   : > { %322 = vrot.lane.b32.xlu1 %v3696_v0, %s7203_s10  ;;  %318 = vrot.lane.b32.xlu0 %v234_v1, %s7203_s10  ;;  %v3706_v3 = vld [vmem:[%s3693_s9 + $0x58] sm:$0x1f]  ;;  %v3716_v5 = vld [vmem:[%s3693_s9 + $0x70] sm:$0x1f]  ;;  %s3596_s25 = smov 30   ;;  %s3597_s26 = smov 33  }
  0x1c   : > { %v3713_v4 = vld [vmem:[%s3693_s9 + $0x78] sm:$0x1f]  ;;  %v3723_v6 = vld [vmem:[%s3693_s9 + $0x88] sm:$0x1f]  ;;  %v3726_v7 = vld [vmem:[%s3693_s9 + $0x80] sm:$0x1f] }
  0x1d   : > { %v3733_v8 = vld [vmem:[%s3693_s9 + $0xa8] sm:$0x1f]  ;;  %v244_v9 = vld [vmem:[%s3693_s9 + $0xa0] sm:$0x1f]  ;;  %v3740_v10 = vld [vmem:[%s3693_s9 + $0xb8] sm:$0x1f] }
  0x1e   : > { %v3743_v11 = vld [vmem:[%s3693_s9 + $0xb0] sm:$0x1f]  ;;  %v3750_v12 = vld [vmem:[%s3693_s9 + $0xc8] sm:$0x1f]  ;;  %v3753_v13 = vld [vmem:[%s3693_s9 + $0xc0] sm:$0x1f] }
  0x1f   : > { %324 = vrot.lane.b32.xlu1 %v3703_v2, %s7203_s10  ;;  %320 = vrot.lane.b32.xlu0 %v3706_v3, %s7203_s10  ;;  %v3760_v14 = vld [vmem:[%s3693_s9 + $0xd8] sm:$0x1f]  ;;  %v3763_v15 = vld [vmem:[%s3693_s9 + $0xd0] sm:$0x1f]  ;;  %s3598_s30 = smov 36   ;;  %s3599_s6 = smov 39  }
  0x20   : > { %v3770_v16 = vld [vmem:[%s3693_s9 + $0xf8] sm:$0x1f]  ;;  %v254_v17 = vld [vmem:[%s3693_s9 + $0xf0] sm:$0x1f]  ;;  %v3777_v18 = vld [vmem:[%s3693_s9 + $0x108] sm:$0x1f] }
  0x21   : > { %v3780_v19 = vld [vmem:[%s3693_s9 + $0x100] sm:$0x1f]  ;;  %v3787_v20 = vld [vmem:[%s3693_s9 + $0x118] sm:$0x1f]  ;;  %v3790_v21 = vld [vmem:[%s3693_s9 + $0x110] sm:$0x1f] }
  0x22   : > { %v3797_v22 = vld [vmem:[%s3693_s9 + $0x128] sm:$0x1f]  ;;  %v3800_v23 = vld [vmem:[%s3693_s9 + $0x120] sm:$0x1f]  ;;  %v3817_v28 = vld [vmem:[%s3693_s9 + $0x18] sm:$0x1f] }
  0x23   : > { %328 = vrot.lane.b32.xlu1 %v3713_v4, %s7203_s10  ;;  %326 = vrot.lane.b32.xlu0 %v3716_v5, %s7203_s10  ;;  %v3803_v24 = vld [vmem:[%s3693_s9 + $0x8] sm:$0x1f]  ;;  %v3806_v25 = vld [vmem:[%s3693_s9] sm:$0x1f]  ;;  %v3828_v30 = vrot.slane %v3817_v28, 1  ;;  %s3600_s7 = smov 42  }
  0x24   : > { %7228 = vst [vmem:[#allocation6_spill] sm:$0xff] %v3806_v25  ;;  %v3813_v26 = vrot.slane %v3803_v24, 1  ;;  %v7105_v27 = vrot.slane %v3806_v25, 1  ;;  %v3820_v29 = vld [vmem:[%s3693_s9 + $0x10] sm:$0x1f]  ;;  %s3601_s8 = smov 45  }
  0x25   : > { %v3831_v31 = vrot.slane %v3820_v29, 1  ;;  %v3834_v32 = vld [vmem:[%s3693_s9 + $0x28] sm:$0x1f]  ;;  %v3837_v33 = vld [vmem:[%s3693_s9 + $0x20] sm:$0x1f] }
  0x26   : > { %v3844_v34 = vrot.slane %v3834_v32, 1  ;;  %v3847_v35 = vrot.slane %v3837_v33, 1  ;;  %v3850_v36 = vld [vmem:[%s3693_s9 + $0x38] sm:$0x1f]  ;;  %v3853_v37 = vld [vmem:[%s3693_s9 + $0x30] sm:$0x1f] }
  0x27   : > { %332 = vrot.lane.b32.xlu1 %v3723_v6, %s7203_s10  ;;  %330 = vrot.lane.b32.xlu0 %v3726_v7, %s7203_s10  ;;  %v3860_v38 = vrot.slane %v3850_v36, 1  ;;  %v3863_v39 = vrot.slane %v3853_v37, 1  ;;  %v3870_v40 = vld [vmem:[%s3693_s9 + $0x148] sm:$0x1f]  ;;  %v3873_v41 = vld [vmem:[%s3693_s9 + $0x140] sm:$0x1f] }
  0x28   : > { %7229 = vst [vmem:[#allocation7_spill] sm:$0xff] %v3844_v34  ;;  %7230 = vst [vmem:[#allocation8_spill] sm:$0xff] %v3847_v35  ;;  %v3880_v42 = vld [vmem:[%s3693_s9 + $0x158] sm:$0x1f]  ;;  %v3883_v43 = vld [vmem:[%s3693_s9 + $0x150] sm:$0x1f] }
  0x29   : > { %7231 = vst [vmem:[#allocation9_spill] sm:$0xff] %v3860_v38  ;;  %7232 = vst [vmem:[#allocation10_spill] sm:$0xff] %v3863_v39  ;;  %v3890_v44 = vld [vmem:[%s3693_s9 + $0x168] sm:$0x1f]  ;;  %v3893_v45 = vld [vmem:[%s3693_s9 + $0x160] sm:$0x1f] }
  0x2a   : > { %7233 = vst [vmem:[#allocation11_spill] sm:$0xff] %v3873_v41  ;;  %v3900_v46 = vld [vmem:[%s3693_s9 + $0x178] sm:$0x1f]  ;;  %v3903_v47 = vld [vmem:[%s3693_s9 + $0x170] sm:$0x1f] }
  0x2b   : > { %352 = vrot.lane.b32.xlu1 %v3733_v8, %s7198_s11  ;;  %350 = vrot.lane.b32.xlu0 %v244_v9, %s7198_s11  ;;  %v3910_v48 = vld [vmem:[%s3693_s9 + $0x198] sm:$0x1f]  ;;  %v273_v49 = vld [vmem:[%s3693_s9 + $0x190] sm:$0x1f] }
  0x2c   : > { %7234 = vst [vmem:[#allocation12_spill] sm:$0xff] %v3910_v48  ;;  %v3917_v50 = vld [vmem:[%s3693_s9 + $0x1a8] sm:$0x1f]  ;;  %v3920_v51 = vld [vmem:[%s3693_s9 + $0x1a0] sm:$0x1f] }
  0x2d   : > { %7235 = vst [vmem:[#allocation13_spill] sm:$0xff] %v3917_v50  ;;  %7236 = vst [vmem:[#allocation14_spill] sm:$0xff] %v3920_v51  ;;  %v3927_v52 = vld [vmem:[%s3693_s9 + $0x1b8] sm:$0x1f]  ;;  %v3930_v53 = vld [vmem:[%s3693_s9 + $0x1b0] sm:$0x1f] }
  0x2e   : > { %7237 = vst [vmem:[#allocation15_spill] sm:$0xff] %v3927_v52  ;;  %7238 = vst [vmem:[#allocation16_spill] sm:$0xff] %v3930_v53  ;;  %v3937_v54 = vld [vmem:[%s3693_s9 + $0x1c8] sm:$0x1f]  ;;  %v3940_v55 = vld [vmem:[%s3693_s9 + $0x1c0] sm:$0x1f] }
  0x2f   : > { %356 = vrot.lane.b32.xlu1 %v3740_v10, %s7198_s11  ;;  %354 = vrot.lane.b32.xlu0 %v3743_v11, %s7198_s11  ;;  %7239 = vst [vmem:[#allocation17_spill] sm:$0xff] %v3937_v54  ;;  %7240 = vst [vmem:[#allocation18_spill] sm:$0xff] %v3940_v55  ;;  %v3947_v56 = vld [vmem:[%s3693_s9 + $0x1e8] sm:$0x1f]  ;;  %v3950_v57 = vld [vmem:[%s3693_s9 + $0x1e0] sm:$0x1f] }
  0x30   : > { %7241 = vst [vmem:[#allocation19_spill] sm:$0xff] %v3950_v57  ;;  %v3957_v58 = vld [vmem:[%s3693_s9 + $0x1f8] sm:$0x1f]  ;;  %v3960_v59 = vld [vmem:[%s3693_s9 + $0x1f0] sm:$0x1f] }
  0x31   : > { %7242 = vst [vmem:[#allocation20_spill] sm:$0xff] %v3957_v58  ;;  %7243 = vst [vmem:[#allocation21_spill] sm:$0xff] %v3960_v59  ;;  %v3967_v60 = vld [vmem:[%s3693_s9 + $0x208] sm:$0x1f]  ;;  %v3970_v61 = vld [vmem:[%s3693_s9 + $0x200] sm:$0x1f] }
  0x32   : > { %7244 = vst [vmem:[#allocation22_spill] sm:$0xff] %v3967_v60  ;;  %7245 = vst [vmem:[#allocation23_spill] sm:$0xff] %v3970_v61  ;;  %v3977_v62 = vld [vmem:[%s3693_s9 + $0x218] sm:$0x1f]  ;;  %v3980_v63 = vld [vmem:[%s3693_s9 + $0x210] sm:$0x1f] }
  0x33   : > { %360 = vrot.lane.b32.xlu1 %v3750_v12, %s7198_s11  ;;  %358 = vrot.lane.b32.xlu0 %v3753_v13, %s7198_s11  ;;  %7246 = vst [vmem:[#allocation24_spill] sm:$0xff] %v3977_v62  ;;  %7247 = vst [vmem:[#allocation25_spill] sm:$0xff] %v3980_v63  ;;  %v3987_v1 = vld [vmem:[%s3693_s9 + $0x238] sm:$0x1f]  ;;  %v3990_v9 = vld [vmem:[%s3693_s9 + $0x230] sm:$0x1f] }
  0x34   : > { %7248 = vst [vmem:[#allocation26_spill] sm:$0xff] %v3990_v9  ;;  %v4011_v25 = vld [vmem:[%s3693_s9 + $0x258] sm:$0x1f] }
  0x35   : > { %7251 = vst [vmem:[#allocation29_spill] sm:$0xff] %v4011_v25 }
  0x37   : > { %364 = vrot.lane.b32.xlu1 %v3760_v14, %s7198_s11  ;;  %362 = vrot.lane.b32.xlu0 %v3763_v15, %s7198_s11 }
  0x3b   : > { %384 = vrot.lane.b32.xlu1 %v3770_v16, %s7196_s12  ;;  %382 = vrot.lane.b32.xlu0 %v254_v17, %s7196_s12  ;;  %v3997_v17 = vld [vmem:[%s3693_s9 + $0x248] sm:$0x1f] }
  0x3f   : > { %388 = vrot.lane.b32.xlu1 %v3777_v18, %s7196_s12  ;;  %386 = vrot.lane.b32.xlu0 %v3780_v19, %s7196_s12 }
  0x43   : > { %392 = vrot.lane.b32.xlu1 %v3787_v20, %s7196_s12  ;;  %390 = vrot.lane.b32.xlu0 %v3790_v21, %s7196_s12 }
  0x47   : > { %396 = vrot.lane.b32.xlu1 %v3797_v22, %s7196_s12  ;;  %394 = vrot.lane.b32.xlu0 %v3800_v23, %s7196_s12 }
  0x4b   : > { %424 = vrot.lane.b32.xlu1 %v3813_v26, %s7201_s13  ;;  %422 = vrot.lane.b32.xlu0 %v7105_v27, %s7201_s13 }
  0x4f   : > { %428 = vrot.lane.b32.xlu1 %v3828_v30, %s7201_s13  ;;  %426 = vrot.lane.b32.xlu0 %v3831_v31, %s7201_s13 }
  0x53   : > { %432 = vrot.lane.b32.xlu1 %v3844_v34, %s7201_s13  ;;  %430 = vrot.lane.b32.xlu0 %v3847_v35, %s7201_s13 }
  0x57   : > { %436 = vrot.lane.b32.xlu1 %v3860_v38, %s7201_s13  ;;  %434 = vrot.lane.b32.xlu0 %v3863_v39, %s7201_s13 }
  0x5b   : > { %456 = vrot.lane.b32.xlu1 %v3870_v40, %s3591_s14  ;;  %454 = vrot.lane.b32.xlu0 %v3873_v41, %s3591_s14 }
  0x5f   : > { %460 = vrot.lane.b32.xlu1 %v3880_v42, %s3591_s14  ;;  %458 = vrot.lane.b32.xlu0 %v3883_v43, %s3591_s14 }
  0x63   : > { %464 = vrot.lane.b32.xlu1 %v3890_v44, %s3591_s14  ;;  %462 = vrot.lane.b32.xlu0 %v3893_v45, %s3591_s14 }
  0x67   : > { %468 = vrot.lane.b32.xlu1 %v3900_v46, %s3591_s14  ;;  %466 = vrot.lane.b32.xlu0 %v3903_v47, %s3591_s14 }
  0x6b   : > { %488 = vrot.lane.b32.xlu1 %v3910_v48, %s7208_s15  ;;  %486 = vrot.lane.b32.xlu0 %v273_v49, %s7208_s15  ;;  %v4000_v49 = vld [vmem:[%s3693_s9 + $0x240] sm:$0x1f]  ;;  %v4047_v48 = vrot.slane %v3880_v42, 1 }
  0x6f   : > { %492 = vrot.lane.b32.xlu1 %v3917_v50, %s7208_s15  ;;  %490 = vrot.lane.b32.xlu0 %v3920_v51, %s7208_s15  ;;  %v4035_v50 = vrot.slane %v3870_v40, 1 }
  0x73   : > { %496 = vrot.lane.b32.xlu1 %v3927_v52, %s7208_s15  ;;  %494 = vrot.lane.b32.xlu0 %v3930_v53, %s7208_s15 }
  0x77   : > { %500 = vrot.lane.b32.xlu1 %v3937_v54, %s7208_s15  ;;  %498 = vrot.lane.b32.xlu0 %v3940_v55, %s7208_s15  ;;  %v4014_v54 = vld [vmem:[%s3693_s9 + $0x250] sm:$0x1f] }
  0x7b   : > { %520 = vrot.lane.b32.xlu1 %v3947_v56, %s3593_s16  ;;  %518 = vrot.lane.b32.xlu0 %v3950_v57, %s3593_s16 }
  0x7f   : > { %524 = vrot.lane.b32.xlu1 %v3957_v58, %s3593_s16  ;;  %522 = vrot.lane.b32.xlu0 %v3960_v59, %s3593_s16 }
  0x83   : > { %528 = vrot.lane.b32.xlu1 %v3967_v60, %s3593_s16  ;;  %526 = vrot.lane.b32.xlu0 %v3970_v61, %s3593_s16 }
  0x87   : > { %532 = vrot.lane.b32.xlu1 %v3977_v62, %s3593_s16  ;;  %530 = vrot.lane.b32.xlu0 %v3980_v63, %s3593_s16 }
  0x8b   : > { %552 = vrot.lane.b32.xlu1 %v3987_v1, %s3594_s17  ;;  %550 = vrot.lane.b32.xlu0 %v3990_v9, %s3594_s17 }
  0x8d   : > { %v4002_v27 = vpop.permute.xlu1 %322  ;;  %v4004_v57 = vpop.permute.xlu0 %318 }
  0x8e   : > { %7249 = vst [vmem:[#allocation27_spill] sm:$0xff] %v4002_v27  ;;  %7250 = vst [vmem:[#allocation28_spill] sm:$0xff] %v4004_v57  ;;  %v4025_v27 = vld [vmem:[%s3693_s9 + $0x268] sm:$0x1f]  ;;  %v4028_v57 = vld [vmem:[%s3693_s9 + $0x260] sm:$0x1f] }
  0x8f   : > { %556 = vrot.lane.b32.xlu1 %v3997_v17, %s3594_s17  ;;  %554 = vrot.lane.b32.xlu0 %v4000_v49, %s3594_s17  ;;  %7254 = vst [vmem:[#allocation32_spill] sm:$0xff] %v4025_v27  ;;  %7255 = vst [vmem:[#allocation33_spill] sm:$0xff] %v4028_v57 }
  0x91   : > { %v4016_v55 = vpop.permute.xlu1 %324  ;;  %v4018_v9 = vpop.permute.xlu0 %320 }
  0x92   : > { %7252 = vst [vmem:[#allocation30_spill] sm:$0xff] %v4016_v55  ;;  %7253 = vst [vmem:[#allocation31_spill] sm:$0xff] %v4018_v9  ;;  %v7126_v55 = vrot.slane %v3873_v41, 1 }
  0x93   : > { %560 = vrot.lane.b32.xlu1 %v4011_v25, %s3594_s17  ;;  %558 = vrot.lane.b32.xlu0 %v4014_v54, %s3594_s17 }
  0x95   : > { %v4030_v52 = vpop.permute.xlu1 %328  ;;  %v4032_v53 = vpop.permute.xlu0 %326 }
  0x96   : > { %7256 = vst [vmem:[#allocation34_spill] sm:$0xff] %v4030_v52  ;;  %7257 = vst [vmem:[#allocation35_spill] sm:$0xff] %v4032_v53  ;;  %v4050_v53 = vrot.slane %v3883_v43, 1 }
  0x97   : > { %564 = vrot.lane.b32.xlu1 %v4025_v27, %s3594_s17  ;;  %562 = vrot.lane.b32.xlu0 %v4028_v57, %s3594_s17 }
  0x99   : > { %v4042_v9 = vpop.permute.xlu1 %332  ;;  %v4044_v51 = vpop.permute.xlu0 %330 }
  0x9a   : > { %7258 = vst [vmem:[#allocation36_spill] sm:$0xff] %v4042_v9  ;;  %7259 = vst [vmem:[#allocation37_spill] sm:$0xff] %v4044_v51  ;;  %v4062_v51 = vrot.slane %v3890_v44, 1  ;;  %v4065_v9 = vrot.slane %v3893_v45, 1 }
  0x9b   : > { %584 = vrot.lane.b32.xlu1 %v4035_v50, %s3595_s23  ;;  %582 = vrot.lane.b32.xlu0 %v7126_v55, %s3595_s23  ;;  %v4076_v55 = vrot.slane %v3900_v46, 1 }
  0x9c   : > { %7262 = vst [vmem:[#allocation40_spill] sm:$0xff] %v4062_v51  ;;  %7263 = vst [vmem:[#allocation41_spill] sm:$0xff] %v4065_v9 }
  0x9d   : > { %v4057_v52 = vpop.permute.xlu1 %352  ;;  %v4059_v27 = vpop.permute.xlu0 %350  ;;  %7266 = vst [vmem:[#allocation44_spill] sm:$0xff] %v4076_v55 }
  0x9e   : > { %7260 = vst [vmem:[#allocation38_spill] sm:$0xff] %v4057_v52  ;;  %7261 = vst [vmem:[#allocation39_spill] sm:$0xff] %v4059_v27  ;;  %v4079_v27 = vrot.slane %v3903_v47, 1 }
  0x9f   : > { %588 = vrot.lane.b32.xlu1 %v4047_v48, %s3595_s23  ;;  %586 = vrot.lane.b32.xlu0 %v4050_v53, %s3595_s23 }
  0xa0   : > { %7267 = vst [vmem:[#allocation45_spill] sm:$0xff] %v4079_v27 }
  0xa1   : > { %v4071_v25 = vpop.permute.xlu1 %356  ;;  %v4073_v41 = vpop.permute.xlu0 %354 }
  0xa2   : > { %7264 = vst [vmem:[#allocation42_spill] sm:$0xff] %v4071_v25  ;;  %7265 = vst [vmem:[#allocation43_spill] sm:$0xff] %v4073_v41 }
  0xa3   : > { %592 = vrot.lane.b32.xlu1 %v4062_v51, %s3595_s23  ;;  %590 = vrot.lane.b32.xlu0 %v4065_v9, %s3595_s23 }
  0xa5   : > { %v4085_v52 = vpop.permute.xlu1 %360  ;;  %v4087_v57 = vpop.permute.xlu0 %358 }
  0xa6   : > { %7268 = vst [vmem:[#allocation46_spill] sm:$0xff] %v4085_v52  ;;  %7269 = vst [vmem:[#allocation47_spill] sm:$0xff] %v4087_v57 }
  0xa7   : > { %596 = vrot.lane.b32.xlu1 %v4076_v55, %s3595_s23  ;;  %594 = vrot.lane.b32.xlu0 %v4079_v27, %s3595_s23 }
  0xa9   : > { %v4093_v41 = vpop.permute.xlu1 %364  ;;  %v4095_v25 = vpop.permute.xlu0 %362 }
  0xaa   : > { %7270 = vst [vmem:[#allocation48_spill] sm:$0xff] %v4093_v41  ;;  %7271 = vst [vmem:[#allocation49_spill] sm:$0xff] %v4095_v25 }
  0xab   : > { %609 = vrot.lane.b32.xlu1 %v3820_v29, %s3596_s25  ;;  %607 = vrot.lane.b32.xlu0 %v3803_v24, %s3596_s25  ;;  %v4118_v24 = vld [vmem:[%s3693_s9 + $0x40] sm:$0x1f] }
  0xad   : > { %v4101_v52 = vpop.permute.xlu1 %384  ;;  %v4103_v57 = vpop.permute.xlu0 %382 }
  0xae   : > { %7272 = vst [vmem:[#allocation50_spill] sm:$0xff] %v4101_v52  ;;  %7273 = vst [vmem:[#allocation51_spill] sm:$0xff] %v4103_v57 }
  0xaf   : > { %613 = vrot.lane.b32.xlu1 %v3837_v33, %s3596_s25  ;;  %611 = vrot.lane.b32.xlu0 %v3817_v28, %s3596_s25 }
  0xb1   : > { %v4109_v41 = vpop.permute.xlu1 %388  ;;  %v4111_v25 = vpop.permute.xlu0 %386 }
  0xb2   : > { %7274 = vst [vmem:[#allocation52_spill] sm:$0xff] %v4109_v41  ;;  %7275 = vst [vmem:[#allocation53_spill] sm:$0xff] %v4111_v25 }
  0xb3   : > { %617 = vrot.lane.b32.xlu1 %v3853_v37, %s3596_s25  ;;  %615 = vrot.lane.b32.xlu0 %v3834_v32, %s3596_s25 }
  0xb5   : > { %v4120_v52 = vpop.permute.xlu1 %392  ;;  %v4122_v57 = vpop.permute.xlu0 %390 }
  0xb6   : > { %7276 = vst [vmem:[#allocation54_spill] sm:$0xff] %v4120_v52  ;;  %7277 = vst [vmem:[#allocation55_spill] sm:$0xff] %v4122_v57 }
  0xb7   : > { %621 = vrot.lane.b32.xlu1 %v4118_v24, %s3596_s25  ;;  %619 = vrot.lane.b32.xlu0 %v3850_v36, %s3596_s25 }
  0xb9   : > { %v4128_v25 = vpop.permute.xlu1 %396  ;;  %v4130_v41 = vpop.permute.xlu0 %394 }
  0xba   : > { %7278 = vst [vmem:[#allocation56_spill] sm:$0xff] %v4128_v25  ;;  %7279 = vst [vmem:[#allocation57_spill] sm:$0xff] %v4130_v41 }
  0xbb   : > { %634 = vrot.lane.b32.xlu1 %v3696_v0, %s3597_s26  ;;  %632 = vrot.lane.b32.xlu0 %v3706_v3, %s3597_s26  ;;  %v4153_v3 = vld [vmem:[%s3693_s9 + $0x90] sm:$0x1f] }
  0xbc   : > { %7284 = vst [vmem:[#allocation62_spill] sm:$0xff] %v4153_v3 }
  0xbd   : > { %v4136_v52 = vpop.permute.xlu1 %424  ;;  %v4138_v57 = vpop.permute.xlu0 %422 }
  0xbe   : > { %7280 = vst [vmem:[#allocation58_spill] sm:$0xff] %v4136_v52  ;;  %7281 = vst [vmem:[#allocation59_spill] sm:$0xff] %v4138_v57 }
  0xbf   : > { %638 = vrot.lane.b32.xlu1 %v3716_v5, %s3597_s26  ;;  %636 = vrot.lane.b32.xlu0 %v3703_v2, %s3597_s26 }
  0xc1   : > { %v4144_v25 = vpop.permute.xlu1 %428  ;;  %v4146_v41 = vpop.permute.xlu0 %426 }
  0xc2   : > { %7282 = vst [vmem:[#allocation60_spill] sm:$0xff] %v4144_v25  ;;  %7283 = vst [vmem:[#allocation61_spill] sm:$0xff] %v4146_v41 }
  0xc3   : > { %642 = vrot.lane.b32.xlu1 %v3726_v7, %s3597_s26  ;;  %640 = vrot.lane.b32.xlu0 %v3713_v4, %s3597_s26 }
  0xc5   : > { %v4155_v52 = vpop.permute.xlu1 %432  ;;  %v4157_v57 = vpop.permute.xlu0 %430 }
  0xc6   : > { %7285 = vst [vmem:[#allocation63_spill] sm:$0xff] %v4155_v52  ;;  %7286 = vst [vmem:[#allocation64_spill] sm:$0xff] %v4157_v57 }
  0xc7   : > { %646 = vrot.lane.b32.xlu1 %v4153_v3, %s3597_s26  ;;  %644 = vrot.lane.b32.xlu0 %v3723_v6, %s3597_s26 }
  0xc9   : > { %v4163_v41 = vpop.permute.xlu1 %436  ;;  %v4165_v25 = vpop.permute.xlu0 %434 }
  0xca   : > { %7287 = vst [vmem:[#allocation65_spill] sm:$0xff] %v4163_v41  ;;  %7288 = vst [vmem:[#allocation66_spill] sm:$0xff] %v4165_v25 }
  0xcb   : > { %659 = vrot.lane.b32.xlu1 %v3743_v11, %s3598_s30  ;;  %657 = vrot.lane.b32.xlu0 %v3733_v8, %s3598_s30  ;;  %v4188_v8 = vld [vmem:[%s3693_s9 + $0xe0] sm:$0x1f] }
  0xcc   : > { %7293 = vst [vmem:[#allocation71_spill] sm:$0xff] %v4188_v8 }
  0xcd   : > { %v4171_v52 = vpop.permute.xlu1 %456  ;;  %v4173_v57 = vpop.permute.xlu0 %454 }
  0xce   : > { %7289 = vst [vmem:[#allocation67_spill] sm:$0xff] %v4171_v52  ;;  %7290 = vst [vmem:[#allocation68_spill] sm:$0xff] %v4173_v57 }
  0xcf   : > { %663 = vrot.lane.b32.xlu1 %v3753_v13, %s3598_s30  ;;  %661 = vrot.lane.b32.xlu0 %v3740_v10, %s3598_s30 }
  0xd1   : > { %v4179_v41 = vpop.permute.xlu1 %460  ;;  %v4181_v25 = vpop.permute.xlu0 %458 }
  0xd2   : > { %7291 = vst [vmem:[#allocation69_spill] sm:$0xff] %v4179_v41  ;;  %7292 = vst [vmem:[#allocation70_spill] sm:$0xff] %v4181_v25 }
  0xd3   : > { %667 = vrot.lane.b32.xlu1 %v3763_v15, %s3598_s30  ;;  %665 = vrot.lane.b32.xlu0 %v3750_v12, %s3598_s30 }
  0xd5   : > { %v4190_v52 = vpop.permute.xlu1 %464  ;;  %v4192_v57 = vpop.permute.xlu0 %462 }
  0xd6   : > { %7294 = vst [vmem:[#allocation72_spill] sm:$0xff] %v4190_v52  ;;  %7295 = vst [vmem:[#allocation73_spill] sm:$0xff] %v4192_v57 }
  0xd7   : > { %671 = vrot.lane.b32.xlu1 %v4188_v8, %s3598_s30  ;;  %669 = vrot.lane.b32.xlu0 %v3760_v14, %s3598_s30 }
  0xd9   : > { %v4198_v25 = vpop.permute.xlu1 %468  ;;  %v4200_v41 = vpop.permute.xlu0 %466 }
  0xda   : > { %7296 = vst [vmem:[#allocation74_spill] sm:$0xff] %v4198_v25  ;;  %7297 = vst [vmem:[#allocation75_spill] sm:$0xff] %v4200_v41 }
  0xdb   : > { %684 = vrot.lane.b32.xlu1 %v3780_v19, %s3599_s6  ;;  %682 = vrot.lane.b32.xlu0 %v3770_v16, %s3599_s6  ;;  %v4223_v16 = vld [vmem:[%s3693_s9 + $0x130] sm:$0x1f] }
  0xdc   : > { %7302 = vst [vmem:[#allocation80_spill] sm:$0xff] %v4223_v16 }
  0xdd   : > { %v4206_v52 = vpop.permute.xlu1 %488  ;;  %v4208_v57 = vpop.permute.xlu0 %486 }
  0xde   : > { %7298 = vst [vmem:[#allocation76_spill] sm:$0xff] %v4206_v52  ;;  %7299 = vst [vmem:[#allocation77_spill] sm:$0xff] %v4208_v57 }
  0xdf   : > { %688 = vrot.lane.b32.xlu1 %v3790_v21, %s3599_s6  ;;  %686 = vrot.lane.b32.xlu0 %v3777_v18, %s3599_s6 }
  0xe1   : > { %v4214_v25 = vpop.permute.xlu1 %492  ;;  %v4216_v41 = vpop.permute.xlu0 %490 }
  0xe2   : > { %7300 = vst [vmem:[#allocation78_spill] sm:$0xff] %v4214_v25  ;;  %7301 = vst [vmem:[#allocation79_spill] sm:$0xff] %v4216_v41 }
  0xe3   : > { %692 = vrot.lane.b32.xlu1 %v3800_v23, %s3599_s6  ;;  %690 = vrot.lane.b32.xlu0 %v3787_v20, %s3599_s6 }
  0xe5   : > { %v4225_v52 = vpop.permute.xlu1 %496  ;;  %v4227_v57 = vpop.permute.xlu0 %494 }
  0xe6   : > { %7303 = vst [vmem:[#allocation81_spill] sm:$0xff] %v4225_v52  ;;  %7304 = vst [vmem:[#allocation82_spill] sm:$0xff] %v4227_v57 }
  0xe7   : > { %696 = vrot.lane.b32.xlu1 %v4223_v16, %s3599_s6  ;;  %694 = vrot.lane.b32.xlu0 %v3797_v22, %s3599_s6  ;;  %v4254_v16 = vrot.slane %v4118_v24, 1 }
  0xe9   : > { %v4233_v25 = vpop.permute.xlu1 %500  ;;  %v4235_v41 = vpop.permute.xlu0 %498  ;;  %7311 = vst [vmem:[#allocation89_spill] sm:$0xff] %v4254_v16 }
  0xea   : > { %7305 = vst [vmem:[#allocation83_spill] sm:$0xff] %v4233_v25  ;;  %7306 = vst [vmem:[#allocation84_spill] sm:$0xff] %v4235_v41 }
  0xeb   : > { %709 = vrot.lane.b32.xlu1 %v3831_v31, %s3600_s7  ;;  %707 = vrot.lane.b32.xlu0 %v3813_v26, %s3600_s7 }
  0xed   : > { %v4241_v52 = vpop.permute.xlu1 %520  ;;  %v4243_v57 = vpop.permute.xlu0 %518 }
  0xee   : > { %7307 = vst [vmem:[#allocation85_spill] sm:$0xff] %v4241_v52  ;;  %7308 = vst [vmem:[#allocation86_spill] sm:$0xff] %v4243_v57 }
  0xef   : > { %713 = vrot.lane.b32.xlu1 %v3847_v35, %s3600_s7  ;;  %711 = vrot.lane.b32.xlu0 %v3828_v30, %s3600_s7 }
  0xf1   : > { %v4249_v25 = vpop.permute.xlu1 %524  ;;  %v4251_v41 = vpop.permute.xlu0 %522 }
  0xf2   : > { %7309 = vst [vmem:[#allocation87_spill] sm:$0xff] %v4249_v25  ;;  %7310 = vst [vmem:[#allocation88_spill] sm:$0xff] %v4251_v41 }
  0xf3   : > { %717 = vrot.lane.b32.xlu1 %v3863_v39, %s3600_s7  ;;  %715 = vrot.lane.b32.xlu0 %v3844_v34, %s3600_s7 }
  0xf5   : > { %v4260_v57 = vpop.permute.xlu1 %528  ;;  %v4262_v52 = vpop.permute.xlu0 %526 }
  0xf6   : > { %7312 = vst [vmem:[#allocation90_spill] sm:$0xff] %v4260_v57  ;;  %7313 = vst [vmem:[#allocation91_spill] sm:$0xff] %v4262_v52 }
  0xf7   : > { %721 = vrot.lane.b32.xlu1 %v4254_v16, %s3600_s7  ;;  %719 = vrot.lane.b32.xlu0 %v3860_v38, %s3600_s7 }
  0xf9   : > { %v4268_v41 = vpop.permute.xlu1 %532  ;;  %v4270_v25 = vpop.permute.xlu0 %530 }
  0xfa   : > { %7314 = vst [vmem:[#allocation92_spill] sm:$0xff] %v4268_v41  ;;  %7315 = vst [vmem:[#allocation93_spill] sm:$0xff] %v4270_v25 }
  0xfb   : > { %734 = vrot.lane.b32.xlu1 %v3883_v43, %s3601_s8  ;;  %732 = vrot.lane.b32.xlu0 %v3870_v40, %s3601_s8  ;;  %v4293_v40 = vld [vmem:[%s3693_s9 + $0x180] sm:$0x1f] }
  0xfd   : > { %v4276_v57 = vpop.permute.xlu1 %552  ;;  %v4278_v52 = vpop.permute.xlu0 %550 }
  0xfe   : > { %7316 = vst [vmem:[#allocation94_spill] sm:$0xff] %v4276_v57  ;;  %7317 = vst [vmem:[#allocation95_spill] sm:$0xff] %v4278_v52  ;;  %v7390_v57 = vld [vmem:[#allocation80_spill] sm:$0xff] }
  0xff   : > { %738 = vrot.lane.b32.xlu1 %v3893_v45, %s3601_s8  ;;  %736 = vrot.lane.b32.xlu0 %v3880_v42, %s3601_s8 }
 0x101   : > { %v4284_v41 = vpop.permute.xlu1 %556  ;;  %v4286_v25 = vpop.permute.xlu0 %554 }
 0x102   : > { %7318 = vst [vmem:[#allocation96_spill] sm:$0xff] %v4284_v41  ;;  %7319 = vst [vmem:[#allocation97_spill] sm:$0xff] %v4286_v25 }
 0x103   : > { %742 = vrot.lane.b32.xlu1 %v3903_v47, %s3601_s8  ;;  %740 = vrot.lane.b32.xlu0 %v3890_v44, %s3601_s8 }
 0x105   : > { %v4295_v43 = vpop.permute.xlu1 %560  ;;  %v4297_v52 = vpop.permute.xlu0 %558 }
 0x106   : > { %7320 = vst [vmem:[#allocation98_spill] sm:$0xff] %v4295_v43  ;;  %7321 = vst [vmem:[#allocation99_spill] sm:$0xff] %v4297_v52 }
 0x107   : > { %746 = vrot.lane.b32.xlu1 %v4293_v40, %s3601_s8  ;;  %744 = vrot.lane.b32.xlu0 %v3900_v46, %s3601_s8 }
 0x109   : > { %v4303_v42 = vpop.permute.xlu1 %564  ;;  %v4305_v45 = vpop.permute.xlu0 %562 }
 0x10a   : > { %7322 = vst [vmem:[#allocation100_spill] sm:$0xff] %v4303_v42  ;;  %7323 = vst [vmem:[#allocation101_spill] sm:$0xff] %v4305_v45 }
 0x10b   : > { %894 = vrot.lane.b32.xlu1 %v3960_v59, %s7203_s10  ;;  %892 = vrot.lane.b32.xlu0 %v3947_v56, %s7203_s10 }
 0x10d   : > { %v4311_v44 = vpop.permute.xlu1 %584  ;;  %v4313_v47 = vpop.permute.xlu0 %582 }
 0x10e   : > { %7324 = vst [vmem:[#allocation102_spill] sm:$0xff] %v4311_v44  ;;  %7325 = vst [vmem:[#allocation103_spill] sm:$0xff] %v4313_v47 }
 0x10f   : > { %898 = vrot.lane.b32.xlu1 %v3970_v61, %s7203_s10  ;;  %896 = vrot.lane.b32.xlu0 %v3957_v58, %s7203_s10 }
 0x111   : > { %v4319_v46 = vpop.permute.xlu1 %588  ;;  %v4321_v42 = vpop.permute.xlu0 %586 }
 0x112   : > { %7326 = vst [vmem:[#allocation104_spill] sm:$0xff] %v4319_v46  ;;  %7327 = vst [vmem:[#allocation105_spill] sm:$0xff] %v4321_v42 }
 0x113   : > { %902 = vrot.lane.b32.xlu1 %v3980_v63, %s7203_s10  ;;  %900 = vrot.lane.b32.xlu0 %v3967_v60, %s7203_s10 }
 0x115   : > { %v4327_v45 = vpop.permute.xlu1 %592  ;;  %v4329_v52 = vpop.permute.xlu0 %590 }
 0x116   : > { %7328 = vst [vmem:[#allocation106_spill] sm:$0xff] %v4327_v45  ;;  %7329 = vst [vmem:[#allocation107_spill] sm:$0xff] %v4329_v52 }
 0x117   : > { %917 = vrot.lane.b32.xlu1 %v3987_v1, %s7198_s11  ;;  %904 = vrot.lane.b32.xlu0 %v3977_v62, %s7203_s10 }
 0x119   : > { %v4335_v43 = vpop.permute.xlu1 %596  ;;  %v4337_v46 = vpop.permute.xlu0 %594 }
 0x11a   : > { %7330 = vst [vmem:[#allocation108_spill] sm:$0xff] %v4335_v43  ;;  %7331 = vst [vmem:[#allocation109_spill] sm:$0xff] %v4337_v46 }
 0x11b   : > { %921 = vrot.lane.b32.xlu1 %v3997_v17, %s7198_s11  ;;  %919 = vrot.lane.b32.xlu0 %v4000_v49, %s7198_s11 }
 0x11d   : > { %v4343_v42 = vpop.permute.xlu1 %609  ;;  %v4345_v45 = vpop.permute.xlu0 %607 }
 0x11e   : > { %7332 = vst [vmem:[#allocation110_spill] sm:$0xff] %v4343_v42  ;;  %7333 = vst [vmem:[#allocation111_spill] sm:$0xff] %v4345_v45  ;;  %v7137_v45 = vrot.slane %v3960_v59, 1  ;;  %v7138_v42 = vrot.slane %v3947_v56, 1 }
 0x11f   : > { %942 = vrot.lane.b32.xlu1 %v4035_v50, %s7196_s12  ;;  %923 = vrot.lane.b32.xlu0 %v4014_v54, %s7198_s11 }
 0x121   : > { %v4351_v52 = vpop.permute.xlu1 %613  ;;  %v4353_v46 = vpop.permute.xlu0 %611 }
 0x122   : > { %7334 = vst [vmem:[#allocation112_spill] sm:$0xff] %v4351_v52  ;;  %7335 = vst [vmem:[#allocation113_spill] sm:$0xff] %v4353_v46 }
 0x123   : > { %946 = vrot.lane.b32.xlu1 %v4047_v48, %s7196_s12  ;;  %944 = vrot.lane.b32.xlu0 %v4050_v53, %s7196_s12 }
 0x125   : > { %v4359_v17 = vpop.permute.xlu1 %617  ;;  %v4361_v49 = vpop.permute.xlu0 %615 }
 0x126   : > { %7336 = vst [vmem:[#allocation114_spill] sm:$0xff] %v4359_v17  ;;  %7337 = vst [vmem:[#allocation115_spill] sm:$0xff] %v4361_v49  ;;  %v7346_v49 = vld [vmem:[#allocation33_spill] sm:$0xff] }
 0x127   : > { %967 = vrot.lane.b32.xlu1 %v3820_v29, %s7201_s13  ;;  %948 = vrot.lane.b32.xlu0 %v4065_v9, %s7196_s12  ;;  %v4384_v29 = vld [vmem:[%s3693_s9 + $0x220] sm:$0x1f] }
 0x129   : > { %v4367_v54 = vpop.permute.xlu1 %621  ;;  %v4369_v43 = vpop.permute.xlu0 %619 }
 0x12a   : > { %7338 = vst [vmem:[#allocation116_spill] sm:$0xff] %v4367_v54  ;;  %7339 = vst [vmem:[#allocation117_spill] sm:$0xff] %v4369_v43 }
 0x12b   : > { %971 = vrot.lane.b32.xlu1 %v3837_v33, %s7201_s13  ;;  %969 = vrot.lane.b32.xlu0 %v3817_v28, %s7201_s13 }
 0x12d   : > { %v4375_v46 = vpop.permute.xlu1 %634  ;;  %v4377_v17 = vpop.permute.xlu0 %632 }
 0x12e   : > { %7340 = vst [vmem:[#allocation118_spill] sm:$0xff] %v4375_v46  ;;  %7341 = vst [vmem:[#allocation119_spill] sm:$0xff] %v4377_v17 }
 0x12f   : > { %992 = vrot.lane.b32.xlu1 %v3696_v0, %s3591_s14  ;;  %973 = vrot.lane.b32.xlu0 %v3834_v32, %s7201_s13  ;;  %v7347_v32 = vld [vmem:[#allocation29_spill] sm:$0xff] }
 0x131   : > { %v4386_v54 = vpop.permute.xlu1 %638  ;;  %v4388_v43 = vpop.permute.xlu0 %636 }
 0x132   : > { %7342 = vst [vmem:[#allocation120_spill] sm:$0xff] %v4386_v54  ;;  %7343 = vst [vmem:[#allocation121_spill] sm:$0xff] %v4388_v43 }
 0x133   : > { %906 = vrot.lane.b32.xlu1 %v4384_v29, %s7203_s10  ;;  %994 = vrot.lane.b32.xlu0 %v3703_v2, %s3591_s14 }
 0x135   : > { %v4394_v28 = vpop.permute.xlu1 %642  ;;  %v4396_v33 = vpop.permute.xlu0 %640 }
 0x136   : > { %7344 = vst [vmem:[#allocation122_spill] sm:$0xff] %v4394_v28  ;;  %7345 = vst [vmem:[#allocation123_spill] sm:$0xff] %v4396_v33 }
 0x137   : > { %927 = vrot.lane.b32.xlu1 %v7346_v49, %s7198_s11  ;;  %925 = vrot.lane.b32.xlu0 %v7347_v32, %s7198_s11  ;;  %v299_v49 = vld [vmem:[%s3693_s9 + $0x270] sm:$0x1f] }
 0x139   : > { %v4402_v54 = vpop.permute.xlu1 %646  ;;  %v4404_v52 = vpop.permute.xlu0 %644 }
 0x13a   : > { %7348 = vst [vmem:[#allocation33_spill] sm:$0xff] %v4402_v54  ;;  %7349 = vst [vmem:[#allocation29_spill] sm:$0xff] %v4404_v52  ;;  %v7354_v54 = vld [vmem:[#allocation32_spill] sm:$0xff] }
 0x13b   : > { %998 = vrot.lane.b32.xlu1 %v3713_v4, %s3591_s14  ;;  %996 = vrot.lane.b32.xlu0 %v3716_v5, %s3591_s14 }
 0x13d   : > { %v4410_v43 = vpop.permute.xlu1 %659  ;;  %v4412_v28 = vpop.permute.xlu0 %657 }
 0x13e   : > { %7350 = vst [vmem:[#allocation124_spill] sm:$0xff] %v4410_v43  ;;  %7351 = vst [vmem:[#allocation125_spill] sm:$0xff] %v4412_v28 }
 0x13f   : > { %1019 = vrot.lane.b32.xlu1 %v3740_v10, %s7208_s15  ;;  %1017 = vrot.lane.b32.xlu0 %v3743_v11, %s7208_s15 }
 0x141   : > { %v4419_v32 = vpop.permute.xlu1 %663  ;;  %v4421_v52 = vpop.permute.xlu0 %661 }
 0x142   : > { %7352 = vst [vmem:[#allocation126_spill] sm:$0xff] %v4419_v32  ;;  %7353 = vst [vmem:[#allocation127_spill] sm:$0xff] %v4421_v52 }
 0x143   : > { %931 = vrot.lane.b32.xlu1 %v299_v49, %s7198_s11  ;;  %929 = vrot.lane.b32.xlu0 %v7354_v54, %s7198_s11 }
 0x145   : > { %v4426_v33 = vpop.permute.xlu1 %667  ;;  %v4428_v25 = vpop.permute.xlu0 %665 }
 0x146   : > { %7355 = vst [vmem:[#allocation32_spill] sm:$0xff] %v4426_v33  ;;  %7356 = vst [vmem:[#allocation128_spill] sm:$0xff] %v4428_v25  ;;  %v7130_v25 = vrot.slane %v4293_v40, 1 }
 0x147   : > { %952 = vrot.lane.b32.xlu1 %v4079_v27, %s7196_s12  ;;  %950 = vrot.lane.b32.xlu0 %v4062_v51, %s7196_s12 }
 0x149   : > { %v4434_v41 = vpop.permute.xlu1 %671  ;;  %v4436_v32 = vpop.permute.xlu0 %669 }
 0x14a   : > { %7357 = vst [vmem:[#allocation129_spill] sm:$0xff] %v4434_v41  ;;  %7358 = vst [vmem:[#allocation130_spill] sm:$0xff] %v4436_v32 }
 0x14b   : > { %1023 = vrot.lane.b32.xlu1 %v3750_v12, %s7208_s15  ;;  %1021 = vrot.lane.b32.xlu0 %v3753_v13, %s7208_s15 }
 0x14d   : > { %v4442_v54 = vpop.permute.xlu1 %684  ;;  %v4444_v49 = vpop.permute.xlu0 %682 }
 0x14e   : > { %7359 = vst [vmem:[#allocation131_spill] sm:$0xff] %v4442_v54  ;;  %7360 = vst [vmem:[#allocation132_spill] sm:$0xff] %v4444_v49  ;;  %v7387_v54 = vld [vmem:[#allocation13_spill] sm:$0xff] }
 0x14f   : > { %1044 = vrot.lane.b32.xlu1 %v3777_v18, %s3593_s16  ;;  %1042 = vrot.lane.b32.xlu0 %v3780_v19, %s3593_s16  ;;  %v7136_v28 = vrot.slane %v7387_v54, 1 }
 0x151   : > { %v4451_v41 = vpop.permute.xlu1 %688  ;;  %v4453_v32 = vpop.permute.xlu0 %686 }
 0x152   : > { %7361 = vst [vmem:[#allocation133_spill] sm:$0xff] %v4451_v41  ;;  %7362 = vst [vmem:[#allocation134_spill] sm:$0xff] %v4453_v32 }
 0x153   : > { %956 = vrot.lane.b32.xlu1 %v7130_v25, %s7196_s12  ;;  %954 = vrot.lane.b32.xlu0 %v4076_v55, %s7196_s12 }
 0x155   : > { %v4460_v33 = vpop.permute.xlu1 %692  ;;  %v4462_v52 = vpop.permute.xlu0 %690 }
 0x156   : > { %7363 = vst [vmem:[#allocation135_spill] sm:$0xff] %v4460_v33  ;;  %7364 = vst [vmem:[#allocation136_spill] sm:$0xff] %v4462_v52 }
 0x157   : > { %977 = vrot.lane.b32.xlu1 %v3850_v36, %s7201_s13  ;;  %975 = vrot.lane.b32.xlu0 %v3853_v37, %s7201_s13  ;;  %v4485_v36 = vld [vmem:[%s3693_s9 + $0x48] sm:$0x1f] }
 0x159   : > { %v4468_v41 = vpop.permute.xlu1 %696  ;;  %v4470_v32 = vpop.permute.xlu0 %694 }
 0x15a   : > { %7365 = vst [vmem:[#allocation137_spill] sm:$0xff] %v4468_v41  ;;  %7366 = vst [vmem:[#allocation138_spill] sm:$0xff] %v4470_v32 }
 0x15b   : > { %1048 = vrot.lane.b32.xlu1 %v3787_v20, %s3593_s16  ;;  %1046 = vrot.lane.b32.xlu0 %v3790_v21, %s3593_s16 }
 0x15d   : > { %v4476_v25 = vpop.permute.xlu1 %709  ;;  %v4478_v33 = vpop.permute.xlu0 %707 }
 0x15e   : > { %7367 = vst [vmem:[#allocation139_spill] sm:$0xff] %v4476_v25  ;;  %7368 = vst [vmem:[#allocation140_spill] sm:$0xff] %v4478_v33 }
 0x15f   : > { %1069 = vrot.lane.b32.xlu1 %v3828_v30, %s3594_s17  ;;  %1067 = vrot.lane.b32.xlu0 %v3831_v31, %s3594_s17 }
 0x161   : > { %v4487_v37 = vpop.permute.xlu1 %713  ;;  %v4489_v32 = vpop.permute.xlu0 %711 }
 0x162   : > { %7369 = vst [vmem:[#allocation141_spill] sm:$0xff] %v4487_v37  ;;  %7370 = vst [vmem:[#allocation142_spill] sm:$0xff] %v4489_v32  ;;  %v7383_v32 = vld [vmem:[#allocation12_spill] sm:$0xff] }
 0x163   : > { %981 = vrot.lane.b32.xlu1 %v4485_v36, %s7201_s13  ;;  %979 = vrot.lane.b32.xlu0 %v4118_v24, %s7201_s13 }
 0x165   : > { %v4495_v41 = vpop.permute.xlu1 %717  ;;  %v4497_v52 = vpop.permute.xlu0 %715 }
 0x166   : > { %7371 = vst [vmem:[#allocation143_spill] sm:$0xff] %v4495_v41  ;;  %7372 = vst [vmem:[#allocation144_spill] sm:$0xff] %v4497_v52 }
 0x167   : > { %1002 = vrot.lane.b32.xlu1 %v3723_v6, %s3591_s14  ;;  %1000 = vrot.lane.b32.xlu0 %v3726_v7, %s3591_s14  ;;  %v4520_v6 = vld [vmem:[%s3693_s9 + $0x98] sm:$0x1f] }
 0x169   : > { %v4503_v37 = vpop.permute.xlu1 %721  ;;  %v4505_v33 = vpop.permute.xlu0 %719 }
 0x16a   : > { %7373 = vst [vmem:[#allocation145_spill] sm:$0xff] %v4503_v37  ;;  %7374 = vst [vmem:[#allocation146_spill] sm:$0xff] %v4505_v33 }
 0x16b   : > { %1073 = vrot.lane.b32.xlu1 %v3844_v34, %s3594_s17  ;;  %1071 = vrot.lane.b32.xlu0 %v3847_v35, %s3594_s17 }
 0x16d   : > { %v4511_v24 = vpop.permute.xlu1 %734  ;;  %v4513_v41 = vpop.permute.xlu0 %732 }
 0x16e   : > { %7375 = vst [vmem:[#allocation147_spill] sm:$0xff] %v4511_v24  ;;  %7376 = vst [vmem:[#allocation148_spill] sm:$0xff] %v4513_v41  ;;  %v7133_v41 = vrot.slane %v7383_v32, 1  ;;  %v7384_v24 = vld [vmem:[#allocation14_spill] sm:$0xff]  ;;  %v7147_v32 = vrot.slane %v4485_v36, 1 }
 0x16f   : > { %1712 = vrot.lane.b32.xlu1 %v4050_v53, %s7203_s10  ;;  %1710 = vrot.lane.b32.xlu0 %v4035_v50, %s7203_s10  ;;  %v7132_v25 = vrot.slane %v7384_v24, 1 }
 0x171   : > { %v4522_v7 = vpop.permute.xlu1 %738  ;;  %v4524_v33 = vpop.permute.xlu0 %736 }
 0x172   : > { %7377 = vst [vmem:[#allocation149_spill] sm:$0xff] %v4522_v7  ;;  %7378 = vst [vmem:[#allocation150_spill] sm:$0xff] %v4524_v33 }
 0x173   : > { %1006 = vrot.lane.b32.xlu1 %v4520_v6, %s3591_s14  ;;  %1004 = vrot.lane.b32.xlu0 %v4153_v3, %s3591_s14 }
 0x175   : > { %v4530_v37 = vpop.permute.xlu1 %742  ;;  %v4532_v52 = vpop.permute.xlu0 %740 }
 0x176   : > { %7379 = vst [vmem:[#allocation151_spill] sm:$0xff] %v4530_v37  ;;  %7380 = vst [vmem:[#allocation152_spill] sm:$0xff] %v4532_v52 }
 0x177   : > { %1027 = vrot.lane.b32.xlu1 %v3760_v14, %s7208_s15  ;;  %1025 = vrot.lane.b32.xlu0 %v3763_v15, %s7208_s15 }
 0x179   : > { %v4538_v7 = vpop.permute.xlu1 %746  ;;  %v4540_v33 = vpop.permute.xlu0 %744 }
 0x17a   : > { %7381 = vst [vmem:[#allocation153_spill] sm:$0xff] %v4538_v7  ;;  %7382 = vst [vmem:[#allocation154_spill] sm:$0xff] %v4540_v33  ;;  %v4559_v33 = vld [vmem:[%s3693_s9 + $0xe8] sm:$0x1f] }
 0x17b   : > { %1716 = vrot.lane.b32.xlu1 %v4065_v9, %s7203_s10  ;;  %1714 = vrot.lane.b32.xlu0 %v4047_v48, %s7203_s10 }
 0x17d   : > { %v4548_v52 = vpop.permute.xlu1 %894  ;;  %v4550_v37 = vpop.permute.xlu0 %892 }
 0x17f   : > { %1738 = vrot.lane.b32.xlu1 %v7132_v25, %s7198_s11  ;;  %1736 = vrot.lane.b32.xlu0 %v7133_v41, %s7198_s11  ;;  %v7388_v41 = vld [vmem:[#allocation16_spill] sm:$0xff] }
 0x180   : > { %v7134_v43 = vrot.slane %v7388_v41, 1 }
 0x181   : > { %v4561_v7 = vpop.permute.xlu1 %898  ;;  %v4563_v9 = vpop.permute.xlu0 %896 }
 0x183   : > { %1031 = vrot.lane.b32.xlu1 %v4559_v33, %s7208_s15  ;;  %1029 = vrot.lane.b32.xlu0 %v4188_v8, %s7208_s15 }
 0x185   : > { %v4569_v49 = vpop.permute.xlu1 %902  ;;  %v4571_v25 = vpop.permute.xlu0 %900 }
 0x186   : > { %7385 = vst [vmem:[#allocation155_spill] sm:$0xff] %v4569_v49  ;;  %7386 = vst [vmem:[#allocation156_spill] sm:$0xff] %v4571_v25 }
 0x187   : > { %1052 = vrot.lane.b32.xlu1 %v3797_v22, %s3593_s16  ;;  %1050 = vrot.lane.b32.xlu0 %v3800_v23, %s3593_s16 }
 0x189   : > { %v4579_v17 = vpop.permute.xlu1 %917  ;;  %v4581_v46 = vpop.permute.xlu0 %904 }
 0x18a   : > { %7389 = vst [vmem:[#allocation157_spill] sm:$0xff] %v4581_v46 }
 0x18b   : > { %1742 = vrot.lane.b32.xlu1 %v7134_v43, %s7198_s11  ;;  %1740 = vrot.lane.b32.xlu0 %v7136_v28, %s7198_s11  ;;  %v4602_v43 = vld [vmem:[%s3693_s9 + $0x138] sm:$0x1f] }
 0x18d   : > { %v4591_v47 = vpop.permute.xlu1 %921  ;;  %v4593_v44 = vpop.permute.xlu0 %919 }
 0x18f   : > { %1763 = vrot.lane.b32.xlu1 %v7137_v45, %s7196_s12  ;;  %1761 = vrot.lane.b32.xlu0 %v7138_v42, %s7196_s12  ;;  %v7144_v45 = vrot.slane %v3970_v61, 1  ;;  %v7145_v42 = vrot.slane %v3957_v58, 1 }
 0x191   : > { %v4604_v41 = vpop.permute.xlu1 %942  ;;  %v4606_v28 = vpop.permute.xlu0 %923 }
 0x193   : > { %1056 = vrot.lane.b32.xlu1 %v4602_v43, %s3593_s16  ;;  %1054 = vrot.lane.b32.xlu0 %v7390_v57, %s3593_s16 }
 0x195   : > { %v4612_v46 = vpop.permute.xlu1 %946  ;;  %v4614_v25 = vpop.permute.xlu0 %944 }
 0x197   : > { %1077 = vrot.lane.b32.xlu1 %v3860_v38, %s3594_s17  ;;  %1075 = vrot.lane.b32.xlu0 %v3863_v39, %s3594_s17 }
 0x199   : > { %v4622_v49 = vpop.permute.xlu1 %967  ;;  %v4624_v59 = vpop.permute.xlu0 %948 }
 0x19a   : > { %7391 = vst [vmem:[#allocation80_spill] sm:$0xff] %v4624_v59 }
 0x19b   : > { %1767 = vrot.lane.b32.xlu1 %v7144_v45, %s7196_s12  ;;  %1765 = vrot.lane.b32.xlu0 %v7145_v42, %s7196_s12 }
 0x19d   : > { %v4632_v24 = vpop.permute.xlu1 %971  ;;  %v4634_v54 = vpop.permute.xlu0 %969 }
 0x19e   : > { %7392 = vst [vmem:[#allocation158_spill] sm:$0xff] %v4632_v24 }
 0x19f   : > { %1787 = vrot.lane.b32.xlu1 %v3740_v10, %s7201_s13  ;;  %1785 = vrot.lane.b32.xlu0 %v3743_v11, %s7201_s13 }
 0x1a1   : > { %v4641_v59 = vpop.permute.xlu1 %992  ;;  %v4643_v61 = vpop.permute.xlu0 %973 }
 0x1a2   : > { %7393 = vst [vmem:[#allocation159_spill] sm:$0xff] %v4643_v61 }
 0x1a3   : > { %1081 = vrot.lane.b32.xlu1 %v7147_v32, %s3594_s17  ;;  %1079 = vrot.lane.b32.xlu0 %v4254_v16, %s3594_s17 }
 0x1a5   : > { %v4650_v45 = vpop.permute.xlu1 %906  ;;  %v4652_v42 = vpop.permute.xlu0 %994 }
 0x1a6   : > { %7394 = vst [vmem:[#allocation160_spill] sm:$0xff] %v4650_v45 }
 0x1a7   : > { %1791 = vrot.lane.b32.xlu1 %v3750_v12, %s7201_s13  ;;  %1789 = vrot.lane.b32.xlu0 %v3753_v13, %s7201_s13 }
 0x1a9   : > { %v4658_v58 = vpop.permute.xlu1 %927  ;;  %v4660_v61 = vpop.permute.xlu0 %925 }
 0x1aa   : > { %7395 = vst [vmem:[#allocation161_spill] sm:$0xff] %v4658_v58  ;;  %7396 = vst [vmem:[#allocation162_spill] sm:$0xff] %v4660_v61 }
 0x1ab   : > { %1811 = vrot.lane.b32.xlu1 %v3777_v18, %s3591_s14  ;;  %1809 = vrot.lane.b32.xlu0 %v3780_v19, %s3591_s14 }
 0x1ad   : > { %v4666_v32 = vpop.permute.xlu1 %998  ;;  %v4668_v45 = vpop.permute.xlu0 %996 }
 0x1ae   : > { %7397 = vst [vmem:[#allocation163_spill] sm:$0xff] %v4668_v45 }
 0x1af   : > { %1815 = vrot.lane.b32.xlu1 %v3787_v20, %s3591_s14  ;;  %1813 = vrot.lane.b32.xlu0 %v3790_v21, %s3591_s14  ;;  %v4691_v20 = vrot.slane %v3703_v2, 1  ;;  %v4694_v21 = vrot.slane %v3696_v0, 1 }
 0x1b1   : > { %v4674_v24 = vpop.permute.xlu1 %1019  ;;  %v4676_v58 = vpop.permute.xlu0 %1017 }
 0x1b3   : > { %1835 = vrot.lane.b32.xlu1 %v3828_v30, %s7208_s15  ;;  %1833 = vrot.lane.b32.xlu0 %v3831_v31, %s7208_s15 }
 0x1b5   : > { %v4682_v18 = vpop.permute.xlu1 %931  ;;  %v4684_v19 = vpop.permute.xlu0 %929 }
 0x1b6   : > { %7398 = vst [vmem:[#allocation164_spill] sm:$0xff] %v4682_v18  ;;  %7399 = vst [vmem:[#allocation165_spill] sm:$0xff] %v4684_v19  ;;  %v4719_v19 = vrot.slane %v3740_v10, 1  ;;  %v4722_v18 = vrot.slane %v3743_v11, 1 }
 0x1b7   : > { %1839 = vrot.lane.b32.xlu1 %v3844_v34, %s7208_s15  ;;  %1837 = vrot.lane.b32.xlu0 %v3847_v35, %s7208_s15  ;;  %v4705_v34 = vrot.slane %v3713_v4, 1  ;;  %v4708_v35 = vrot.slane %v3716_v5, 1 }
 0x1b9   : > { %v4696_v61 = vpop.permute.xlu1 %952  ;;  %v4698_v45 = vpop.permute.xlu0 %950  ;;  %7402 = vst [vmem:[#allocation168_spill] sm:$0xff] %v4705_v34  ;;  %7403 = vst [vmem:[#allocation169_spill] sm:$0xff] %v4708_v35 }
 0x1ba   : > { %7400 = vst [vmem:[#allocation166_spill] sm:$0xff] %v4696_v61  ;;  %7401 = vst [vmem:[#allocation167_spill] sm:$0xff] %v4698_v45 }
 0x1bb   : > { %1860 = vrot.lane.b32.xlu1 %v4691_v20, %s3593_s16  ;;  %1858 = vrot.lane.b32.xlu0 %v4694_v21, %s3593_s16 }
 0x1bd   : > { %v4710_v2 = vpop.permute.xlu1 %1023  ;;  %v4712_v0 = vpop.permute.xlu0 %1021 }
 0x1be   : > { %7404 = vst [vmem:[#allocation170_spill] sm:$0xff] %v4712_v0 }
 0x1bf   : > { %1864 = vrot.lane.b32.xlu1 %v4705_v34, %s3593_s16  ;;  %1862 = vrot.lane.b32.xlu0 %v4708_v35, %s3593_s16  ;;  %v4733_v34 = vrot.slane %v3750_v12, 1  ;;  %v4736_v35 = vrot.slane %v3753_v13, 1 }
 0x1c1   : > { %v4724_v4 = vpop.permute.xlu1 %1044  ;;  %v4726_v5 = vpop.permute.xlu0 %1042  ;;  %7405 = vst [vmem:[#allocation171_spill] sm:$0xff] %v4733_v34  ;;  %7406 = vst [vmem:[#allocation172_spill] sm:$0xff] %v4736_v35 }
 0x1c3   : > { %1885 = vrot.lane.b32.xlu1 %v4719_v19, %s3594_s17  ;;  %1883 = vrot.lane.b32.xlu0 %v4722_v18, %s3594_s17 }
 0x1c5   : > { %v4738_v10 = vpop.permute.xlu1 %956  ;;  %v4740_v11 = vpop.permute.xlu0 %954 }
 0x1c6   : > { %7407 = vst [vmem:[#allocation173_spill] sm:$0xff] %v4738_v10  ;;  %7408 = vst [vmem:[#allocation174_spill] sm:$0xff] %v4740_v11  ;;  %v7413_v11 = vld [vmem:[#allocation15_spill] sm:$0xff] }
 0x1c7   : > { %1889 = vrot.lane.b32.xlu1 %v4733_v34, %s3594_s17  ;;  %1887 = vrot.lane.b32.xlu0 %v4736_v35, %s3594_s17  ;;  %v7166_v10 = vrot.slane %v7413_v11, 1  ;;  %v7414_v34 = vld [vmem:[#allocation18_spill] sm:$0xff]  ;;  %v7415_v35 = vrot.slane %v4293_v40, 1 }
 0x1c8   : > { %v7165_v0 = vrot.slane %v7414_v34, 1 }
 0x1c9   : > { %v4746_v45 = vpop.permute.xlu1 %977  ;;  %v4748_v61 = vpop.permute.xlu0 %975 }
 0x1ca   : > { %7409 = vst [vmem:[#allocation175_spill] sm:$0xff] %v4746_v45  ;;  %7410 = vst [vmem:[#allocation176_spill] sm:$0xff] %v4748_v61  ;;  %v7417_v45 = vld [vmem:[#allocation17_spill] sm:$0xff] }
 0x1cb   : > { %1720 = vrot.lane.b32.xlu1 %v4079_v27, %s7203_s10  ;;  %1718 = vrot.lane.b32.xlu0 %v4062_v51, %s7203_s10  ;;  %v4770_v51 = vld [vmem:[%s3693_s9 + $0x1d0] sm:$0x1f] }
 0x1cc   : > { %7416 = vst [vmem:[#allocation179_spill] sm:$0xff] %v4770_v51 }
 0x1cd   : > { %v4754_v12 = vpop.permute.xlu1 %1048  ;;  %v4756_v13 = vpop.permute.xlu0 %1046 }
 0x1ce   : > { %7411 = vst [vmem:[#allocation177_spill] sm:$0xff] %v4754_v12  ;;  %7412 = vst [vmem:[#allocation178_spill] sm:$0xff] %v4756_v13  ;;  %v7167_v12 = vrot.slane %v7417_v45, 1  ;;  %v1735_v13 = vrot.slane %v4770_v51, 1  ;;  %v7171_v51 = vrot.slane %v3967_v60, 1 }
 0x1cf   : > { %1724 = vrot.lane.b32.xlu1 %v7415_v35, %s7203_s10  ;;  %1722 = vrot.lane.b32.xlu0 %v4076_v55, %s7203_s10  ;;  %v7170_v55 = vrot.slane %v3980_v63, 1 }
 0x1d1   : > { %v4765_v61 = vpop.permute.xlu1 %1069  ;;  %v4767_v27 = vpop.permute.xlu0 %1067 }
 0x1d3   : > { %1746 = vrot.lane.b32.xlu1 %v7165_v0, %s7198_s11  ;;  %1744 = vrot.lane.b32.xlu0 %v7166_v10, %s7198_s11  ;;  %v1760_v10 = vrot.slane %v4384_v29, 1 }
 0x1d5   : > { %v4780_v35 = vpop.permute.xlu1 %981  ;;  %v4782_v40 = vpop.permute.xlu0 %979 }
 0x1d7   : > { %1750 = vrot.lane.b32.xlu1 %v1735_v13, %s7198_s11  ;;  %1748 = vrot.lane.b32.xlu0 %v7167_v12, %s7198_s11  ;;  %v7172_v13 = vrot.slane %v3977_v62, 1 }
 0x1d9   : > { %v4790_v34 = vpop.permute.xlu1 %1002  ;;  %v4792_v0 = vpop.permute.xlu0 %1000 }
 0x1db   : > { %1771 = vrot.lane.b32.xlu1 %v7170_v55, %s7196_s12  ;;  %1769 = vrot.lane.b32.xlu0 %v7171_v51, %s7196_s12 }
 0x1dd   : > { %v4802_v12 = vpop.permute.xlu1 %1073  ;;  %v4804_v45 = vpop.permute.xlu0 %1071 }
 0x1df   : > { %1775 = vrot.lane.b32.xlu1 %v1760_v10, %s7196_s12  ;;  %1773 = vrot.lane.b32.xlu0 %v7172_v13, %s7196_s12 }
 0x1e1   : > { %v4810_v29 = vpop.permute.xlu1 %1712  ;;  %v4812_v63 = vpop.permute.xlu0 %1710 }
 0x1e2   : > { %7418 = vst [vmem:[#allocation180_spill] sm:$0xff] %v4810_v29  ;;  %7419 = vst [vmem:[#allocation181_spill] sm:$0xff] %v4812_v63  ;;  %v3472_v63 = vld [vmem:[%s3693_s9 + $0x50] sm:$0x1f] }
 0x1e3   : > { %1795 = vrot.lane.b32.xlu1 %v3760_v14, %s7201_s13  ;;  %1793 = vrot.lane.b32.xlu0 %v3763_v15, %s7201_s13  ;;  %v1244_v29 = vrot.slane %v3472_v63, 1 }
 0x1e5   : > { %v4818_v55 = vpop.permute.xlu1 %1006  ;;  %v4820_v51 = vpop.permute.xlu0 %1004 }
 0x1e7   : > { %1799 = vrot.lane.b32.xlu1 %v4559_v33, %s7201_s13  ;;  %1797 = vrot.lane.b32.xlu0 %v4188_v8, %s7201_s13 }
 0x1e9   : > { %v4826_v10 = vpop.permute.xlu1 %1027  ;;  %v4828_v13 = vpop.permute.xlu0 %1025 }
 0x1eb   : > { %1819 = vrot.lane.b32.xlu1 %v3797_v22, %s3591_s14  ;;  %1817 = vrot.lane.b32.xlu0 %v3800_v23, %s3591_s14 }
 0x1ed   : > { %v4834_v14 = vpop.permute.xlu1 %1716  ;;  %v4836_v15 = vpop.permute.xlu0 %1714 }
 0x1ee   : > { %7420 = vst [vmem:[#allocation182_spill] sm:$0xff] %v4834_v14  ;;  %7421 = vst [vmem:[#allocation183_spill] sm:$0xff] %v4836_v15 }
 0x1ef   : > { %1823 = vrot.lane.b32.xlu1 %v4602_v43, %s3591_s14  ;;  %1821 = vrot.lane.b32.xlu0 %v7390_v57, %s3591_s14  ;;  %v7424_v43 = vrot.slane %v4485_v36, 1  ;;  %v3464_v57 = vld [vmem:[%s3693_s9 + $0x88] sm:$0x1f]  ;;  %v1857_v36 = vrot.slane %v4520_v6, 1  ;;  %v4887_v6 = vld [vmem:[%s3693_s9 + $0xd0] sm:$0x1f] }
 0x1f0   : > { %v4860_v11 = vrot.slane %v3464_v57, 1  ;;  %7430 = vst [vmem:[#allocation191_spill] sm:$0xff] %v4887_v6 }
 0x1f1   : > { %v4842_v62 = vpop.permute.xlu1 %1738  ;;  %v4844_v60 = vpop.permute.xlu0 %1736 }
 0x1f2   : > { %7422 = vst [vmem:[#allocation184_spill] sm:$0xff] %v4842_v62  ;;  %7423 = vst [vmem:[#allocation185_spill] sm:$0xff] %v4844_v60  ;;  %v7185_v60 = vrot.slane %v4153_v3, 1 }
 0x1f3   : > { %1843 = vrot.lane.b32.xlu1 %v3860_v38, %s7208_s15  ;;  %1841 = vrot.lane.b32.xlu0 %v3863_v39, %s7208_s15  ;;  %7425 = vst [vmem:[#allocation186_spill] sm:$0xff] %v4860_v11  ;;  %v3465_v38 = vld [vmem:[%s3693_s9 + $0x80] sm:$0x1f] }
 0x1f4   : > { %v4863_v15 = vrot.slane %v3465_v38, 1  ;;  %v3466_v38 = vld [vmem:[%s3693_s9 + $0xd8] sm:$0x1f] }
 0x1f5   : > { %v4850_v22 = vpop.permute.xlu1 %1031  ;;  %v4852_v23 = vpop.permute.xlu0 %1029 }
 0x1f6   : > { %7426 = vst [vmem:[#allocation187_spill] sm:$0xff] %v4863_v15 }
 0x1f7   : > { %1847 = vrot.lane.b32.xlu1 %v7424_v43, %s7208_s15  ;;  %1845 = vrot.lane.b32.xlu0 %v4254_v16, %s7208_s15  ;;  %v4884_v16 = vrot.slane %v3466_v38, 1  ;;  %v7193_v38 = vrot.slane %v4188_v8, 1  ;;  %v4926_v8 = vld [vmem:[%s3693_s9 + $0x108] sm:$0x1f] }
 0x1f9   : > { %v4865_v39 = vpop.permute.xlu1 %1052  ;;  %v4867_v14 = vpop.permute.xlu0 %1050  ;;  %7429 = vst [vmem:[#allocation190_spill] sm:$0xff] %v4884_v16 }
 0x1fb   : > { %1868 = vrot.lane.b32.xlu1 %v4860_v11, %s3593_s16  ;;  %1866 = vrot.lane.b32.xlu0 %v4863_v15, %s3593_s16  ;;  %v4890_v11 = vrot.slane %v4887_v6, 1 }
 0x1fd   : > { %v4875_v43 = vpop.permute.xlu1 %1742  ;;  %v4877_v57 = vpop.permute.xlu0 %1740  ;;  %7431 = vst [vmem:[#allocation192_spill] sm:$0xff] %v4890_v11 }
 0x1fe   : > { %7427 = vst [vmem:[#allocation188_spill] sm:$0xff] %v4875_v43  ;;  %7428 = vst [vmem:[#allocation189_spill] sm:$0xff] %v4877_v57 }
 0x1ff   : > { %1872 = vrot.lane.b32.xlu1 %v1857_v36, %s3593_s16  ;;  %1870 = vrot.lane.b32.xlu0 %v7185_v60, %s3593_s16  ;;  %v1882_v36 = vrot.slane %v4559_v33, 1 }
 0x201   : > { %v4892_v15 = vpop.permute.xlu1 %1763  ;;  %v4894_v43 = vpop.permute.xlu0 %1761 }
 0x202   : > { %7432 = vst [vmem:[#allocation193_spill] sm:$0xff] %v4892_v15  ;;  %7433 = vst [vmem:[#allocation194_spill] sm:$0xff] %v4894_v43 }
 0x203   : > { %1893 = vrot.lane.b32.xlu1 %v4884_v16, %s3594_s17  ;;  %1891 = vrot.lane.b32.xlu0 %v4890_v11, %s3594_s17  ;;  %v4915_v16 = vld [vmem:[%s3693_s9 + $0xf8] sm:$0x1f]  ;;  %v3469_v11 = vld [vmem:[%s3693_s9 + $0xf0] sm:$0x1f] }
 0x205   : > { %v4902_v60 = vpop.permute.xlu1 %1056  ;;  %v4904_v3 = vpop.permute.xlu0 %1054 }
 0x206   : > { %7434 = vst [vmem:[#allocation195_spill] sm:$0xff] %v4904_v3  ;;  %v4950_v3 = vld [vmem:[%s3693_s9 + $0x58] sm:$0x1f] }
 0x207   : > { %1897 = vrot.lane.b32.xlu1 %v1882_v36, %s3594_s17  ;;  %1895 = vrot.lane.b32.xlu0 %v7193_v38, %s3594_s17  ;;  %v4931_v38 = vld [vmem:[%s3693_s9 + $0x100] sm:$0x1f]  ;;  %7443 = vst [vmem:[#allocation201_spill] sm:$0xff] %v4950_v3 }
 0x209   : > { %v4910_v33 = vpop.permute.xlu1 %1077  ;;  %v4912_v6 = vpop.permute.xlu0 %1075 }
 0x20b   : > { %1198 = vrot.lane.b32.xlu1 %v4915_v16, %s7203_s10  ;;  %1196 = vrot.lane.b32.xlu0 %v3469_v11, %s7203_s10  ;;  %v7439_v11 = vld [vmem:[#allocation6_spill] sm:$0xff] }
 0x20d   : > { %v4921_v57 = vpop.permute.xlu1 %1767  ;;  %v4923_v36 = vpop.permute.xlu0 %1765 }
 0x20e   : > { %7435 = vst [vmem:[#allocation196_spill] sm:$0xff] %v4921_v57  ;;  %7436 = vst [vmem:[#allocation197_spill] sm:$0xff] %v4923_v36  ;;  %v7440_v36 = vrot.slane %v7439_v11, 1 }
 0x20f   : > { %1202 = vrot.lane.b32.xlu1 %v4926_v8, %s7203_s10  ;;  %1200 = vrot.lane.b32.xlu0 %v4931_v38, %s7203_s10  ;;  %s7597_s10 = smov 9  }
 0x211   : > { %v4935_v43 = vpop.permute.xlu1 %1787  ;;  %v4937_v15 = vpop.permute.xlu0 %1785 }
 0x212   : > { %7437 = vst [vmem:[#allocation198_spill] sm:$0xff] %v4935_v43  ;;  %7438 = vst [vmem:[#allocation199_spill] sm:$0xff] %v4937_v15  ;;  %v7195_v43 = vrot.slane %v4950_v3, 1 }
 0x213   : > { %1222 = vrot.lane.b32.xlu1 %v3813_v26, %s7198_s11  ;;  %1220 = vrot.lane.b32.xlu0 %v7440_v36, %s7198_s11 }
 0x215   : > { %v4944_v57 = vpop.permute.xlu1 %1081  ;;  %v4946_v62 = vpop.permute.xlu0 %1079 }
 0x216   : > { %7441 = vst [vmem:[#allocation6_spill] sm:$0xff] %v4944_v57  ;;  %7442 = vst [vmem:[#allocation200_spill] sm:$0xff] %v4946_v62  ;;  %v3474_v62 = vld [vmem:[%s3693_s9 + $0xa0] sm:$0x1f] }
 0x217   : > { %1226 = vrot.lane.b32.xlu1 %v3828_v30, %s7198_s11  ;;  %1224 = vrot.lane.b32.xlu0 %v3831_v31, %s7198_s11  ;;  %v1276_v57 = vrot.slane %v3474_v62, 1  ;;  %s3602_s11 = smov 48  }
 0x219   : > { %v4957_v11 = vpop.permute.xlu1 %1791  ;;  %v4959_v36 = vpop.permute.xlu0 %1789 }
 0x21a   : > { %7444 = vst [vmem:[#allocation202_spill] sm:$0xff] %v4957_v11  ;;  %7445 = vst [vmem:[#allocation203_spill] sm:$0xff] %v4959_v36  ;;  %v4975_v11 = vld [vmem:[%s3693_s9 + $0xa8] sm:$0x1f] }
 0x21b   : > { %1254 = vrot.lane.b32.xlu1 %v7195_v43, %s7196_s12  ;;  %1252 = vrot.lane.b32.xlu0 %v1244_v29, %s7196_s12  ;;  %v7200_v36 = vrot.slane %v4975_v11, 1 }
 0x21d   : > { %v4965_v63 = vpop.permute.xlu1 %1811  ;;  %v4967_v15 = vpop.permute.xlu0 %1809 }
 0x21e   : > { %7446 = vst [vmem:[#allocation204_spill] sm:$0xff] %v4965_v63  ;;  %7447 = vst [vmem:[#allocation205_spill] sm:$0xff] %v4967_v15  ;;  %v7461_v15 = vld [vmem:[#allocation26_spill] sm:$0xff] }
 0x21f   : > { %1258 = vrot.lane.b32.xlu1 %v4691_v20, %s7196_s12  ;;  %1256 = vrot.lane.b32.xlu0 %v4694_v21, %s7196_s12  ;;  %s7577_s12 = smov 6  }
 0x221   : > { %v4978_v3 = vpop.permute.xlu1 %1815  ;;  %v4980_v43 = vpop.permute.xlu0 %1813 }
 0x222   : > { %7448 = vst [vmem:[#allocation206_spill] sm:$0xff] %v4978_v3  ;;  %7449 = vst [vmem:[#allocation207_spill] sm:$0xff] %v4980_v43 }
 0x223   : > { %1286 = vrot.lane.b32.xlu1 %v7200_v36, %s7201_s13  ;;  %1284 = vrot.lane.b32.xlu0 %v1276_v57, %s7201_s13  ;;  %v7454_v57 = vld [vmem:[#allocation19_spill] sm:$0xff] }
 0x224   : > { %v309_v36 = vld [vmem:[%s7100_s1 + $0x48] sm:$0x7] }
 0x225   : > { %v4986_v62 = vpop.permute.xlu1 %1835  ;;  %v4988_v29 = vpop.permute.xlu0 %1833  ;;  %3359 = vmatprep.subr.msk.mxu0 %vm2059_vm0, %v309_v36 }
 0x226   : > { %7450 = vst [vmem:[#allocation208_spill] sm:$0xff] %v4986_v62  ;;  %7451 = vst [vmem:[#allocation209_spill] sm:$0xff] %v4988_v29  ;;  %3360 = vmatpush3.msk.msra.mxu0 %vm2059_vm0, %v309_v36  ;;  %vm7217_vm0 = vcmask 392192  }
 0x227   : > { %1290 = vrot.lane.b32.xlu1 %v4719_v19, %s7201_s13  ;;  %1288 = vrot.lane.b32.xlu0 %v4722_v18, %s7201_s13  ;;  %s7623_s13 = smov 12  }
 0x229   : > { %v4994_v3 = vpop.permute.xlu1 %1839  ;;  %v4996_v43 = vpop.permute.xlu0 %1837 }
 0x22a   : > { %7452 = vst [vmem:[#allocation210_spill] sm:$0xff] %v4994_v3  ;;  %7453 = vst [vmem:[#allocation211_spill] sm:$0xff] %v4996_v43  ;;  %v308_v43 = vld [vmem:[%s7100_s1 + $0x40] sm:$0xff]  ;;  %v5013_v3 = vld [vmem:[%s3693_s9 + $0x1f8] sm:$0x1f] }
 0x22b   : > { %1310 = vrot.lane.b32.xlu1 %v3947_v56, %s3591_s14  ;;  %1308 = vrot.lane.b32.xlu0 %v7454_v57, %s3591_s14  ;;  %7457 = vst [vmem:[#allocation213_spill] sm:$0xff] %v5013_v3  ;;  %v5018_v57 = vld [vmem:[%s3693_s9 + $0x1f0] sm:$0x1f] }
 0x22c   : > { %7458 = vst [vmem:[#allocation214_spill] sm:$0xff] %v5018_v57  ;;  %3361 = vmatprep.subr.mxu0 %v308_v43 }
 0x22d   : > { %v5005_v29 = vpop.permute.xlu1 %1860  ;;  %v5007_v62 = vpop.permute.xlu0 %1858  ;;  %3362 = vmatpush3.msra.mxu0 %v308_v43  ;;  %v305_v43 = vld [vmem:[%s7100_s1 + $0x28] sm:$0xff] }
 0x22e   : > { %7455 = vst [vmem:[#allocation19_spill] sm:$0xff] %v5005_v29  ;;  %7456 = vst [vmem:[#allocation212_spill] sm:$0xff] %v5007_v62  ;;  %v307_v29 = vld [vmem:[%s7100_s1 + $0x38] sm:$0xff] }
 0x22f   : > { %1314 = vrot.lane.b32.xlu1 %v5013_v3, %s3591_s14  ;;  %1312 = vrot.lane.b32.xlu0 %v5018_v57, %s3591_s14  ;;  %v306_v3 = vld [vmem:[%s7100_s1 + $0x30] sm:$0xff]  ;;  %v3479_v57 = vld [vmem:[%s3693_s9 + $0x198] sm:$0x1f] }
 0x230   : > { %3363 = vmatprep.subr.mxu0 %v307_v29 }
 0x231   : > { %v5025_v36 = vpop.permute.xlu1 %1864  ;;  %v5027_v62 = vpop.permute.xlu0 %1862  ;;  %3364 = vmatpush3.msra.mxu0 %v307_v29  ;;  %v5050_v29 = vld [vmem:[%s3693_s9 + $0x248] sm:$0x1f] }
 0x232   : > { %7459 = vst [vmem:[#allocation215_spill] sm:$0xff] %v5025_v36  ;;  %7460 = vst [vmem:[#allocation216_spill] sm:$0xff] %v5027_v62  ;;  %3365 = vmatprep.subr.mxu0 %v306_v3  ;;  %v3478_v62 = vld [vmem:[%s3693_s9 + $0x1a0] sm:$0x1f] }
 0x233   : > { %1334 = vrot.lane.b32.xlu1 %v3987_v1, %s7208_s15  ;;  %1332 = vrot.lane.b32.xlu0 %v7461_v15, %s7208_s15  ;;  %v1092_v1 = vsel %vm756_vm1, %v3478_v62, %v4548_v52  ;;  %v1091_v15 = vsel %vm756_vm1, %v3479_v57, %v4550_v37  ;;  %7464 = vst [vmem:[#allocation218_spill] sm:$0xff] %v5050_v29 }
 0x234   : > { %3366 = vmatpush3.msra.mxu0 %v306_v3  ;;  %v304_v3 = vld [vmem:[%s7100_s1 + $0x20] sm:$0xff]  ;;  %v1099_v52 = vsel %vm7210_vm2, %v1091_v15, %v4579_v17  ;;  %v1100_v37 = vsel %vm7210_vm2, %v1092_v1, %v4593_v44 }
 0x235   : > { %v5036_v63 = vpop.permute.xlu1 %1885  ;;  %v5038_v36 = vpop.permute.xlu0 %1883  ;;  %3367 = vmatprep.subr.mxu0 %v305_v43  ;;  %v1107_v62 = vsel %vm774_vm3, %v1099_v52, %v4604_v41  ;;  %v1108_v57 = vsel %vm774_vm3, %v1100_v37, %v4614_v25  ;;  %v303_v41 = vld [vmem:[%s7100_s1 + $0x18] sm:$0xff] }
 0x236   : > { %7462 = vst [vmem:[#allocation26_spill] sm:$0xff] %v5036_v63  ;;  %7463 = vst [vmem:[#allocation217_spill] sm:$0xff] %v5038_v36  ;;  %v5055_v36 = vld [vmem:[%s3693_s9 + $0x240] sm:$0x1f]  ;;  %3368 = vmatpush3.msra.mxu0 %v305_v43  ;;  %v1115_v17 = vsel %vm783_vm4, %v1107_v62, %v4622_v49  ;;  %v1116_v44 = vsel %vm783_vm4, %v1108_v57, %v4634_v54  ;;  %v7465_v49 = vld [vmem:[#allocation11_spill] sm:$0xff] }
 0x237   : > { %1338 = vrot.lane.b32.xlu1 %v5050_v29, %s7208_s15  ;;  %1336 = vrot.lane.b32.xlu0 %v5055_v36, %s7208_s15  ;;  %v1123_v25 = vsel %vm792_vm5, %v1115_v17, %v4641_v59  ;;  %v1124_v1 = vsel %vm792_vm5, %v1116_v44, %v4652_v42  ;;  %v7466_v43 = vrot.slane %v7465_v49, 1  ;;  %v3483_v57 = vld [vmem:[%s3693_s9 + $0x1b0] sm:$0x1f]  ;;  %v3484_v44 = vld [vmem:[%s3693_s9 + $0x1a8] sm:$0x1f]  ;;  %s7574_s15 = smov 3  }
 0x238   : > { %3369 = vmatprep.subr.mxu0 %v304_v3  ;;  %v1132_v54 = vsel %vm801_vm6, %v1124_v1, %v4674_v24  ;;  %v1131_v15 = vsel %vm801_vm6, %v1123_v25, %v4676_v58  ;;  %v302_v24 = vld [vmem:[%s7100_s1 + $0x10] sm:$0xff]  ;;  %v1094_v17 = vsel %vm756_vm1, %v3483_v57, %v4561_v7 }
 0x239   : > { %v5070_v63 = vpop.permute.xlu1 %1889  ;;  %v5072_v29 = vpop.permute.xlu0 %1887  ;;  %3370 = vmatpush3.msra.mxu0 %v304_v3  ;;  %v1140_v59 = vsel %vm810_vm7, %v1132_v54, %v4724_v4  ;;  %v1139_v42 = vsel %vm810_vm7, %v1131_v15, %v4726_v5  ;;  %v301_v5 = vld [vmem:[%s7100_s1 + $0x8] sm:$0xff]  ;;  %v1102_v1 = vsel %vm7210_vm2, %v1094_v17, %v4606_v28  ;;  %v7471_v49 = vld [vmem:[#allocation80_spill] sm:$0xff] }
 0x23a   : > { %3371 = vmatprep.subr.mxu0 %v303_v41  ;;  %v1148_v58 = vsel %vm819_vm8, %v1140_v59, %v4765_v61  ;;  %v1147_v4 = vsel %vm819_vm8, %v1139_v42, %v4767_v27  ;;  %v300_v27 = vld [vmem:[%s7100_s1] sm:$0xff]  ;;  %v3482_v61 = vld [vmem:[%s3693_s9 + $0x190] sm:$0x1f]  ;;  %v7475_v15 = vld [vmem:[#allocation159_spill] sm:$0xff] }
 0x23b   : > { %1358 = vrot.lane.b32.xlu1 %v4035_v50, %s3593_s16  ;;  %1356 = vrot.lane.b32.xlu0 %v7466_v43, %s3593_s16  ;;  %v1380_v62 = vrot.slane %v3482_v61, 1  ;;  %v1110_v43 = vsel %vm774_vm3, %v1102_v1, %v7471_v49  ;;  %v7476_v59 = vld [vmem:[#allocation163_spill] sm:$0xff]  ;;  %v7477_v42 = vld [vmem:[#allocation12_spill] sm:$0xff]  ;;  %v3485_v1 = vld [vmem:[%s3693_s9 + $0x1e0] sm:$0x1f] }
 0x23c   : > { %3372 = vmatpush3.msra.mxu0 %v303_v41  ;;  %v1093_v41 = vsel %vm756_vm1, %v3484_v44, %v4563_v9  ;;  %v7486_v49 = vld [vmem:[#allocation13_spill] sm:$0xff] }
 0x23d   : > { %v5098_v50 = vpop.permute.xlu1 %1720  ;;  %v5100_v52 = vpop.permute.xlu0 %1718  ;;  %3373 = vmatprep.subr.mxu0 %v302_v24  ;;  %v1101_v25 = vsel %vm7210_vm2, %v1093_v41, %v4591_v47  ;;  %v1118_v47 = vsel %vm783_vm4, %v1110_v43, %v7475_v15  ;;  %v7487_v43 = vrot.slane %v7486_v49, 1  ;;  %v7492_v15 = vrot.slane %v3947_v56, 1  ;;  %v5227_v49 = vld [vmem:[%s3693_s9 + $0xb8] sm:$0x1f] }
 0x23e   : > { %7467 = vst [vmem:[#allocation11_spill] sm:$0xff] %v5098_v50  ;;  %7468 = vst [vmem:[#allocation219_spill] sm:$0xff] %v5100_v52  ;;  %3374 = vmatpush3.msra.mxu0 %v302_v24  ;;  %v1109_v7 = vsel %vm774_vm3, %v1101_v25, %v4612_v46  ;;  %v1126_v28 = vsel %vm792_vm5, %v1118_v47, %v4666_v32  ;;  %v7478_v24 = vrot.slane %v7477_v42, 1  ;;  %v7481_v32 = vld [vmem:[#allocation178_spill] sm:$0xff]  ;;  %v7497_v42 = vld [vmem:[#allocation21_spill] sm:$0xff] }
 0x23f   : > { %1165 = vrot.lane.b32.xlu1 %v1148_v58, %s3602_s11  ;;  %1163 = vrot.lane.b32.xlu0 %v1147_v4, %s3602_s11  ;;  %v1134_v58 = vsel %vm801_vm6, %v1126_v28, %v4710_v2  ;;  %v7479_v4 = vld [vmem:[#allocation170_spill] sm:$0xff] }
 0x240   : > { %3375 = vmatprep.subr.mxu0 %v301_v5 }
 0x241   : > { %v5114_v3 = vpop.permute.xlu1 %1724  ;;  %v5116_v37 = vpop.permute.xlu0 %1722  ;;  %3376 = vmatpush3.msra.mxu0 %v301_v5 }
 0x242   : > { %7469 = vst [vmem:[#allocation220_spill] sm:$0xff] %v5114_v3  ;;  %7470 = vst [vmem:[#allocation221_spill] sm:$0xff] %v5116_v37  ;;  %3377 = vmatprep.subr.mxu0 %v300_v27  ;;  %v7610_v37 = vld [vmem:[#allocation186_spill] sm:$0xff] }
 0x243   : > { %1362 = vrot.lane.b32.xlu1 %v4047_v48, %s3593_s16  ;;  %1360 = vrot.lane.b32.xlu0 %v4050_v53, %s3593_s16  ;;  %v7474_v48 = vld [vmem:[#allocation158_spill] sm:$0xff] }
 0x244   : > { %v1117_v53 = vsel %vm783_vm4, %v1109_v7, %v7474_v48  ;;  %3378 = vmatpush3.msra.mxu0 %v300_v27  ;;  %v7480_v27 = vld [vmem:[#allocation177_spill] sm:$0xff]  ;;  %v1412_v7 = vrot.slane %v3485_v1, 1 }
 0x245   : > { %v5140_v9 = vpop.permute.xlu1 %1746  ;;  %v5142_v54 = vpop.permute.xlu0 %1744  ;;  %v1125_v46 = vsel %vm792_vm5, %v1117_v53, %v7476_v59  ;;  %v1142_v61 = vsel %vm810_vm7, %v1134_v58, %v7480_v27  ;;  %v7495_v59 = vld [vmem:[#allocation20_spill] sm:$0xff] }
 0x246   : > { %7472 = vst [vmem:[#allocation80_spill] sm:$0xff] %v5140_v9  ;;  %7473 = vst [vmem:[#allocation222_spill] sm:$0xff] %v5142_v54  ;;  %v1133_v5 = vsel %vm801_vm6, %v1125_v46, %v7479_v4  ;;  %v1150_v41 = vsel %vm819_vm8, %v1142_v61, %v4802_v12  ;;  %v7488_v12 = vld [vmem:[#allocation14_spill] sm:$0xff]  ;;  %v7496_v46 = vrot.slane %v7495_v59, 1  ;;  %v5208_v4 = vld [vmem:[%s3693_s9 + $0xb0] sm:$0x1f] }
 0x247   : > { %1390 = vrot.lane.b32.xlu1 %v7478_v24, %s3594_s17  ;;  %1388 = vrot.lane.b32.xlu0 %v1380_v62, %s3594_s17  ;;  %v1141_v57 = vsel %vm810_vm7, %v1133_v5, %v7481_v32  ;;  %v7489_v48 = vrot.slane %v7488_v12, 1  ;;  %v7498_v24 = vrot.slane %v7497_v42, 1  ;;  %v3487_v61 = vld [vmem:[%s3693_s9 + $0x1c0] sm:$0x1f]  ;;  %v7503_v32 = vld [vmem:[#allocation155_spill] sm:$0xff]  ;;  %v7660_v9 = vld [vmem:[#allocation40_spill] sm:$0xff] }
 0x248   : > { %v1149_v62 = vsel %vm819_vm8, %v1141_v57, %v4804_v45  ;;  %v1096_v57 = vsel %vm756_vm1, %v3487_v61, %v7503_v32  ;;  %v7507_v59 = vld [vmem:[#allocation166_spill] sm:$0xff]  ;;  %v7508_v42 = vld [vmem:[#allocation167_spill] sm:$0xff] }
 0x249   : > { %v5164_v17 = vpop.permute.xlu1 %1750  ;;  %v5166_v44 = vpop.permute.xlu0 %1748 }
 0x24a   : > { %7482 = vst [vmem:[#allocation158_spill] sm:$0xff] %v5164_v17  ;;  %7483 = vst [vmem:[#allocation159_spill] sm:$0xff] %v5166_v44 }
 0x24b   : > { %1169 = vrot.lane.b32.xlu1 %v1150_v41, %s3602_s11  ;;  %1167 = vrot.lane.b32.xlu0 %v1149_v62, %s3602_s11  ;;  %v3488_v41 = vld [vmem:[%s3693_s9 + $0x1b8] sm:$0x1f]  ;;  %v7504_v62 = vld [vmem:[#allocation156_spill] sm:$0xff] }
 0x24c   : > { %v1095_v1 = vsel %vm756_vm1, %v3488_v41, %v7504_v62  ;;  %v7511_v41 = vld [vmem:[#allocation175_spill] sm:$0xff] }
 0x24d   : > { %v5174_v2 = vpop.permute.xlu1 %1771  ;;  %v5176_v25 = vpop.permute.xlu0 %1769 }
 0x24e   : > { %7484 = vst [vmem:[#allocation163_spill] sm:$0xff] %v5174_v2  ;;  %7485 = vst [vmem:[#allocation12_spill] sm:$0xff] %v5176_v25  ;;  %v7619_v25 = vld [vmem:[#allocation148_spill] sm:$0xff] }
 0x24f   : > { %1394 = vrot.lane.b32.xlu1 %v7487_v43, %s3594_s17  ;;  %1392 = vrot.lane.b32.xlu0 %v7489_v48, %s3594_s17  ;;  %v7505_v43 = vld [vmem:[#allocation161_spill] sm:$0xff]  ;;  %v7506_v48 = vld [vmem:[#allocation162_spill] sm:$0xff] }
 0x250   : > { %v1104_v12 = vsel %vm7210_vm2, %v1096_v57, %v7505_v43 }
 0x251   : > { %v5185_v45 = vpop.permute.xlu1 %1775  ;;  %v5187_v53 = vpop.permute.xlu0 %1773 }
 0x252   : > { %7490 = vst [vmem:[#allocation170_spill] sm:$0xff] %v5185_v45  ;;  %7491 = vst [vmem:[#allocation177_spill] sm:$0xff] %v5187_v53  ;;  %v7590_v53 = vld [vmem:[#allocation77_spill] sm:$0xff] }
 0x253   : > { %1422 = vrot.lane.b32.xlu1 %v7492_v15, %s3595_s23  ;;  %1420 = vrot.lane.b32.xlu0 %v1412_v7, %s3595_s23  ;;  %v3489_v7 = vld [vmem:[%s3693_s9 + $0xc0] sm:$0x1f]  ;;  %v1103_v15 = vsel %vm7210_vm2, %v1095_v1, %v7506_v48 }
 0x255   : > { %v5193_v47 = vpop.permute.xlu1 %1795  ;;  %v5195_v28 = vpop.permute.xlu0 %1793 }
 0x256   : > { %7493 = vst [vmem:[#allocation178_spill] sm:$0xff] %v5193_v47  ;;  %7494 = vst [vmem:[#allocation13_spill] sm:$0xff] %v5195_v28  ;;  %v7618_v47 = vld [vmem:[#allocation147_spill] sm:$0xff] }
 0x257   : > { %1426 = vrot.lane.b32.xlu1 %v7496_v46, %s3595_s23  ;;  %1424 = vrot.lane.b32.xlu0 %v7498_v24, %s3595_s23  ;;  %v1112_v46 = vsel %vm774_vm3, %v1104_v12, %v7507_v59  ;;  %v1111_v24 = vsel %vm774_vm3, %v1103_v15, %v7508_v42  ;;  %v7518_v59 = vld [vmem:[#allocation160_spill] sm:$0xff] }
 0x258   : > { %v1120_v62 = vsel %vm783_vm4, %v1112_v46, %v7511_v41  ;;  %v7519_v46 = vld [vmem:[#allocation179_spill] sm:$0xff]  ;;  %v7521_v41 = vld [vmem:[#allocation165_spill] sm:$0xff] }
 0x259   : > { %v5203_v58 = vpop.permute.xlu1 %1799  ;;  %v5205_v56 = vpop.permute.xlu0 %1797  ;;  %v1128_v57 = vsel %vm792_vm5, %v1120_v62, %v4790_v34  ;;  %v1098_v42 = vsel %vm756_vm1, %v7519_v46, %v7518_v59 }
 0x25a   : > { %7499 = vst [vmem:[#allocation14_spill] sm:$0xff] %v5203_v58  ;;  %7500 = vst [vmem:[#allocation20_spill] sm:$0xff] %v5205_v56  ;;  %v1136_v43 = vsel %vm801_vm6, %v1128_v57, %v4826_v10  ;;  %v3491_v10 = vld [vmem:[%s3693_s9 + $0x1c8] sm:$0x1f] }
 0x25b   : > { %1446 = vrot.lane.b32.xlu1 %v5208_v4, %s3596_s25  ;;  %1444 = vrot.lane.b32.xlu0 %v4975_v11, %s3596_s25  ;;  %v1144_v34 = vsel %vm810_vm7, %v1136_v43, %v4865_v39 }
 0x25d   : > { %v5214_v5 = vpop.permute.xlu1 %1819  ;;  %v5216_v27 = vpop.permute.xlu0 %1817 }
 0x25e   : > { %7501 = vst [vmem:[#allocation21_spill] sm:$0xff] %v5214_v5  ;;  %7502 = vst [vmem:[#allocation223_spill] sm:$0xff] %v5216_v27  ;;  %v7606_v27 = vld [vmem:[#allocation125_spill] sm:$0xff] }
 0x25f   : > { %1450 = vrot.lane.b32.xlu1 %v3489_v7, %s3596_s25  ;;  %1448 = vrot.lane.b32.xlu0 %v5227_v49, %s3596_s25  ;;  %v7512_v7 = vld [vmem:[#allocation176_spill] sm:$0xff] }
 0x260   : > { %v1119_v56 = vsel %vm783_vm4, %v1111_v24, %v7512_v7  ;;  %v7522_v7 = vld [vmem:[#allocation173_spill] sm:$0xff] }
 0x261   : > { %v5239_v61 = vpop.permute.xlu1 %1823  ;;  %v5241_v32 = vpop.permute.xlu0 %1821  ;;  %v1127_v1 = vsel %vm792_vm5, %v1119_v56, %v4792_v0 }
 0x262   : > { %7509 = vst [vmem:[#allocation155_spill] sm:$0xff] %v5239_v61  ;;  %7510 = vst [vmem:[#allocation156_spill] sm:$0xff] %v5241_v32  ;;  %v1135_v12 = vsel %vm801_vm6, %v1127_v1, %v4828_v13  ;;  %v7523_v1 = vld [vmem:[#allocation174_spill] sm:$0xff]  ;;  %v7580_v32 = vld [vmem:[#allocation39_spill] sm:$0xff] }
 0x263   : > { %1470 = vrot.lane.b32.xlu1 %v4931_v38, %s3597_s26  ;;  %1468 = vrot.lane.b32.xlu0 %v4915_v16, %s3597_s26  ;;  %v1143_v48 = vsel %vm810_vm7, %v1135_v12, %v4867_v14  ;;  %v1152_v16 = vsel %vm819_vm8, %v1144_v34, %v4910_v33  ;;  %v7517_v14 = vld [vmem:[#allocation157_spill] sm:$0xff]  ;;  %v5284_v33 = vld [vmem:[%s3693_s9 + $0x110] sm:$0x1f] }
 0x264   : > { %v1151_v38 = vsel %vm819_vm8, %v1143_v48, %v4912_v6  ;;  %v1097_v15 = vsel %vm756_vm1, %v3491_v10, %v7517_v14  ;;  %v7520_v6 = vld [vmem:[#allocation164_spill] sm:$0xff]  ;;  %v7526_v14 = vld [vmem:[#allocation195_spill] sm:$0xff] }
 0x265   : > { %v5263_v0 = vpop.permute.xlu1 %1843  ;;  %v5265_v56 = vpop.permute.xlu0 %1841  ;;  %v1106_v24 = vsel %vm7210_vm2, %v1098_v42, %v7520_v6  ;;  %v1105_v62 = vsel %vm7210_vm2, %v1097_v15, %v7521_v41 }
 0x266   : > { %7513 = vst [vmem:[#allocation161_spill] sm:$0xff] %v5263_v0  ;;  %7514 = vst [vmem:[#allocation162_spill] sm:$0xff] %v5265_v56  ;;  %v1114_v57 = vsel %vm774_vm3, %v1106_v24, %v7522_v7  ;;  %v1113_v43 = vsel %vm774_vm3, %v1105_v62, %v7523_v1  ;;  %v7536_v24 = vld [vmem:[#allocation201_spill] sm:$0xff]  ;;  %v7601_v56 = vld [vmem:[#allocation27_spill] sm:$0xff] }
 0x267   : > { %1173 = vrot.lane.b32.xlu1 %v1152_v16, %s3602_s11  ;;  %1171 = vrot.lane.b32.xlu0 %v1151_v38, %s3602_s11  ;;  %v1122_v48 = vsel %vm783_vm4, %v1114_v57, %v4780_v35  ;;  %v7537_v41 = vrot.slane %v7536_v24, 1  ;;  %v7538_v57 = vld [vmem:[#allocation169_spill] sm:$0xff] }
 0x268   : > { %v1130_v16 = vsel %vm792_vm5, %v1122_v48, %v4818_v55 }
 0x269   : > { %v5273_v13 = vpop.permute.xlu1 %1847  ;;  %v5275_v39 = vpop.permute.xlu0 %1845  ;;  %v1138_v10 = vsel %vm801_vm6, %v1130_v16, %v4850_v22 }
 0x26a   : > { %7515 = vst [vmem:[#allocation166_spill] sm:$0xff] %v5273_v13  ;;  %7516 = vst [vmem:[#allocation167_spill] sm:$0xff] %v5275_v39  ;;  %v7562_v39 = vld [vmem:[#allocation19_spill] sm:$0xff]  ;;  %v7563_v13 = vld [vmem:[#allocation212_spill] sm:$0xff] }
 0x26b   : > { %1474 = vrot.lane.b32.xlu1 %v5284_v33, %s3597_s26  ;;  %1472 = vrot.lane.b32.xlu0 %v4926_v8, %s3597_s26  ;;  %v1121_v8 = vsel %vm783_vm4, %v1113_v43, %v4782_v40  ;;  %v1146_v40 = vsel %vm810_vm7, %v1138_v10, %v4902_v60  ;;  %v7542_v10 = vld [vmem:[#allocation181_spill] sm:$0xff] }
 0x26c   : > { %v1129_v38 = vsel %vm792_vm5, %v1121_v8, %v4820_v51  ;;  %v7540_v8 = vld [vmem:[#allocation172_spill] sm:$0xff] }
 0x26d   : > { %v5298_v12 = vpop.permute.xlu1 %1868  ;;  %v5300_v34 = vpop.permute.xlu0 %1866  ;;  %v1137_v35 = vsel %vm801_vm6, %v1129_v38, %v4852_v23  ;;  %v7533_v23 = vld [vmem:[#allocation8_spill] sm:$0xff]  ;;  %v3493_v38 = vld [vmem:[%s3693_s9 + $0x238] sm:$0x1f] }
 0x26e   : > { %7524 = vst [vmem:[#allocation175_spill] sm:$0xff] %v5298_v12  ;;  %7525 = vst [vmem:[#allocation176_spill] sm:$0xff] %v5300_v34  ;;  %v1145_v55 = vsel %vm810_vm7, %v1137_v35, %v7526_v14  ;;  %v1907_v35 = vsel %vm756_vm1, %v3493_v38, %v7542_v10  ;;  %v3494_v14 = vld [vmem:[%s3693_s9 + $0x1e8] sm:$0x1f]  ;;  %v7548_v38 = vld [vmem:[#allocation182_spill] sm:$0xff] }
 0x26f   : > { %1494 = vrot.lane.b32.xlu1 %v3831_v31, %s3598_s30  ;;  %1492 = vrot.lane.b32.xlu0 %v3813_v26, %s3598_s30  ;;  %v7529_v31 = vld [vmem:[#allocation6_spill] sm:$0xff]  ;;  %v7530_v26 = vld [vmem:[#allocation200_spill] sm:$0xff] }
 0x270   : > { %v1154_v59 = vsel %vm819_vm8, %v1146_v40, %v7529_v31  ;;  %v1153_v46 = vsel %vm819_vm8, %v1145_v55, %v7530_v26  ;;  %v7543_v40 = vld [vmem:[#allocation214_spill] sm:$0xff]  ;;  %v7545_v31 = vld [vmem:[#allocation185_spill] sm:$0xff] }
 0x271   : > { %v5322_v15 = vpop.permute.xlu1 %1872  ;;  %v5324_v51 = vpop.permute.xlu0 %1870  ;;  %v7546_v26 = vld [vmem:[#allocation193_spill] sm:$0xff] }
 0x272   : > { %7527 = vst [vmem:[#allocation157_spill] sm:$0xff] %v5322_v15  ;;  %7528 = vst [vmem:[#allocation160_spill] sm:$0xff] %v5324_v51  ;;  %v7561_v51 = vld [vmem:[#allocation197_spill] sm:$0xff] }
 0x273   : > { %1177 = vrot.lane.b32.xlu1 %v1154_v59, %s3602_s11  ;;  %1175 = vrot.lane.b32.xlu0 %v1153_v46, %s3602_s11  ;;  %v1915_v59 = vsel %vm7210_vm2, %v1907_v35, %v7545_v31  ;;  %v7547_v46 = vld [vmem:[#allocation194_spill] sm:$0xff]  ;;  %v7550_v35 = vld [vmem:[#allocation199_spill] sm:$0xff] }
 0x274   : > { %v1923_v24 = vsel %vm774_vm3, %v1915_v59, %v7547_v46  ;;  %v7553_v59 = vld [vmem:[#allocation204_spill] sm:$0xff]  ;;  %v7554_v46 = vld [vmem:[#allocation205_spill] sm:$0xff] }
 0x275   : > { %v5332_v22 = vpop.permute.xlu1 %1893  ;;  %v5334_v60 = vpop.permute.xlu0 %1891 }
 0x276   : > { %7531 = vst [vmem:[#allocation179_spill] sm:$0xff] %v5332_v22  ;;  %7532 = vst [vmem:[#allocation164_spill] sm:$0xff] %v5334_v60  ;;  %v7581_v60 = vld [vmem:[#allocation50_spill] sm:$0xff] }
 0x277   : > { %1498 = vrot.lane.b32.xlu1 %v7533_v23, %s3598_s30  ;;  %1496 = vrot.lane.b32.xlu0 %v3828_v30, %s3598_s30 }
 0x279   : > { %v5340_v42 = vpop.permute.xlu1 %1897  ;;  %v5342_v6 = vpop.permute.xlu0 %1895 }
 0x27a   : > { %7534 = vst [vmem:[#allocation165_spill] sm:$0xff] %v5340_v42  ;;  %7535 = vst [vmem:[#allocation173_spill] sm:$0xff] %v5342_v6  ;;  %v5418_v42 = vld [vmem:[%s3693_s9 + $0x200] sm:$0x1f] }
 0x27b   : > { %1519 = vrot.lane.b32.xlu1 %v4694_v21, %s3599_s6  ;;  %1517 = vrot.lane.b32.xlu0 %v7537_v41, %s3599_s6  ;;  %v7539_v21 = vrot.slane %v4975_v11, 1 }
 0x27d   : > { %v5349_v62 = vpop.permute.xlu1 %1198  ;;  %v5351_v7 = vpop.permute.xlu0 %1196 }
 0x27f   : > { %1523 = vrot.lane.b32.xlu1 %v7538_v57, %s3599_s6  ;;  %1521 = vrot.lane.b32.xlu0 %v4691_v20, %s3599_s6 }
 0x281   : > { %v5357_v30 = vpop.permute.xlu1 %1202  ;;  %v5359_v1 = vpop.permute.xlu0 %1200 }
 0x283   : > { %1544 = vrot.lane.b32.xlu1 %v4722_v18, %s3600_s7  ;;  %1542 = vrot.lane.b32.xlu0 %v7539_v21, %s3600_s7  ;;  %v7541_v18 = vld [vmem:[#allocation180_spill] sm:$0xff] }
 0x284   : > { %v1908_v11 = vsel %vm756_vm1, %v5055_v36, %v7541_v18  ;;  %v5401_v18 = vld [vmem:[%s3693_s9 + $0x250] sm:$0x1f] }
 0x285   : > { %v5366_v43 = vpop.permute.xlu1 %1222  ;;  %v5368_v48 = vpop.permute.xlu0 %1220  ;;  %v1910_v10 = vsel %vm756_vm1, %v5401_v18, %v7548_v38  ;;  %v7556_v38 = vld [vmem:[#allocation188_spill] sm:$0xff] }
 0x287   : > { %1548 = vrot.lane.b32.xlu1 %v7540_v8, %s3600_s7  ;;  %1546 = vrot.lane.b32.xlu0 %v4719_v19, %s3600_s7  ;;  %v7544_v19 = vld [vmem:[#allocation184_spill] sm:$0xff] }
 0x288   : > { %v1916_v55 = vsel %vm7210_vm2, %v1908_v11, %v7544_v19  ;;  %v7549_v11 = vld [vmem:[#allocation198_spill] sm:$0xff]  ;;  %v7551_v19 = vld [vmem:[#allocation183_spill] sm:$0xff] }
 0x289   : > { %v5374_v20 = vpop.permute.xlu1 %1226  ;;  %v5376_v16 = vpop.permute.xlu0 %1224  ;;  %v1924_v36 = vsel %vm774_vm3, %v1916_v55, %v7546_v26  ;;  %v7552_v55 = vld [vmem:[#allocation218_spill] sm:$0xff] }
 0x28a   : > { %v1909_v31 = vsel %vm756_vm1, %v7552_v55, %v7551_v19  ;;  %v7558_v19 = vld [vmem:[#allocation208_spill] sm:$0xff]  ;;  %v7559_v55 = vld [vmem:[#allocation209_spill] sm:$0xff] }
 0x28b   : > { %1568 = vrot.lane.b32.xlu1 %v7543_v40, %s3601_s8  ;;  %1566 = vrot.lane.b32.xlu0 %v3494_v14, %s3601_s8  ;;  %v1932_v40 = vsel %vm783_vm4, %v1924_v36, %v7549_v11  ;;  %v1931_v14 = vsel %vm783_vm4, %v1923_v24, %v7550_v35  ;;  %v7555_v36 = vld [vmem:[#allocation213_spill] sm:$0xff]  ;;  %v1918_v24 = vsel %vm7210_vm2, %v1910_v10, %v7556_v38 }
 0x28c   : > { %v1940_v26 = vsel %vm792_vm5, %v1932_v40, %v7553_v59  ;;  %v1939_v6 = vsel %vm792_vm5, %v1931_v14, %v7554_v46  ;;  %v7557_v11 = vld [vmem:[#allocation189_spill] sm:$0xff]  ;;  %v7560_v59 = vld [vmem:[#allocation196_spill] sm:$0xff] }
 0x28d   : > { %v5396_v41 = vpop.permute.xlu1 %1254  ;;  %v5398_v21 = vpop.permute.xlu0 %1252  ;;  %v1917_v35 = vsel %vm7210_vm2, %v1909_v31, %v7557_v11  ;;  %v1948_v40 = vsel %vm801_vm6, %v1940_v26, %v7558_v19  ;;  %v1947_v14 = vsel %vm801_vm6, %v1939_v6, %v7559_v55  ;;  %v1926_v46 = vsel %vm774_vm3, %v1918_v24, %v7560_v59  ;;  %v7564_v26 = vld [vmem:[#allocation202_spill] sm:$0xff]  ;;  %v7565_v6 = vld [vmem:[#allocation203_spill] sm:$0xff] }
 0x28e   : > { %v1925_v15 = vsel %vm774_vm3, %v1917_v35, %v7561_v51  ;;  %v1955_v10 = vsel %vm810_vm7, %v1947_v14, %v7563_v13  ;;  %v1934_v11 = vsel %vm783_vm4, %v1926_v46, %v7564_v26  ;;  %v7566_v24 = vld [vmem:[#allocation26_spill] sm:$0xff]  ;;  %v7567_v51 = vld [vmem:[#allocation217_spill] sm:$0xff]  ;;  %v7569_v13 = vld [vmem:[#allocation207_spill] sm:$0xff] }
 0x28f   : > { %1572 = vrot.lane.b32.xlu1 %v5418_v42, %s3601_s8  ;;  %1570 = vrot.lane.b32.xlu0 %v7555_v36, %s3601_s8  ;;  %v1956_v36 = vsel %vm810_vm7, %v1948_v40, %v7562_v39  ;;  %v1933_v19 = vsel %vm783_vm4, %v1925_v15, %v7565_v6  ;;  %v1963_v35 = vsel %vm819_vm8, %v1955_v10, %v7567_v51  ;;  %v7568_v39 = vld [vmem:[#allocation206_spill] sm:$0xff]  ;;  %v7571_v46 = vld [vmem:[#allocation211_spill] sm:$0xff]  ;;  %v7573_v6 = vld [vmem:[#allocation216_spill] sm:$0xff] }
 0x290   : > { %v1964_v55 = vsel %vm819_vm8, %v1956_v36, %v7566_v24  ;;  %v1942_v40 = vsel %vm792_vm5, %v1934_v11, %v7568_v39  ;;  %v1941_v14 = vsel %vm792_vm5, %v1933_v19, %v7569_v13  ;;  %v7570_v59 = vld [vmem:[#allocation210_spill] sm:$0xff]  ;;  %v7572_v26 = vld [vmem:[#allocation215_spill] sm:$0xff] }
 0x291   : > { %v5440_v38 = vpop.permute.xlu1 %1258  ;;  %v5442_v31 = vpop.permute.xlu0 %1256  ;;  %v1950_v15 = vsel %vm801_vm6, %v1942_v40, %v7570_v59  ;;  %v1949_v36 = vsel %vm801_vm6, %v1941_v14, %v7571_v46  ;;  %v5481_v40 = vld [vmem:[%s3693_s9 + $0x118] sm:$0x1f]  ;;  %v5492_v13 = vld [vmem:[%s3693_s9 + $0x128] sm:$0x1f]  ;;  %v5497_v14 = vld [vmem:[%s3693_s9 + $0x120] sm:$0x1f] }
 0x292   : > { %v1958_v10 = vsel %vm810_vm7, %v1950_v15, %v7572_v26  ;;  %v1957_v11 = vsel %vm810_vm7, %v1949_v36, %v7573_v6  ;;  %v3500_v46 = vld [vmem:[%s3693_s9] sm:$0x1f]  ;;  %v3501_v26 = vld [vmem:[%s3693_s9 + $0x8] sm:$0x1f] }
 0x293   : > { %1981 = vrot.lane.b32.xlu1 %v1964_v55, %s3602_s11  ;;  %1979 = vrot.lane.b32.xlu0 %v1963_v35, %s3602_s11  ;;  %v1966_v55 = vsel %vm819_vm8, %v1958_v10, %v5070_v63  ;;  %v1965_v51 = vsel %vm819_vm8, %v1957_v11, %v5072_v29  ;;  %v7576_v10 = vld [vmem:[#allocation31_spill] sm:$0xff] }
 0x294   : > { %v758_v6 = vsel %vm756_vm1, %v3501_v26, %v7576_v10  ;;  %v7578_v11 = vld [vmem:[#allocation7_spill] sm:$0xff]  ;;  %v7583_v10 = vld [vmem:[#allocation58_spill] sm:$0xff] }
 0x295   : > { %v5466_v24 = vpop.permute.xlu1 %1286  ;;  %v5468_v19 = vpop.permute.xlu0 %1284 }
 0x297   : > { %1985 = vrot.lane.b32.xlu1 %v1966_v55, %s3602_s11  ;;  %1983 = vrot.lane.b32.xlu0 %v1965_v51, %s3602_s11  ;;  %v7579_v55 = vld [vmem:[#allocation38_spill] sm:$0xff] }
 0x298   : > { %v767_v51 = vsel %vm7210_vm2, %v758_v6, %v7579_v55  ;;  %v7585_v6 = vld [vmem:[#allocation67_spill] sm:$0xff] }
 0x299   : > { %v5476_v35 = vpop.permute.xlu1 %1290  ;;  %v5478_v39 = vpop.permute.xlu0 %1288  ;;  %v776_v22 = vsel %vm774_vm3, %v767_v51, %v7581_v60  ;;  %v7587_v60 = vld [vmem:[#allocation9_spill] sm:$0xff]  ;;  %v7589_v51 = vld [vmem:[#allocation76_spill] sm:$0xff] }
 0x29a   : > { %v785_v34 = vsel %vm783_vm4, %v776_v22, %v7583_v10 }
 0x29b   : > { %1206 = vrot.lane.b32.xlu1 %v5481_v40, %s7574_s15  ;;  %1204 = vrot.lane.b32.xlu0 %v5284_v33, %s7574_s15  ;;  %v7575_v33 = vld [vmem:[#allocation28_spill] sm:$0xff]  ;;  %v794_v55 = vsel %vm792_vm5, %v785_v34, %v7585_v6  ;;  %v7592_v34 = vld [vmem:[#allocation86_spill] sm:$0xff] }
 0x29c   : > { %v757_v36 = vsel %vm756_vm1, %v3500_v46, %v7575_v33  ;;  %v7582_v46 = vld [vmem:[#allocation51_spill] sm:$0xff] }
 0x29d   : > { %v5487_v63 = vpop.permute.xlu1 %1310  ;;  %v5489_v29 = vpop.permute.xlu0 %1308  ;;  %v766_v61 = vsel %vm7210_vm2, %v757_v36, %v7580_v32  ;;  %v7586_v32 = vld [vmem:[#allocation68_spill] sm:$0xff] }
 0x29e   : > { %v775_v33 = vsel %vm774_vm3, %v766_v61, %v7582_v46  ;;  %v7588_v61 = vld [vmem:[#allocation10_spill] sm:$0xff]  ;;  %v803_v46 = vsel %vm801_vm6, %v794_v55, %v7589_v51  ;;  %v7594_v55 = vld [vmem:[#allocation95_spill] sm:$0xff] }
 0x29f   : > { %1210 = vrot.lane.b32.xlu1 %v5492_v13, %s7574_s15  ;;  %1208 = vrot.lane.b32.xlu0 %v5497_v14, %s7574_s15  ;;  %s7653_s15 = smov 18  }
 0x2a1   : > { %v5501_v59 = vpop.permute.xlu1 %1314  ;;  %v5503_v15 = vpop.permute.xlu0 %1312 }
 0x2a3   : > { %1230 = vrot.lane.b32.xlu1 %v7578_v11, %s7577_s12  ;;  %1228 = vrot.lane.b32.xlu0 %v7533_v23, %s7577_s12  ;;  %v7584_v23 = vld [vmem:[#allocation59_spill] sm:$0xff] }
 0x2a4   : > { %v784_v12 = vsel %vm783_vm4, %v775_v33, %v7584_v23  ;;  %v7591_v33 = vld [vmem:[#allocation85_spill] sm:$0xff] }
 0x2a5   : > { %v5523_v58 = vpop.permute.xlu1 %1334  ;;  %v5525_v26 = vpop.permute.xlu0 %1332  ;;  %v793_v36 = vsel %vm792_vm5, %v784_v12, %v7586_v32  ;;  %v812_v10 = vsel %vm810_vm7, %v803_v46, %v7591_v33  ;;  %v7593_v32 = vld [vmem:[#allocation94_spill] sm:$0xff]  ;;  %v7596_v46 = vld [vmem:[#allocation103_spill] sm:$0xff] }
 0x2a6   : > { %v802_v22 = vsel %vm801_vm6, %v793_v36, %v7590_v53  ;;  %v821_v45 = vsel %vm819_vm8, %v812_v10, %v7593_v32  ;;  %v7595_v53 = vld [vmem:[#allocation102_spill] sm:$0xff]  ;;  %v7600_v32 = vld [vmem:[#allocation111_spill] sm:$0xff] }
 0x2a7   : > { %1234 = vrot.lane.b32.xlu1 %v7587_v60, %s7577_s12  ;;  %1232 = vrot.lane.b32.xlu0 %v7588_v61, %s7577_s12  ;;  %v811_v12 = vsel %vm810_vm7, %v802_v22, %v7592_v34  ;;  %v830_v36 = vsel %vm828_vm9, %v821_v45, %v7595_v53  ;;  %v7598_v22 = vld [vmem:[#allocation168_spill] sm:$0xff]  ;;  %v7599_v34 = vld [vmem:[#allocation110_spill] sm:$0xff] }
 0x2a8   : > { %v820_v51 = vsel %vm819_vm8, %v811_v12, %v7594_v55  ;;  %v839_v10 = vsel %vm837_vm10, %v830_v36, %v7599_v34  ;;  %v3502_v55 = vld [vmem:[%s3693_s9 + $0x10] sm:$0x1f]  ;;  %v7602_v53 = vld [vmem:[#allocation118_spill] sm:$0xff]  ;;  %v3503_v36 = vld [vmem:[%s3693_s9 + $0x18] sm:$0x1f] }
 0x2a9   : > { %v5547_v23 = vpop.permute.xlu1 %1338  ;;  %v5549_v6 = vpop.permute.xlu0 %1336  ;;  %v829_v33 = vsel %vm828_vm9, %v820_v51, %v7596_v46  ;;  %v759_v45 = vsel %vm756_vm1, %v3502_v55, %v7601_v56  ;;  %v848_v51 = vsel %vm846_vm11, %v839_v10, %v7602_v53  ;;  %v7603_v46 = vld [vmem:[#allocation119_spill] sm:$0xff]  ;;  %v7604_v34 = vld [vmem:[#allocation30_spill] sm:$0xff] }
 0x2aa   : > { %v838_v12 = vsel %vm837_vm10, %v829_v33, %v7600_v32  ;;  %v760_v33 = vsel %vm756_vm1, %v3503_v36, %v7604_v34  ;;  %v7605_v32 = vld [vmem:[#allocation124_spill] sm:$0xff]  ;;  %v7607_v10 = vld [vmem:[#allocation42_spill] sm:$0xff]  ;;  %v7611_v36 = vld [vmem:[#allocation187_spill] sm:$0xff] }
 0x2ab   : > { %1262 = vrot.lane.b32.xlu1 %v7598_v22, %s7597_s10  ;;  %1260 = vrot.lane.b32.xlu0 %v7538_v57, %s7597_s10  ;;  %v847_v0 = vsel %vm846_vm11, %v838_v12, %v7603_v46  ;;  %v857_v17 = vsel %vm7222_vm12, %v848_v51, %v7605_v32  ;;  %v769_v55 = vsel %vm7210_vm2, %v760_v33, %v7607_v10  ;;  %v7608_v12 = vld [vmem:[#allocation131_spill] sm:$0xff]  ;;  %v7609_v46 = vld [vmem:[#allocation132_spill] sm:$0xff] }
 0x2ac   : > { %v856_v56 = vsel %vm7222_vm12, %v847_v0, %v7606_v27  ;;  %v866_v53 = vsel %vm7221_vm13, %v857_v17, %v7608_v12  ;;  %v7612_v51 = vld [vmem:[#allocation43_spill] sm:$0xff]  ;;  %v7613_v0 = vld [vmem:[#allocation52_spill] sm:$0xff] }
 0x2ad   : > { %v5574_v44 = vpop.permute.xlu1 %1358  ;;  %v5576_v57 = vpop.permute.xlu0 %1356  ;;  %v865_v5 = vsel %vm7221_vm13, %v856_v56, %v7609_v46  ;;  %v768_v27 = vsel %vm7210_vm2, %v759_v45, %v7612_v51  ;;  %v778_v34 = vsel %vm774_vm3, %v769_v55, %v7613_v0  ;;  %v7614_v33 = vld [vmem:[#allocation139_spill] sm:$0xff]  ;;  %v7615_v17 = vld [vmem:[#allocation140_spill] sm:$0xff]  ;;  %v7616_v56 = vld [vmem:[#allocation53_spill] sm:$0xff]  ;;  %vm7214_vm2 = vcmask 613376  }
 0x2ae   : > { %v875_v32 = vsel %vm7220_vm14, %v866_v53, %v7614_v33  ;;  %v874_v10 = vsel %vm7220_vm14, %v865_v5, %v7615_v17  ;;  %v777_v12 = vsel %vm774_vm3, %v768_v27, %v7616_v56  ;;  %v7617_v46 = vld [vmem:[#allocation60_spill] sm:$0xff]  ;;  %v7620_v0 = vld [vmem:[#allocation61_spill] sm:$0xff] }
 0x2af   : > { %1266 = vrot.lane.b32.xlu1 %v7610_v37, %s7597_s10  ;;  %1264 = vrot.lane.b32.xlu0 %v7611_v36, %s7597_s10  ;;  %v787_v28 = vsel %vm783_vm4, %v778_v34, %v7617_v46  ;;  %v884_v3 = vsel %vm882_vm15, %v875_v32, %v7618_v47  ;;  %v883_v45 = vsel %vm882_vm15, %v874_v10, %v7619_v25  ;;  %v7621_v27 = vld [vmem:[#allocation69_spill] sm:$0xff]  ;;  %v7622_v34 = vld [vmem:[#allocation70_spill] sm:$0xff]  ;;  %v7624_v47 = vld [vmem:[#allocation171_spill] sm:$0xff]  ;;  %s3220_s10 = sshll.u32 %s3661_s22, 8  ;;  %s3607_s22 = smov [#allocation3]  }
 0x2b0   : > { %v786_v53 = vsel %vm783_vm4, %v777_v12, %v7620_v0  ;;  %v796_v17 = vsel %vm792_vm5, %v787_v28, %v7621_v27  ;;  %v7625_v32 = vld [vmem:[#allocation78_spill] sm:$0xff]  ;;  %v7627_v46 = vld [vmem:[#allocation87_spill] sm:$0xff]  ;;  %v7628_v28 = vld [vmem:[#allocation88_spill] sm:$0xff] }
 0x2b1   : > { %v1166_v51 = vpop.permute.xlu1 %1165  ;;  %v1164_v55 = vpop.permute.xlu0 %1163  ;;  %v795_v56 = vsel %vm792_vm5, %v786_v53, %v7622_v34  ;;  %v805_v10 = vsel %vm801_vm6, %v796_v17, %v7625_v32  ;;  %v7631_v27 = vld [vmem:[#allocation104_spill] sm:$0xff]  ;;  %v7632_v34 = vld [vmem:[#allocation105_spill] sm:$0xff]  ;;  %v7633_v32 = vld [vmem:[#allocation190_spill] sm:$0xff] }
 0x2b2   : > { %v1189_v33 = vsel %vm7217_vm0, %v884_v3, %v1166_v51  ;;  %v1188_v5 = vsel %vm7217_vm0, %v883_v45, %v1164_v55  ;;  %v7626_v3 = vld [vmem:[#allocation79_spill] sm:$0xff]  ;;  %v814_v45 = vsel %vm810_vm7, %v805_v10, %v7627_v46  ;;  %v7635_v10 = vld [vmem:[#allocation112_spill] sm:$0xff] }
 0x2b3   : > { %1294 = vrot.lane.b32.xlu1 %v7624_v47, %s7623_s13  ;;  %1292 = vrot.lane.b32.xlu0 %v7540_v8, %s7623_s13  ;;  %v2034_v25 = vcombine.low %v1188_v5, %v1189_v33  ;;  %v804_v12 = vsel %vm801_vm6, %v795_v56, %v7626_v3  ;;  %v7629_v8 = vld [vmem:[#allocation96_spill] sm:$0xff]  ;;  %v7630_v33 = vld [vmem:[#allocation97_spill] sm:$0xff] }
 0x2b4   : > { %v813_v51 = vsel %vm810_vm7, %v804_v12, %v7628_v28  ;;  %v823_v53 = vsel %vm819_vm8, %v814_v45, %v7629_v8  ;;  %v7636_v12 = vld [vmem:[#allocation113_spill] sm:$0xff]  ;;  %v7637_v45 = vld [vmem:[#allocation120_spill] sm:$0xff] }
 0x2b5   : > { %v5631_v55 = vpop.permute.xlu1 %1362  ;;  %3379 = vmatprep.mubr.msk.f32.mxu0 %vm7214_vm2, %v2034_v25  ;;  %v5634_v0 = vpop.permute.xlu0 %1360  ;;  %v822_v5 = vsel %vm819_vm8, %v813_v51, %v7630_v33  ;;  %v832_v17 = vsel %vm828_vm9, %v823_v53, %v7631_v27  ;;  %v7634_v25 = vld [vmem:[#allocation192_spill] sm:$0xff]  ;;  %v7638_v51 = vld [vmem:[#allocation121_spill] sm:$0xff] }
 0x2b6   : > { %v831_v56 = vsel %vm828_vm9, %v822_v5, %v7632_v34  ;;  %v841_v3 = vsel %vm837_vm10, %v832_v17, %v7635_v10  ;;  %v7639_v5 = vld [vmem:[#allocation126_spill] sm:$0xff]  ;;  %v7640_v34 = vld [vmem:[#allocation127_spill] sm:$0xff]  ;;  %v7641_v10 = vld [vmem:[#allocation133_spill] sm:$0xff] }
 0x2b7   : > { %1298 = vrot.lane.b32.xlu1 %v7633_v32, %s7623_s13  ;;  %1296 = vrot.lane.b32.xlu0 %v7634_v25, %s7623_s13  ;;  %v840_v46 = vsel %vm837_vm10, %v831_v56, %v7636_v12  ;;  %v850_v28 = vsel %vm846_vm11, %v841_v3, %v7637_v45  ;;  %v7642_v12 = vld [vmem:[#allocation134_spill] sm:$0xff]  ;;  %v5669_v45 = vld [vmem:[%s3693_s9 + $0x208] sm:$0x1f] }
 0x2b8   : > { %v849_v8 = vsel %vm846_vm11, %v840_v46, %v7638_v51  ;;  %v859_v27 = vsel %vm7222_vm12, %v850_v28, %v7639_v5  ;;  %7643 = vst [vmem:[#allocation174_spill] sm:$0xff] %v5669_v45  ;;  %v7644_v46 = vld [vmem:[#allocation141_spill] sm:$0xff]  ;;  %v7645_v51 = vld [vmem:[#allocation142_spill] sm:$0xff] }
 0x2b9   : > { %v5656_v53 = vpop.permute.xlu1 %1390  ;;  %v5658_v33 = vpop.permute.xlu0 %1388  ;;  %v858_v17 = vsel %vm7222_vm12, %v849_v8, %v7640_v34  ;;  %v868_v56 = vsel %vm7221_vm13, %v859_v27, %v7641_v10  ;;  %v7646_v5 = vld [vmem:[#allocation149_spill] sm:$0xff]  ;;  %v7647_v34 = vld [vmem:[#allocation150_spill] sm:$0xff] }
 0x2ba   : > { %v867_v3 = vsel %vm7221_vm13, %v858_v17, %v7642_v12  ;;  %v877_v28 = vsel %vm7220_vm14, %v868_v56, %v7644_v46  ;;  %v5686_v56 = vld [vmem:[%s3693_s9 + $0x218] sm:$0x1f]  ;;  %v7675_v25 = vld [vmem:[#allocation82_spill] sm:$0xff] }
 0x2bb   : > { %1318 = vrot.lane.b32.xlu1 %v5669_v45, %s3591_s14  ;;  %1316 = vrot.lane.b32.xlu0 %v5418_v42, %s3591_s14  ;;  %v876_v8 = vsel %vm7220_vm14, %v867_v3, %v7645_v51  ;;  %v886_v27 = vsel %vm882_vm15, %v877_v28, %v7646_v5  ;;  %7648 = vst [vmem:[#allocation195_spill] sm:$0xff] %v5686_v56  ;;  %v5691_v3 = vld [vmem:[%s3693_s9 + $0x210] sm:$0x1f]  ;;  %v5701_v51 = vld [vmem:[%s3693_s9 + $0x258] sm:$0x1f]  ;;  %v7662_v45 = vld [vmem:[#allocation46_spill] sm:$0xff] }
 0x2bc   : > { %v885_v17 = vsel %vm882_vm15, %v876_v8, %v7647_v34  ;;  %7649 = vst [vmem:[#allocation6_spill] sm:$0xff] %v5691_v3  ;;  %7652 = vst [vmem:[#allocation201_spill] sm:$0xff] %v5701_v51  ;;  %v5712_v5 = vld [vmem:[%s3693_s9 + $0x268] sm:$0x1f] }
 0x2bd   : > { %v1170_v10 = vpop.permute.xlu1 %1169  ;;  %v1168_v12 = vpop.permute.xlu0 %1167  ;;  %7654 = vst [vmem:[#allocation169_spill] sm:$0xff] %v5712_v5 }
 0x2be   : > { %v1191_v2 = vsel %vm7217_vm0, %v886_v27, %v1170_v10  ;;  %v1190_v42 = vsel %vm7217_vm0, %v885_v17, %v1168_v12  ;;  %v3510_v17 = vld [vmem:[%s3693_s9 + $0x28] sm:$0x1f]  ;;  %v3511_v12 = vld [vmem:[%s3693_s9 + $0x20] sm:$0x1f] }
 0x2bf   : > { %v2035_v54 = vcombine.low %v1190_v42, %v1191_v2  ;;  %1322 = vrot.lane.b32.xlu1 %v5686_v56, %s3591_s14  ;;  %1320 = vrot.lane.b32.xlu0 %v5691_v3, %s3591_s14  ;;  %v7659_v42 = vld [vmem:[#allocation35_spill] sm:$0xff]  ;;  %s3604_s14 = smov 32  }
 0x2c0   : > { %v761_v56 = vsel %vm756_vm1, %v3511_v12, %v7659_v42 }
 0x2c1   : > { %v5695_v46 = vpop.permute.xlu1 %1394  ;;  %3380 = vmatmul.mubr.msk.f32.vlgmr.msra.gmra.mxu0 %vm7214_vm2, %v2035_v54  ;;  %v5698_v28 = vpop.permute.xlu0 %1392  ;;  %v5717_v54 = vld [vmem:[%s3693_s9 + $0x260] sm:$0x1f]  ;;  %vm7663_vm2 = vcmask 48128  }
 0x2c2   : > { %7650 = vst [vmem:[#allocation200_spill] sm:$0xff] %v5695_v46  ;;  %7651 = vst [vmem:[#allocation8_spill] sm:$0xff] %v5698_v28  ;;  %v7712_v46 = vld [vmem:[#allocation152_spill] sm:$0xff] }
 0x2c3   : > { %1342 = vrot.lane.b32.xlu1 %v5701_v51, %s7653_s15  ;;  %1340 = vrot.lane.b32.xlu0 %v5401_v18, %s7653_s15  ;;  %7655 = vst [vmem:[#allocation172_spill] sm:$0xff] %v5717_v54  ;;  %v7658_v18 = vld [vmem:[#allocation34_spill] sm:$0xff]  ;;  %v7664_v51 = vld [vmem:[#allocation47_spill] sm:$0xff]  ;;  %vm7665_vm0 = vmmov %vm7663_vm2 }
 0x2c4   : > { %v762_v10 = vsel %vm756_vm1, %v3510_v17, %v7658_v18  ;;  %v770_v52 = vsel %vm7665_vm0, %v761_v56, %v7664_v51  ;;  %v7667_v17 = vld [vmem:[#allocation55_spill] sm:$0xff]  ;;  %v7671_v56 = vld [vmem:[#allocation73_spill] sm:$0xff] }
 0x2c5   : > { %v5707_v2 = vpop.permute.xlu1 %1422  ;;  %v5709_v8 = vpop.permute.xlu0 %1420  ;;  %v771_v3 = vsel %vm7663_vm2, %v762_v10, %v7662_v45  ;;  %v779_v18 = vsel %vm774_vm3, %v770_v52, %v7667_v17  ;;  %v7670_v45 = vld [vmem:[#allocation72_spill] sm:$0xff]  ;;  %v7673_v52 = vld [vmem:[#allocation45_spill] sm:$0xff]  ;;  %vm7705_vm2 = vmmov %vm7665_vm0 }
 0x2c7   : > { %1346 = vrot.lane.b32.xlu1 %v5712_v5, %s7653_s15  ;;  %1344 = vrot.lane.b32.xlu0 %v5717_v54, %s7653_s15  ;;  %v7661_v5 = vld [vmem:[#allocation41_spill] sm:$0xff]  ;;  %v7666_v54 = vld [vmem:[#allocation54_spill] sm:$0xff] }
 0x2c8   : > { %v780_v50 = vsel %vm774_vm3, %v771_v3, %v7666_v54  ;;  %v7672_v3 = vld [vmem:[#allocation44_spill] sm:$0xff]  ;;  %v7674_v54 = vld [vmem:[#allocation81_spill] sm:$0xff] }
 0x2c9   : > { %v5721_v27 = vpop.permute.xlu1 %1426  ;;  %v5723_v34 = vpop.permute.xlu0 %1424 }
 0x2ca   : > { %7656 = vst [vmem:[#allocation180_spill] sm:$0xff] %v5721_v27  ;;  %7657 = vst [vmem:[#allocation181_spill] sm:$0xff] %v5723_v34  ;;  %v7694_v34 = vld [vmem:[#allocation36_spill] sm:$0xff]  ;;  %v7697_v27 = vld [vmem:[#allocation37_spill] sm:$0xff] }
 0x2cb   : > { %1366 = vrot.lane.b32.xlu1 %v7660_v9, %s3593_s16  ;;  %1364 = vrot.lane.b32.xlu0 %v7661_v5, %s3593_s16  ;;  %v7668_v9 = vld [vmem:[#allocation63_spill] sm:$0xff]  ;;  %v7669_v5 = vld [vmem:[#allocation64_spill] sm:$0xff] }
 0x2cc   : > { %v789_v42 = vsel %vm783_vm4, %v780_v50, %v7668_v9  ;;  %v788_v47 = vsel %vm783_vm4, %v779_v18, %v7669_v5  ;;  %v7676_v9 = vld [vmem:[#allocation90_spill] sm:$0xff]  ;;  %v7677_v5 = vld [vmem:[#allocation91_spill] sm:$0xff] }
 0x2cd   : > { %v5743_v32 = vpop.permute.xlu1 %1446  ;;  %v5745_v12 = vpop.permute.xlu0 %1444  ;;  %v798_v10 = vsel %vm792_vm5, %v789_v42, %v7670_v45  ;;  %v797_v51 = vsel %vm792_vm5, %v788_v47, %v7671_v56  ;;  %v7680_v56 = vld [vmem:[#allocation98_spill] sm:$0xff] }
 0x2ce   : > { %v807_v17 = vsel %vm801_vm6, %v798_v10, %v7674_v54  ;;  %v806_v50 = vsel %vm801_vm6, %v797_v51, %v7675_v25  ;;  %v7682_v54 = vld [vmem:[#allocation106_spill] sm:$0xff]  ;;  %v7683_v51 = vld [vmem:[#allocation107_spill] sm:$0xff] }
 0x2cf   : > { %1370 = vrot.lane.b32.xlu1 %v7672_v3, %s3593_s16  ;;  %1368 = vrot.lane.b32.xlu0 %v7673_v52, %s3593_s16  ;;  %v816_v18 = vsel %vm810_vm7, %v807_v17, %v7676_v9  ;;  %v815_v42 = vsel %vm810_vm7, %v806_v50, %v7677_v5  ;;  %v7681_v52 = vld [vmem:[#allocation99_spill] sm:$0xff]  ;;  %v7686_v5 = vld [vmem:[#allocation16_spill] sm:$0xff]  ;;  %s3605_s16 = smov 64  }
 0x2d0   : > { %v825_v3 = vsel %vm819_vm8, %v816_v18, %v7680_v56  ;;  %v824_v10 = vsel %vm819_vm8, %v815_v42, %v7681_v52  ;;  %v7684_v9 = vld [vmem:[#allocation15_spill] sm:$0xff]  ;;  %v7690_v52 = vld [vmem:[#allocation122_spill] sm:$0xff] }
 0x2d1   : > { %v5767_v47 = vpop.permute.xlu1 %1450  ;;  %v5769_v45 = vpop.permute.xlu0 %1448  ;;  %v834_v25 = vsel %vm828_vm9, %v825_v3, %v7682_v54  ;;  %v833_v17 = vsel %vm828_vm9, %v824_v10, %v7683_v51  ;;  %v7685_v50 = vrot.slane %v7684_v9, 1  ;;  %v7689_v56 = vld [vmem:[#allocation115_spill] sm:$0xff] }
 0x2d2   : > { %7678 = vst [vmem:[#allocation214_spill] sm:$0xff] %v5767_v47  ;;  %7679 = vst [vmem:[#allocation184_spill] sm:$0xff] %v5769_v45  ;;  %v7687_v45 = vrot.slane %v7686_v5, 1  ;;  %v7688_v47 = vld [vmem:[#allocation114_spill] sm:$0xff]  ;;  %v842_v42 = vsel %vm837_vm10, %v833_v17, %v7689_v56  ;;  %v7691_v54 = vld [vmem:[#allocation123_spill] sm:$0xff] }
 0x2d3   : > { %1398 = vrot.lane.b32.xlu1 %v7685_v50, %s3594_s17  ;;  %v843_v18 = vsel %vm837_vm10, %v834_v25, %v7688_v47  ;;  %v851_v10 = vsel %vm846_vm11, %v842_v42, %v7691_v54  ;;  %v3512_v50 = vld [vmem:[%s3693_s9 + $0x38] sm:$0x1f]  ;;  %v7695_v5 = vld [vmem:[#allocation32_spill] sm:$0xff] }
 0x2d4   : > { %1396 = vrot.lane.b32.xlu0 %v7687_v45, %s3594_s17  ;;  %v852_v3 = vsel %vm846_vm11, %v843_v18, %v7690_v52  ;;  %v764_v45 = vsel %vm756_vm1, %v3512_v50, %v7694_v34  ;;  %v7696_v25 = vld [vmem:[#allocation128_spill] sm:$0xff]  ;;  %v7698_v52 = vld [vmem:[#allocation135_spill] sm:$0xff]  ;;  %v7702_v34 = vld [vmem:[#allocation18_spill] sm:$0xff] }
 0x2d5   : > { %v5793_v51 = vpop.permute.xlu1 %1470  ;;  %v5795_v9 = vpop.permute.xlu0 %1468  ;;  %v861_v47 = vsel %vm7222_vm12, %v852_v3, %v7695_v5  ;;  %v860_v17 = vsel %vm7222_vm12, %v851_v10, %v7696_v25  ;;  %v3513_v56 = vld [vmem:[%s3693_s9 + $0x30] sm:$0x1f]  ;;  %v7703_v3 = vrot.slane %v7702_v34, 1  ;;  %v7706_v5 = vld [vmem:[#allocation49_spill] sm:$0xff]  ;;  %v7707_v25 = vld [vmem:[#allocation143_spill] sm:$0xff] }
 0x2d6   : > { %7692 = vst [vmem:[#allocation185_spill] sm:$0xff] %v5793_v51  ;;  %7693 = vst [vmem:[#allocation193_spill] sm:$0xff] %v5795_v9  ;;  %v763_v18 = vsel %vm756_vm1, %v3513_v56, %v7697_v27  ;;  %v870_v42 = vsel %vm7221_vm13, %v861_v47, %v7698_v52  ;;  %v7699_v54 = vld [vmem:[#allocation136_spill] sm:$0xff]  ;;  %v7700_v9 = vld [vmem:[#allocation17_spill] sm:$0xff] }
 0x2d7   : > { %v869_v28 = vsel %vm7221_vm13, %v860_v17, %v7699_v54  ;;  %v7701_v51 = vrot.slane %v7700_v9, 1  ;;  %v7704_v50 = vld [vmem:[#allocation48_spill] sm:$0xff]  ;;  %v772_v27 = vsel %vm7665_vm0, %v763_v18, %v7706_v5  ;;  %v879_v47 = vsel %vm7220_vm14, %v870_v42, %v7707_v25  ;;  %v7711_v34 = vld [vmem:[#allocation151_spill] sm:$0xff]  ;;  %v7713_v5 = vld [vmem:[#allocation65_spill] sm:$0xff] }
 0x2d8   : > { %1400 = vrot.lane.b32.xlu0 %v7703_v3, %s3594_s17  ;;  %v773_v10 = vsel %vm7705_vm2, %v764_v45, %v7704_v50  ;;  %v7708_v56 = vld [vmem:[#allocation144_spill] sm:$0xff]  ;;  %v888_v3 = vsel %vm882_vm15, %v879_v47, %v7711_v34  ;;  %v7714_v25 = vld [vmem:[#allocation66_spill] sm:$0xff]  ;;  %vm7715_vm2 = vcmask 392192  }
 0x2d9   : > { %1402 = vrot.lane.b32.xlu1 %v7701_v51, %s3594_s17  ;;  %v878_v17 = vsel %vm7220_vm14, %v869_v28, %v7708_v56  ;;  %v7709_v52 = vld [vmem:[#allocation56_spill] sm:$0xff]  ;;  %v7710_v51 = vld [vmem:[#allocation57_spill] sm:$0xff]  ;;  %v1174_v50 = vpop.permute.xlu1 %1173  ;;  %v1172_v18 = vpop.permute.xlu0 %1171  ;;  %vm7716_vm0 = vmmov %vm7715_vm2  ;;  %s3606_s17 = smov 96  }
 0x2da   : > { %v782_v9 = vsel %vm774_vm3, %v773_v10, %v7709_v52  ;;  %v781_v54 = vsel %vm774_vm3, %v772_v27, %v7710_v51  ;;  %v887_v45 = vsel %vm882_vm15, %v878_v17, %v7712_v46  ;;  %v1193_v56 = vsel %vm7715_vm2, %v888_v3, %v1174_v50  ;;  %v7717_v52 = vld [vmem:[#allocation74_spill] sm:$0xff]  ;;  %v7718_v51 = vld [vmem:[#allocation75_spill] sm:$0xff]  ;;  %v7724_v50 = vld [vmem:[#allocation84_spill] sm:$0xff] }
 0x2db   : > { %v791_v42 = vsel %vm783_vm4, %v782_v9, %v7713_v5  ;;  %v790_v28 = vsel %vm783_vm4, %v781_v54, %v7714_v25  ;;  %v1192_v10 = vsel %vm7716_vm0, %v887_v45, %v1172_v18  ;;  %v7719_v46 = vld [vmem:[#allocation22_spill] sm:$0xff]  ;;  %v7721_v9 = vld [vmem:[#allocation23_spill] sm:$0xff]  ;;  %v7725_v18 = vld [vmem:[#allocation92_spill] sm:$0xff]  ;;  %vm7727_vm2 = vcmask 613376  }
 0x2dc   : > { %v800_v27 = vsel %vm792_vm5, %v791_v42, %v7717_v52  ;;  %v799_v47 = vsel %vm792_vm5, %v790_v28, %v7718_v51  ;;  %v2036_v34 = vcombine.low %v1192_v10, %v1193_v56  ;;  %v7720_v17 = vrot.slane %v7719_v46, 1  ;;  %v7723_v54 = vld [vmem:[#allocation83_spill] sm:$0xff]  ;;  %v7726_v25 = vld [vmem:[#allocation93_spill] sm:$0xff]  ;;  %v7729_v52 = vld [vmem:[#allocation100_spill] sm:$0xff] }
 0x2dd   : > { %v7722_v5 = vrot.slane %v7721_v9, 1  ;;  %v809_v3 = vsel %vm801_vm6, %v800_v27, %v7723_v54  ;;  %v808_v45 = vsel %vm801_vm6, %v799_v47, %v7724_v50  ;;  %v5857_v56 = vpop.permute.xlu1 %1474  ;;  %v5860_v10 = vpop.permute.xlu0 %1472  ;;  %v7730_v46 = vld [vmem:[#allocation101_spill] sm:$0xff]  ;;  %v7733_v54 = vld [vmem:[#allocation24_spill] sm:$0xff] }
 0x2de   : > { %1430 = vrot.lane.b32.xlu1 %v7720_v17, %s3595_s23  ;;  %v818_v42 = vsel %vm810_vm7, %v809_v3, %v7725_v18  ;;  %v817_v28 = vsel %vm810_vm7, %v808_v45, %v7726_v25  ;;  %3382 = vmatprep.mubr.msk.f32.mxu0 %vm7727_vm2, %v2036_v34  ;;  %7728 = vst [vmem:[#allocation194_spill] sm:$0xff] %v5860_v10  ;;  %v7731_v17 = vld [vmem:[#allocation108_spill] sm:$0xff]  ;;  %v7732_v9 = vld [vmem:[#allocation109_spill] sm:$0xff]  ;;  %v7734_v3 = vrot.slane %v7733_v54, 1  ;;  %vm7751_vm2 = vmmov %vm7716_vm0 }
 0x2df   : > { %1428 = vrot.lane.b32.xlu0 %v7722_v5, %s3595_s23  ;;  %v827_v51 = vsel %vm819_vm8, %v818_v42, %v7729_v52  ;;  %v826_v27 = vsel %vm819_vm8, %v817_v28, %v7730_v46  ;;  %v7735_v34 = vld [vmem:[#allocation25_spill] sm:$0xff]  ;;  %v7737_v45 = vld [vmem:[#allocation116_spill] sm:$0xff]  ;;  %v3515_v10 = vld [vmem:[%s3693_s9 + $0xe0] sm:$0x1f] }
 0x2e0   : > { %v836_v47 = vsel %vm828_vm9, %v827_v51, %v7731_v17  ;;  %v835_v5 = vsel %vm828_vm9, %v826_v27, %v7732_v9  ;;  %v7736_v50 = vrot.slane %v7735_v34, 1  ;;  %v7738_v42 = vld [vmem:[#allocation117_spill] sm:$0xff] }
 0x2e1   : > { %v845_v18 = vsel %vm837_vm10, %v836_v47, %v7737_v45  ;;  %v844_v25 = vsel %vm837_vm10, %v835_v5, %v7738_v42  ;;  %v7739_v28 = vld [vmem:[#allocation33_spill] sm:$0xff]  ;;  %v5884_v27 = vpop.permute.xlu1 %1494  ;;  %v5886_v17 = vpop.permute.xlu0 %1492  ;;  %v5899_v42 = vld [vmem:[%s3693_s9 + $0xc8] sm:$0x1f] }
 0x2e2   : > { %1434 = vrot.lane.b32.xlu1 %v7734_v3, %s3595_s23  ;;  %v854_v52 = vsel %vm846_vm11, %v845_v18, %v7739_v28  ;;  %v7740_v51 = vld [vmem:[#allocation29_spill] sm:$0xff]  ;;  %v7742_v3 = vld [vmem:[#allocation130_spill] sm:$0xff]  ;;  %v7745_v18 = vld [vmem:[#allocation191_spill] sm:$0xff]  ;;  %7746 = vst [vmem:[#allocation182_spill] sm:$0xff] %v5899_v42 }
 0x2e3   : > { %1432 = vrot.lane.b32.xlu0 %v7736_v50, %s3595_s23  ;;  %v853_v46 = vsel %vm846_vm11, %v844_v25, %v7740_v51  ;;  %v7741_v9 = vld [vmem:[#allocation129_spill] sm:$0xff]  ;;  %v7744_v50 = vld [vmem:[#allocation138_spill] sm:$0xff] }
 0x2e4   : > { %v863_v54 = vsel %vm7222_vm12, %v854_v52, %v7741_v9  ;;  %v862_v47 = vsel %vm7222_vm12, %v853_v46, %v7742_v3  ;;  %v7743_v34 = vld [vmem:[#allocation137_spill] sm:$0xff]  ;;  %v7748_v52 = vld [vmem:[#allocation146_spill] sm:$0xff] }
 0x2e5   : > { %v872_v5 = vsel %vm7221_vm13, %v863_v54, %v7743_v34  ;;  %v871_v45 = vsel %vm7221_vm13, %v862_v47, %v7744_v50  ;;  %v7747_v25 = vld [vmem:[#allocation145_spill] sm:$0xff]  ;;  %v7750_v54 = vld [vmem:[#allocation154_spill] sm:$0xff]  ;;  %v1178_v47 = vpop.permute.xlu1 %1177  ;;  %v1176_v34 = vpop.permute.xlu0 %1175 }
 0x2e6   : > { %1454 = vrot.lane.b32.xlu1 %v7745_v18, %s3596_s25  ;;  %v881_v28 = vsel %vm7220_vm14, %v872_v5, %v7747_v25  ;;  %v880_v51 = vsel %vm7220_vm14, %v871_v45, %v7748_v52  ;;  %v7749_v46 = vld [vmem:[#allocation153_spill] sm:$0xff]  ;;  %vm7752_vm14 = vcmask 613376   ;;  %v3517_v52 = vld [vmem:[%s3693_s9 + $0x130] sm:$0x1f] }
 0x2e7   : > { %1452 = vrot.lane.b32.xlu0 %v5899_v42, %s3596_s25  ;;  %v890_v9 = vsel %vm882_vm15, %v881_v28, %v7749_v46  ;;  %v889_v3 = vsel %vm882_vm15, %v880_v51, %v7750_v54  ;;  %v5916_v5 = vld [vmem:[%s3693_s9 + $0xd8] sm:$0x1f]  ;;  %v3518_v46 = vld [vmem:[%s3693_s9 + $0xa8] sm:$0x1f]  ;;  %v3519_v54 = vld [vmem:[%s3693_s9 + $0xa0] sm:$0x1f] }
 0x2e8   : > { %v1195_v50 = vsel %vm7716_vm0, %v890_v9, %v1178_v47  ;;  %v1194_v18 = vsel %vm7751_vm2, %v889_v3, %v1176_v34  ;;  %vm2200_vm0 = vcmask 259072   ;;  %v1591_v9 = vsel %vm756_vm1, %v3518_v46, %v5349_v62  ;;  %v7753_v47 = vld [vmem:[#allocation89_spill] sm:$0xff] }
 0x2e9   : > { %v2037_v42 = vcombine.low %v1194_v18, %v1195_v50  ;;  %v5920_v45 = vpop.permute.xlu1 %1498  ;;  %v5923_v25 = vpop.permute.xlu0 %1496  ;;  %v1590_v3 = vsel %vm756_vm1, %v3519_v54, %v5351_v7  ;;  %vm7754_vm2 = vcmask 48128   ;;  %v1593_v62 = vsel %vm756_vm1, %v5227_v49, %v5357_v30  ;;  %v7762_v46 = vld [vmem:[#allocation193_spill] sm:$0xff]  ;;  %v7763_v54 = vld [vmem:[#allocation8_spill] sm:$0xff] }
 0x2ea   : > { %1458 = vrot.lane.b32.xlu1 %v3515_v10, %s3596_s25 }
 0x2eb   : > { %1456 = vrot.lane.b32.xlu0 %v5916_v5, %s3596_s25  ;;  %3383 = vmatmul.mubr.msk.f32.gmra.mxu0 %vm7752_vm14, %v2037_v42  ;;  %v3603_v42 = vmov 0.0   ;;  %vm2210_vm14 = vcmask 253952  }
 0x2ec   : > { %2202 = vst.msk [vmem:[#allocation2 + $0x8] sm:$0x3f] %vm2200_vm0, %v3603_v42  ;;  %2201 = vst.msk [vmem:[#allocation2] sm:$0x3f] %vm2200_vm0, %v3603_v42 }
 0x2ed   : > { %v5929_v28 = vpop.permute.xlu1 %1519  ;;  %v5931_v10 = vpop.permute.xlu0 %1517  ;;  %2203 = vst.msk [vmem:[#allocation2 + $0x60] sm:$0x3f] %vm2200_vm0, %v3603_v42  ;;  %2204 = vst.msk [vmem:[#allocation2 + $0x68] sm:$0x3f] %vm2200_vm0, %v3603_v42 }
 0x2ee   : > { %1478 = vrot.lane.b32.xlu1 %v5497_v14, %s3597_s26  ;;  %2206 = vst.msk [vmem:[#allocation2 + $0x50] sm:$0x3f] %vm2200_vm0, %v3603_v42  ;;  %2208 = vst.msk [vmem:[#allocation2 + $0xb0] sm:$0x3f] %vm2200_vm0, %v3603_v42 }
 0x2ef   : > { %1476 = vrot.lane.b32.xlu0 %v5481_v40, %s3597_s26  ;;  %2212 = vst.msk [vmem:[#allocation2 + $0x8] sm:$0x1] %vm2210_vm14, %v3603_v42  ;;  %2236 = vst.msk [vmem:[#allocation2 + $0xd] sm:$0x1] %vm2210_vm14, %v3603_v42 }
 0x2f0   : > { %2213 = vst.msk [vmem:[#allocation2 + $0x10] sm:$0x1] %vm2210_vm14, %v3603_v42  ;;  %2214 = vst.msk [vmem:[#allocation2 + $0x18] sm:$0x1] %vm2210_vm14, %v3603_v42 }
 0x2f1   : > { %2215 = vst.msk [vmem:[#allocation2 + $0x20] sm:$0x1] %vm2210_vm14, %v3603_v42  ;;  %2216 = vst.msk [vmem:[#allocation2 + $0x28] sm:$0x1] %vm2210_vm14, %v3603_v42  ;;  %v5981_v40 = vpop.permute.xlu1 %1523 }
 0x2f2   : > { %1482 = vrot.lane.b32.xlu1 %v3517_v52, %s3597_s26  ;;  %2217 = vst.msk [vmem:[#allocation2 + $0x30] sm:$0x1] %vm2210_vm14, %v3603_v42  ;;  %2218 = vst.msk [vmem:[#allocation2 + $0x38] sm:$0x1] %vm2210_vm14, %v3603_v42 }
 0x2f3   : > { %1480 = vrot.lane.b32.xlu0 %v5492_v13, %s3597_s26  ;;  %2219 = vst.msk [vmem:[#allocation2 + $0x40] sm:$0x1] %vm2210_vm14, %v3603_v42  ;;  %2220 = vst.msk [vmem:[#allocation2 + $0x48] sm:$0x1] %vm2210_vm14, %v3603_v42  ;;  %v5983_v13 = vpop.permute.xlu0 %1521 }
 0x2f4   : > { %2225 = vst.msk [vmem:[#allocation2 + $0x70] sm:$0x1] %vm2210_vm14, %v3603_v42  ;;  %2226 = vst.msk [vmem:[#allocation2 + $0x78] sm:$0x1] %vm2210_vm14, %v3603_v42 }
 0x2f5   : > { %2227 = vst.msk [vmem:[#allocation2 + $0x80] sm:$0x1] %vm2210_vm14, %v3603_v42  ;;  %2228 = vst.msk [vmem:[#allocation2 + $0x88] sm:$0x1] %vm2210_vm14, %v3603_v42  ;;  %v5989_v14 = vpop.permute.xlu1 %1544 }
 0x2f6   : > { %2229 = vst.msk [vmem:[#allocation2 + $0x90] sm:$0x1] %vm2210_vm14, %v3603_v42  ;;  %2230 = vst.msk [vmem:[#allocation2 + $0x98] sm:$0x1] %vm2210_vm14, %v3603_v42  ;;  %1502 = vrot.lane.b32.xlu1 %v7588_v61, %s3598_s30 }
 0x2f7   : > { %2231 = vst.msk [vmem:[#allocation2 + $0xa0] sm:$0x1] %vm2210_vm14, %v3603_v42  ;;  %2232 = vst.msk [vmem:[#allocation2 + $0xa8] sm:$0x1] %vm2210_vm14, %v3603_v42  ;;  %1500 = vrot.lane.b32.xlu0 %v7578_v11, %s3598_s30  ;;  %v5991_v51 = vpop.permute.xlu0 %1542  ;;  %v1599_v11 = vsel %vm7754_vm2, %v1591_v9, %v5366_v43  ;;  %v1592_v43 = vsel %vm756_vm1, %v5208_v4, %v5359_v1 }
 0x2f8   : > { %2237 = vst.msk [vmem:[#allocation2 + $0x15] sm:$0x1] %vm2210_vm14, %v3603_v42  ;;  %2238 = vst.msk [vmem:[#allocation2 + $0x1d] sm:$0x1] %vm2210_vm14, %v3603_v42  ;;  %v1607_v34 = vsel %vm774_vm3, %v1599_v11, %v5396_v41  ;;  %v7765_v11 = vld [vmem:[#allocation181_spill] sm:$0xff] }
 0x2f9   : > { %2239 = vst.msk [vmem:[#allocation2 + $0x25] sm:$0x1] %vm2210_vm14, %v3603_v42  ;;  %2240 = vst.msk [vmem:[#allocation2 + $0x2d] sm:$0x1] %vm2210_vm14, %v3603_v42  ;;  %v6014_v50 = vpop.permute.xlu1 %1548  ;;  %v1615_v49 = vsel %vm783_vm4, %v1607_v34, %v5466_v24 }
 0x2fa   : > { %2241 = vst.msk [vmem:[#allocation2 + $0x35] sm:$0x1] %vm2210_vm14, %v3603_v42  ;;  %2242 = vst.msk [vmem:[#allocation2 + $0x3d] sm:$0x1] %vm2210_vm14, %v3603_v42  ;;  %1506 = vrot.lane.b32.xlu1 %v7753_v47, %s3598_s30 }
 0x2fb   : > { %2243 = vst.msk [vmem:[#allocation2 + $0x45] sm:$0x1] %vm2210_vm14, %v3603_v42  ;;  %2244 = vst.msk [vmem:[#allocation2 + $0x4d] sm:$0x1] %vm2210_vm14, %v3603_v42  ;;  %1504 = vrot.lane.b32.xlu0 %v7587_v60, %s3598_s30  ;;  %v6016_v18 = vpop.permute.xlu0 %1546 }
 0x2fc   : > { %2249 = vst.msk [vmem:[#allocation2 + $0x75] sm:$0x1] %vm2210_vm14, %v3603_v42  ;;  %2250 = vst.msk [vmem:[#allocation2 + $0x7d] sm:$0x1] %vm2210_vm14, %v3603_v42 }
 0x2fd   : > { %2251 = vst.msk [vmem:[#allocation2 + $0x85] sm:$0x1] %vm2210_vm14, %v3603_v42  ;;  %2252 = vst.msk [vmem:[#allocation2 + $0x8d] sm:$0x1] %vm2210_vm14, %v3603_v42 }
 0x2fe   : > { %2253 = vst.msk [vmem:[#allocation2 + $0x95] sm:$0x1] %vm2210_vm14, %v3603_v42  ;;  %2254 = vst.msk [vmem:[#allocation2 + $0x9d] sm:$0x1] %vm2210_vm14, %v3603_v42  ;;  %1527 = vrot.lane.b32.xlu1 %v7611_v36, %s3599_s6 }
 0x2ff   : > { %2255 = vst.msk [vmem:[#allocation2 + $0xa5] sm:$0x1] %vm2210_vm14, %v3603_v42  ;;  %2256 = vst.msk [vmem:[#allocation2 + $0xad] sm:$0x1] %vm2210_vm14, %v3603_v42  ;;  %1525 = vrot.lane.b32.xlu0 %v7598_v22, %s3599_s6 }
 0x300   : > { %2211 = vst.msk [vmem:[#allocation2] sm:$0x1] %vm2210_vm14, %v3603_v42  ;;  %2221 = vst.msk [vmem:[#allocation2 + $0x50] sm:$0x1] %vm2210_vm14, %v3603_v42 }
 0x301   : > { %2223 = vst.msk [vmem:[#allocation2 + $0x60] sm:$0x1] %vm2210_vm14, %v3603_v42  ;;  %2224 = vst.msk [vmem:[#allocation2 + $0x68] sm:$0x1] %vm2210_vm14, %v3603_v42 }
 0x302   : > { %2233 = vst.msk [vmem:[#allocation2 + $0xb0] sm:$0x1] %vm2210_vm14, %v3603_v42  ;;  %2235 = vst.msk [vmem:[#allocation2 + $0x5] sm:$0x1] %vm2210_vm14, %v3603_v42 }
 0x303   : > { %2245 = vst.msk [vmem:[#allocation2 + $0x55] sm:$0x1] %vm2210_vm14, %v3603_v42  ;;  %2247 = vst.msk [vmem:[#allocation2 + $0x65] sm:$0x1] %vm2210_vm14, %v3603_v42  ;;  %1529 = vrot.lane.b32.xlu0 %v7610_v37, %s3599_s6 }
 0x304   : > { %2248 = vst.msk [vmem:[#allocation2 + $0x6d] sm:$0x1] %vm2210_vm14, %v3603_v42  ;;  %2257 = vst.msk [vmem:[#allocation2 + $0xb5] sm:$0x1] %vm2210_vm14, %v3603_v42  ;;  %v7761_v42 = vld [vmem:[#allocation185_spill] sm:$0xff] }
 0x305   : > { %vm7755_vm0 = vmmov %vm7754_vm2 }
 0x306   : > { %v1598_v61 = vsel %vm7755_vm0, %v1590_v3, %v5368_v48  ;;  %vm7756_vm14 = vmmov %vm7755_vm0  ;;  %v7764_v3 = vld [vmem:[#allocation180_spill] sm:$0xff] }
 0x307   : > { %v1606_v7 = vsel %vm774_vm3, %v1598_v61, %v5398_v21  ;;  %v1601_v48 = vsel %vm7756_vm14, %v1593_v62, %v5374_v20  ;;  %vm7757_vm2 = vmmov %vm7755_vm0  ;;  %v1623_v21 = vsel %vm792_vm5, %v1615_v49, %v5487_v63  ;;  %v7769_v49 = vld [vmem:[#allocation184_spill] sm:$0xff]  ;;  %vm7770_vm0 = vcmask 343040  }
 0x308   : > { %v1614_v30 = vsel %vm783_vm4, %v1606_v7, %v5468_v19  ;;  %v1600_v41 = vsel %vm7757_vm2, %v1592_v43, %v5376_v16  ;;  %v1609_v4 = vsel %vm774_vm3, %v1601_v48, %v5440_v38  ;;  %v1631_v20 = vsel %vm801_vm6, %v1623_v21, %v5523_v58  ;;  %v7766_v7 = vld [vmem:[#allocation192_spill] sm:$0xff]  ;;  %v7767_v43 = vld [vmem:[#allocation171_spill] sm:$0xff]  ;;  %v7768_v48 = vld [vmem:[#allocation214_spill] sm:$0xff] }
 0x309   : > { %v1622_v60 = vsel %vm792_vm5, %v1614_v30, %v5489_v29  ;;  %v1608_v1 = vsel %vm774_vm3, %v1600_v41, %v5442_v31  ;;  %v1617_v24 = vsel %vm783_vm4, %v1609_v4, %v5476_v35  ;;  %v1639_v63 = vsel %vm810_vm7, %v1631_v20, %v5574_v44  ;;  %v1569_v29 = vpop.permute.xlu1 %1568  ;;  %v1567_v31 = vpop.permute.xlu0 %1566  ;;  %1550 = vrot.lane.b32.xlu0 %v7767_v43, %s3600_s7  ;;  %vm7771_vm14 = vmmov %vm7770_vm0  ;;  %v7772_v41 = vld [vmem:[#allocation194_spill] sm:$0xff]  ;;  %v7801_v43 = vld [vmem:[#allocation223_spill] sm:$0xff] }
 0x30a   : > { %v1630_v16 = vsel %vm801_vm6, %v1622_v60, %v5525_v26  ;;  %v1616_v19 = vsel %vm783_vm4, %v1608_v1, %v5478_v39  ;;  %v1625_v58 = vsel %vm792_vm5, %v1617_v24, %v5501_v59  ;;  %v1647_v35 = vsel %vm819_vm8, %v1639_v63, %v5656_v53  ;;  %v7758_v59 = vld [vmem:[#allocation62_spill] sm:$0xff] }
 0x30b   : > { %v1638_v38 = vsel %vm810_vm7, %v1630_v16, %v5576_v57  ;;  %v1624_v26 = vsel %vm792_vm5, %v1616_v19, %v5503_v15  ;;  %v1633_v44 = vsel %vm801_vm6, %v1625_v58, %v5547_v23  ;;  %v1655_v22 = vsel %vm828_vm9, %v1647_v35, %v5707_v2 }
 0x30c   : > { %v1646_v39 = vsel %vm819_vm8, %v1638_v38, %v5658_v33  ;;  %v7759_v36 = vrot.slane %v7758_v59, 1  ;;  %v1632_v15 = vsel %vm801_vm6, %v1624_v26, %v5549_v6  ;;  %v1641_v53 = vsel %vm810_vm7, %v1633_v44, %v5631_v55  ;;  %v7775_v38 = vld [vmem:[#allocation71_spill] sm:$0xff]  ;;  %v7785_v59 = vld [vmem:[#allocation201_spill] sm:$0xff] }
 0x30d   : > { %v1654_v57 = vsel %vm828_vm9, %v1646_v39, %v5709_v8  ;;  %v1663_v23 = vsel %vm837_vm10, %v1655_v22, %v5743_v32  ;;  %v1640_v2 = vsel %vm810_vm7, %v1632_v15, %v5634_v0  ;;  %v7760_v8 = vld [vmem:[#allocation200_spill] sm:$0xff]  ;;  %v1573_v9 = vpop.permute.xlu1 %1572  ;;  %v1571_v55 = vpop.permute.xlu0 %1570  ;;  %vm7773_vm2 = vcmask 392192   ;;  %v7782_v44 = vld [vmem:[#allocation11_spill] sm:$0xff]  ;;  %v7786_v15 = vld [vmem:[#allocation6_spill] sm:$0xff] }
 0x30e   : > { %1531 = vrot.lane.b32.xlu1 %v7759_v36, %s3599_s6  ;;  %v1662_v33 = vsel %vm837_vm10, %v1654_v57, %v5745_v12  ;;  %v1649_v52 = vsel %vm819_vm8, %v1641_v53, %v7760_v8  ;;  %v1671_v37 = vsel %vm846_vm11, %v1663_v23, %v7761_v42  ;;  %v1648_v32 = vsel %vm819_vm8, %v1640_v2, %v7763_v54  ;;  %v7783_v22 = vld [vmem:[#allocation172_spill] sm:$0xff]  ;;  %v7784_v57 = vld [vmem:[#allocation219_spill] sm:$0xff]  ;;  %v7787_v53 = vld [vmem:[#allocation174_spill] sm:$0xff] }
 0x30f   : > { %v1670_v6 = vsel %vm846_vm11, %v1662_v33, %v7762_v46  ;;  %v1657_v12 = vsel %vm828_vm9, %v1649_v52, %v7764_v3  ;;  %v1679_v0 = vsel %vm7222_vm12, %v1671_v37, %v5884_v27  ;;  %v1656_v61 = vsel %vm828_vm9, %v1648_v32, %v7765_v11  ;;  %v7788_v23 = vld [vmem:[#allocation80_spill] sm:$0xff]  ;;  %v7790_v2 = vld [vmem:[#allocation222_spill] sm:$0xff]  ;;  %v7792_v52 = vld [vmem:[#allocation163_spill] sm:$0xff] }
 0x310   : > { %v1678_v47 = vsel %vm7222_vm12, %v1670_v6, %v5886_v17  ;;  %v1687_v62 = vsel %vm7221_vm13, %v1679_v0, %v5929_v28  ;;  %v1665_v27 = vsel %vm837_vm10, %v1657_v12, %v7768_v48  ;;  %v1664_v17 = vsel %vm837_vm10, %v1656_v61, %v7769_v49  ;;  %v7793_v37 = vld [vmem:[#allocation12_spill] sm:$0xff]  ;;  %v7796_v3 = vld [vmem:[#allocation178_spill] sm:$0xff]  ;;  %v7797_v0 = vld [vmem:[#allocation13_spill] sm:$0xff] }
 0x311   : > { %v1686_v34 = vsel %vm7221_vm13, %v1678_v47, %v5931_v10  ;;  %v1695_v30 = vsel %vm7770_vm0, %v1687_v62, %v5989_v14  ;;  %v1673_v10 = vsel %vm846_vm11, %v1665_v27, %v5857_v56  ;;  %v1672_v21 = vsel %vm846_vm11, %v1664_v17, %v7772_v41  ;;  %v1982_v1 = vpop.permute.xlu1 %1981  ;;  %v1980_v20 = vpop.permute.xlu0 %1979  ;;  %vm7774_vm0 = vmmov %vm7773_vm2  ;;  %v7795_v54 = vld [vmem:[#allocation220_spill] sm:$0xff]  ;;  %v7798_v11 = vld [vmem:[#allocation221_spill] sm:$0xff] }
 0x312   : > { %1552 = vrot.lane.b32.xlu1 %v7766_v7, %s3600_s7  ;;  %v1694_v28 = vsel %vm7771_vm14, %v1686_v34, %v5991_v51  ;;  %v1703_v60 = vsel %vm882_vm15, %v1695_v30, %v1569_v29  ;;  %v1681_v16 = vsel %vm7222_vm12, %v1673_v10, %v5920_v45  ;;  %v1680_v14 = vsel %vm7222_vm12, %v1672_v21, %v5923_v25  ;;  %v7777_v45 = vld [vmem:[#allocation190_spill] sm:$0xff]  ;;  %v7799_v61 = vld [vmem:[#allocation169_spill] sm:$0xff]  ;;  %v7802_v49 = vld [vmem:[#allocation195_spill] sm:$0xff] }
 0x313   : > { %v1702_v4 = vsel %vm882_vm15, %v1694_v28, %v1567_v31  ;;  %v2004_v51 = vsel %vm7773_vm2, %v1703_v60, %v1982_v1  ;;  %v1689_v56 = vsel %vm7221_vm13, %v1681_v16, %v5981_v40  ;;  %v1688_v19 = vsel %vm7221_vm13, %v1680_v14, %v5983_v13  ;;  %1554 = vrot.lane.b32.xlu0 %v7777_v45, %s3600_s7  ;;  %vm7778_vm2 = vmmov %vm7771_vm14  ;;  %v7800_v34 = vld [vmem:[#allocation21_spill] sm:$0xff]  ;;  %v3521_v27 = vld [vmem:[%s3693_s9 + $0x220] sm:$0x1f] }
 0x314   : > { %v2003_v24 = vsel %vm7774_vm0, %v1702_v4, %v1980_v20  ;;  %v7776_v29 = vrot.slane %v7775_v38, 1  ;;  %v1697_v25 = vsel %vm7771_vm14, %v1689_v56, %v6014_v50  ;;  %v1696_v31 = vsel %vm7778_vm2, %v1688_v19, %v6016_v18  ;;  %v7803_v17 = vld [vmem:[#allocation158_spill] sm:$0xff]  ;;  %v7805_v28 = vld [vmem:[#allocation159_spill] sm:$0xff]  ;;  %v7807_v41 = vld [vmem:[#allocation161_spill] sm:$0xff] }
 0x315   : > { %v2038_v63 = vcombine.low %v2003_v24, %v2004_v51  ;;  %v1705_v58 = vsel %vm882_vm15, %v1697_v25, %v1573_v9  ;;  %v1704_v40 = vsel %vm882_vm15, %v1696_v31, %v1571_v55  ;;  %v1986_v26 = vpop.permute.xlu1 %1985  ;;  %vm7779_vm0 = vcmask 613376   ;;  %v1984_v13 = vpop.permute.xlu0 %1983  ;;  %v3520_v55 = vld [vmem:[%s3693_s9 + $0x270] sm:$0x1f]  ;;  %v7808_v60 = vld [vmem:[#allocation162_spill] sm:$0xff]  ;;  %v7810_v16 = vld [vmem:[#allocation177_spill] sm:$0xff] }
 0x316   : > { %1556 = vrot.lane.b32.xlu1 %v7776_v29, %s3600_s7  ;;  %vm7780_vm13 = vcmask 392192   ;;  %v1912_v50 = vsel %vm756_vm1, %v7783_v22, %v7782_v44  ;;  %v1911_v18 = vsel %vm756_vm1, %v7785_v59, %v7784_v57  ;;  %vm7794_vm14 = vmmov %vm7779_vm0  ;;  %v1914_v32 = vsel %vm756_vm1, %v3520_v55, %v7795_v54  ;;  %v7809_v1 = vld [vmem:[#allocation170_spill] sm:$0xff]  ;;  %v7811_v51 = vld [vmem:[#allocation175_spill] sm:$0xff]  ;;  %s215_s7 = sand.u32 1, %s3577_s19  }
 0x317   : > { %3385 = vmatprep.mubr.msk.f32.mxu0 %vm7779_vm0, %v2038_v63  ;;  %v2006_v35 = vsel %vm7780_vm13, %v1705_v58, %v1986_v26  ;;  %vm7781_vm12 = vmmov %vm7780_vm13  ;;  %1574 = vrot.lane.b32.xlu0 %v7787_v53, %s3601_s8  ;;  %vm7789_vm13 = vcmask 48128   ;;  %v1913_v62 = vsel %vm756_vm1, %v7799_v61, %v7798_v11  ;;  %v7812_v56 = vld [vmem:[#allocation176_spill] sm:$0xff]  ;;  %v7813_v29 = vld [vmem:[#allocation14_spill] sm:$0xff] }
 0x318   : > { %v2005_v39 = vsel %vm7781_vm12, %v1704_v40, %v1984_v13  ;;  %v1920_v33 = vsel %vm7789_vm13, %v1912_v50, %v7788_v23  ;;  %vm7791_vm12 = vmmov %vm7789_vm13  ;;  %v7814_v25 = vld [vmem:[#allocation20_spill] sm:$0xff]  ;;  %v7815_v58 = vld [vmem:[#allocation179_spill] sm:$0xff] }
 0x319   : > { %v2039_v36 = vcombine.low %v2005_v39, %v2006_v35  ;;  %v1919_v8 = vsel %vm7791_vm12, %v1911_v18, %v7790_v2  ;;  %v1928_v42 = vsel %vm774_vm3, %v1920_v33, %v7792_v52  ;;  %v6162_v6 = vpop.permute.xlu1 %1206  ;;  %v6165_v9 = vpop.permute.xlu0 %1204  ;;  %vm7804_vm2 = vmmov %vm7791_vm12  ;;  %v7816_v26 = vld [vmem:[#allocation164_spill] sm:$0xff]  ;;  %v7817_v35 = vld [vmem:[#allocation155_spill] sm:$0xff] }
 0x31a   : > { %1576 = vrot.lane.b32.xlu1 %v7786_v15, %s3601_s8  ;;  %v1927_v46 = vsel %vm774_vm3, %v1919_v8, %v7793_v37  ;;  %v1936_v12 = vsel %vm783_vm4, %v1928_v42, %v7796_v3  ;;  %v1922_v30 = vsel %vm7804_vm2, %v1914_v32, %v7803_v17  ;;  %vm7806_vm0 = vmmov %vm7804_vm2  ;;  %v7818_v44 = vld [vmem:[#allocation156_spill] sm:$0xff]  ;;  %v7819_v50 = vld [vmem:[#allocation166_spill] sm:$0xff] }
 0x31b   : > { %3386 = vmatmul.mubr.msk.f32.gmra.mxu0 %vm7794_vm14, %v2039_v36  ;;  %v1935_v47 = vsel %vm783_vm4, %v1927_v46, %v7797_v0  ;;  %v1944_v7 = vsel %vm792_vm5, %v1936_v12, %v7800_v34  ;;  %1578 = vrot.lane.b32.xlu0 %v7802_v49, %s3601_s8  ;;  %v1921_v10 = vsel %vm7806_vm0, %v1913_v62, %v7805_v28  ;;  %v7820_v59 = vld [vmem:[#allocation167_spill] sm:$0xff]  ;;  %v7821_v36 = vld [vmem:[#allocation157_spill] sm:$0xff]  ;;  %v7822_v53 = vld [vmem:[#allocation160_spill] sm:$0xff] }
 0x31c   : > { %v1943_v48 = vsel %vm792_vm5, %v1935_v47, %v7801_v43  ;;  %v1952_v21 = vsel %vm801_vm6, %v1944_v7, %v7807_v41  ;;  %v1930_v20 = vsel %vm774_vm3, %v1922_v30, %v7809_v1  ;;  %v1929_v14 = vsel %vm774_vm3, %v1921_v10, %v7810_v16  ;;  %v7823_v8 = vld [vmem:[#allocation165_spill] sm:$0xff]  ;;  %v6237_v46 = vld [vmem:[#allocation2 + $0x8] sm:$0x3f]  ;;  %v2288_v32 = vld [vmem:[#allocation2 + $0x60] sm:$0x3f] }
 0x31d   : > { %v1951_v4 = vsel %vm801_vm6, %v1943_v48, %v7808_v60  ;;  %v1960_v24 = vsel %vm810_vm7, %v1952_v21, %v7811_v51  ;;  %v6201_v63 = vpop.permute.xlu1 %1210  ;;  %v6203_v38 = vpop.permute.xlu0 %1208  ;;  %v1938_v45 = vsel %vm783_vm4, %v1930_v20, %v7813_v29  ;;  %v1937_v31 = vsel %vm783_vm4, %v1929_v14, %v7814_v25  ;;  %v7824_v42 = vld [vmem:[#allocation173_spill] sm:$0xff]  ;;  %7825 = vst [vmem:[#allocation198_spill] sm:$0xff] %v6237_v46  ;;  %v2289_v0 = vld [vmem:[#allocation2 + $0x68] sm:$0x3f]  ;;  %v6250_v47 = vld [vmem:[#allocation2] sm:$0x3f] }
 0x31e   : > { %1580 = vrot.lane.b32.xlu1 %v3521_v27, %s3601_s8  ;;  %v1959_v19 = vsel %vm810_vm7, %v1951_v4, %v7812_v56  ;;  %v1968_v40 = vsel %vm819_vm8, %v1960_v24, %v7815_v58  ;;  %v1946_v39 = vsel %vm792_vm5, %v1938_v45, %v7817_v35  ;;  %v1945_v22 = vsel %vm792_vm5, %v1937_v31, %v7818_v44  ;;  %vm7828_vm13 = vmmov %vm7806_vm0  ;;  %s3188_s8 = sshll.u32 %s215_s7, 4 }
 0x31f   : > { %v1967_v13 = vsel %vm819_vm8, %v1959_v19, %v7816_v26  ;;  %v1954_v57 = vsel %vm801_vm6, %v1946_v39, %v7819_v50  ;;  %v1953_v18 = vsel %vm801_vm6, %v1945_v22, %v7820_v59  ;;  %7826 = vst [vmem:[#allocation199_spill] sm:$0xff] %v6250_v47  ;;  %v2319_v62 = vrot.slane %v6250_v47, 1  ;;  %vm7829_vm12 = vmmov %vm7806_vm0 }
 0x320   : > { %1987 = vrot.lane.b32.xlu0 %v1967_v13, %s3602_s11  ;;  %v1962_v15 = vsel %vm810_vm7, %v1954_v57, %v7821_v36  ;;  %v1961_v23 = vsel %vm810_vm7, %v1953_v18, %v7822_v53  ;;  %v2391_v43 = vrot.slane %v6237_v46, 1  ;;  %v2335_v49 = vrot.slane %v2288_v32, 1  ;;  %vm7830_vm14 = vmmov %vm7806_vm0 }
 0x321   : > { %v6227_v33 = vpop.permute.xlu1 %1230  ;;  %v6229_v2 = vpop.permute.xlu0 %1228  ;;  %v1970_v52 = vsel %vm819_vm8, %v1962_v15, %v7823_v8  ;;  %v1969_v37 = vsel %vm819_vm8, %v1961_v23, %v7824_v42  ;;  %v7827_v42 = vld [vmem:[#allocation182_spill] sm:$0xff]  ;;  %vm7831_vm2 = vmmov %vm7806_vm0 }
 0x322   : > { %1989 = vrot.lane.b32.xlu1 %v1968_v40, %s3602_s11 }
 0x324   : > { %1991 = vrot.lane.b32.xlu0 %v1969_v37, %s3602_s11  ;;  %v1595_v37 = vsel %vm756_vm1, %v7827_v42, %v6162_v6 }
 0x325   : > { %v6239_v55 = vpop.permute.xlu1 %1234  ;;  %v6241_v54 = vpop.permute.xlu0 %1232 }
 0x326   : > { %1993 = vrot.lane.b32.xlu1 %v1970_v52, %s3602_s11  ;;  %s217_s11 = scalar_lea.vmem [#allocation3], %s3188_s8 }
 0x327   : > { %s3122_s12 = sshll.u32 %s217_s11, 4  ;;  %s7052_s12 = int_to_ptr.vmem [resolvable:$true] %s3122_s12 }
 0x328   : > { %2363 = vrot.lane.b32.xlu0 %v6237_v46, %s3604_s14 }
 0x329   : > { %v6245_v3 = vpop.permute.xlu1 %1262  ;;  %v6247_v12 = vpop.permute.xlu0 %1260 }
 0x32c   : > { %2303 = vrot.lane.b32.xlu0 %v2288_v32, %s3604_s14  ;;  %v3522_v32 = vld [vmem:[%s3693_s9 + $0xc0] sm:$0x1f] }
 0x32d   : > { %v6252_v11 = vpop.permute.xlu1 %1266  ;;  %v6254_v61 = vpop.permute.xlu0 %1264 }
 0x330   : > { %2379 = vrot.lane.b32.xlu0 %v2289_v0, %s3605_s16  ;;  %v1594_v0 = vsel %vm756_vm1, %v3522_v32, %v6165_v9 }
 0x331   : > { %v6258_v34 = vpop.permute.xlu1 %1294  ;;  %v6260_v7 = vpop.permute.xlu0 %1292  ;;  %v1602_v46 = vsel %vm7829_vm12, %v1594_v0, %v6229_v2 }
 0x334   : > { %2323 = vrot.lane.b32.xlu0 %v2319_v62, %s3605_s16  ;;  %v1603_v62 = vsel %vm7828_vm13, %v1595_v37, %v6227_v33 }
 0x335   : > { %v6264_v48 = vpop.permute.xlu1 %1298  ;;  %v6266_v27 = vpop.permute.xlu0 %1296  ;;  %v1611_v6 = vsel %vm774_vm3, %v1603_v62, %v6245_v3 }
 0x338   : > { %2395 = vrot.lane.b32.xlu0 %v2391_v43, %s3606_s17  ;;  %v1597_v43 = vsel %vm756_vm1, %v5916_v5, %v6201_v63  ;;  %v1610_v63 = vsel %vm774_vm3, %v1602_v46, %v6247_v12 }
 0x339   : > { %v1319_v17 = vpop.permute.xlu1 %1318  ;;  %v1317_v30 = vpop.permute.xlu0 %1316  ;;  %v1605_v33 = vsel %vm7830_vm14, %v1597_v43, %v6239_v55  ;;  %v1618_v37 = vsel %vm783_vm4, %v1610_v63, %v6260_v7 }
 0x33a   : > { %v1613_v2 = vsel %vm774_vm3, %v1605_v33, %v6252_v11  ;;  %v1626_v12 = vsel %vm792_vm5, %v1618_v37, %v1317_v30 }
 0x33c   : > { %2339 = vrot.lane.b32.xlu0 %v2335_v49, %s3606_s17  ;;  %v3523_v49 = vld [vmem:[%s3693_s9 + $0xd0] sm:$0x1f]  ;;  %s7057_s9 = scalar_lea.hbm %s7104_s5, %s3220_s10 }
 0x33d   : > { %v1323_v28 = vpop.permute.xlu1 %1322  ;;  %v1321_v10 = vpop.permute.xlu0 %1320  ;;  %v1596_v47 = vsel %vm756_vm1, %v3523_v49, %v6203_v38  ;;  %v1619_v38 = vsel %vm783_vm4, %v1611_v6, %v6258_v34  ;;  %vm2260_vm1 = vcmask 257024  }
 0x33e   : > { %v1604_v5 = vsel %vm7831_vm2, %v1596_v47, %v6241_v54  ;;  %v1627_v55 = vsel %vm792_vm5, %v1619_v38, %v1319_v17  ;;  %v1621_v54 = vsel %vm783_vm4, %v1613_v2, %v6264_v48 }
 0x33f   : > { %v1612_v3 = vsel %vm774_vm3, %v1604_v5, %v6254_v61  ;;  %v1629_v11 = vsel %vm792_vm5, %v1621_v54, %v1323_v28  ;;  %vm7832_vm3 = vcmask 293888   ;;  %v2681_v54 = vld [vmem:[%s7102_s3 + $0x70] sm:$0xff] }
 0x340   : > { %v1620_v46 = vsel %vm783_vm4, %v1612_v3, %v6266_v27  ;;  %vm7833_vm4 = vmmov %vm7832_vm3 }
 0x341   : > { %v1343_v41 = vpop.permute.xlu1 %1342  ;;  %v1341_v21 = vpop.permute.xlu0 %1340  ;;  %v1628_v61 = vsel %vm792_vm5, %v1620_v46, %v1321_v10  ;;  %vm7834_vm5 = vcmask 318464  }
 0x342   : > { %v1635_v47 = vsel %vm801_vm6, %v1627_v55, %v1343_v41  ;;  %v1634_v34 = vsel %vm801_vm6, %v1626_v12, %v1341_v21  ;;  %vm7841_vm0 = vmmov %vm7834_vm5 }
 0x343   : > { %vm7843_vm12 = vmmov %vm7841_vm0 }
 0x345   : > { %v6270_v60 = vpop.permute.xlu1 %1346  ;;  %v6272_v4 = vpop.permute.xlu0 %1344 }
 0x346   : > { %v1637_v48 = vsel %vm801_vm6, %v1629_v11, %v6270_v60  ;;  %v1636_v27 = vsel %vm801_vm6, %v1628_v61, %v6272_v4  ;;  %v6380_v60 = vld [vmem:[%s7101_s2] ss:$0 sm:$0xff]  ;;  %vm7835_vm6 = vmmov %vm7834_vm5 }
 0x349   : > { %v1367_v1 = vpop.permute.xlu1 %1366  ;;  %v1365_v20 = vpop.permute.xlu0 %1364 }
 0x34a   : > { %v1643_v7 = vsel %vm810_vm7, %v1635_v47, %v1367_v1  ;;  %v1642_v30 = vsel %vm810_vm7, %v1634_v34, %v1365_v20 }
 0x34d   : > { %v6274_v16 = vpop.permute.xlu1 %1370  ;;  %v6276_v14 = vpop.permute.xlu0 %1368 }
 0x34e   : > { %v1645_v28 = vsel %vm810_vm7, %v1637_v48, %v6274_v16  ;;  %v1644_v10 = vsel %vm810_vm7, %v1636_v27, %v6276_v14  ;;  %vm7836_vm7 = vcmask 343040   ;;  %v2679_v48 = vld [vmem:[%s7102_s3 + $0x60] sm:$0xff] }
 0x34f   : > { %vm7844_vm14 = vmmov %vm7836_vm7 }
 0x350   : > { %vm7845_vm2 = vmmov %vm7836_vm7 }
 0x351   : > { %v1399_v51 = vpop.permute.xlu1 %1398  ;;  %v1397_v24 = vpop.permute.xlu0 %1396 }
 0x352   : > { %v1651_v41 = vsel %vm819_vm8, %v1643_v7, %v1399_v51  ;;  %v1650_v21 = vsel %vm819_vm8, %v1642_v30, %v1397_v24  ;;  %v2694_v30 = vld [vmem:[%s7102_s3 + $0xd8] sm:$0xff] }
 0x355   : > { %v6278_v56 = vpop.permute.xlu1 %1402  ;;  %v6280_v19 = vpop.permute.xlu0 %1400 }
 0x356   : > { %v1653_v4 = vsel %vm819_vm8, %v1645_v28, %v6278_v56  ;;  %v1652_v20 = vsel %vm819_vm8, %v1644_v10, %v6280_v19  ;;  %vm7837_vm8 = vmmov %vm7832_vm3  ;;  %v2693_v28 = vld [vmem:[%s7102_s3 + $0xd0] sm:$0xff] }
 0x359   : > { %v1431_v29 = vpop.permute.xlu1 %1430  ;;  %v6282_v45 = vpop.permute.xlu0 %1428 }
 0x35a   : > { %v1659_v1 = vsel %vm828_vm9, %v1651_v41, %v1431_v29  ;;  %v1658_v16 = vsel %vm828_vm9, %v1650_v21, %v6282_v45  ;;  %v2678_v41 = vld [vmem:[%s7102_s3 + $0x58] sm:$0xff] }
 0x35d   : > { %v6284_v25 = vpop.permute.xlu1 %1434  ;;  %v6286_v31 = vpop.permute.xlu0 %1432 }
 0x35e   : > { %v1661_v51 = vsel %vm828_vm9, %v1653_v4, %v6284_v25  ;;  %v1660_v24 = vsel %vm828_vm9, %v1652_v20, %v6286_v31  ;;  %vm7838_vm9 = vmmov %vm7836_vm7 }
 0x361   : > { %v1455_v58 = vpop.permute.xlu1 %1454  ;;  %v6288_v40 = vpop.permute.xlu0 %1452 }
 0x362   : > { %v1667_v14 = vsel %vm837_vm10, %v1659_v1, %v1455_v58  ;;  %v1666_v29 = vsel %vm837_vm10, %v1658_v16, %v6288_v40 }
 0x365   : > { %v6290_v26 = vpop.permute.xlu1 %1458  ;;  %v6292_v13 = vpop.permute.xlu0 %1456 }
 0x366   : > { %v1669_v19 = vsel %vm837_vm10, %v1661_v51, %v6290_v26  ;;  %v1668_v31 = vsel %vm837_vm10, %v1660_v24, %v6292_v13  ;;  %vm7839_vm10 = vcmask 392192  }
 0x367   : > { %vm7842_vm13 = vmmov %vm7839_vm10 }
 0x369   : > { %v1479_v35 = vpop.permute.xlu1 %1478  ;;  %v6294_v39 = vpop.permute.xlu0 %1476 }
 0x36a   : > { %v1675_v0 = vsel %vm846_vm11, %v1667_v14, %v1479_v35  ;;  %v1674_v45 = vsel %vm846_vm11, %v1666_v29, %v6294_v39 }
 0x36d   : > { %v6296_v44 = vpop.permute.xlu1 %1482  ;;  %v6298_v22 = vpop.permute.xlu0 %1480 }
 0x36e   : > { %v1677_v40 = vsel %vm846_vm11, %v1669_v19, %v6296_v44  ;;  %v1676_v13 = vsel %vm846_vm11, %v1668_v31, %v6298_v22  ;;  %v2698_v22 = vld [vmem:[%s7102_s3 + $0xf8] sm:$0xff]  ;;  %vm7840_vm11 = vmmov %vm7832_vm3  ;;  %v2692_v19 = vld [vmem:[%s7102_s3 + $0xc8] sm:$0xff] }
 0x36f   : > { %3239 = vmatprep.subr.mxu1 %v2698_v22  ;;  %v2691_v31 = vld [vmem:[%s7102_s3 + $0xc0] sm:$0xff] }
 0x371   : > { %v1503_v50 = vpop.permute.xlu1 %1502  ;;  %v6300_v57 = vpop.permute.xlu0 %1500 }
 0x372   : > { %v1683_v58 = vsel %vm7832_vm3, %v1675_v0, %v1503_v50  ;;  %v1682_v35 = vsel %vm7833_vm4, %v1674_v45, %v6300_v57  ;;  %vm7846_vm3 = vmmov %vm7839_vm10  ;;  %vm7847_vm4 = vcmask 613376  }
 0x375   : > { %v6302_v59 = vpop.permute.xlu1 %1506  ;;  %v6304_v18 = vpop.permute.xlu0 %1504 }
 0x376   : > { %v1685_v44 = vsel %vm7837_vm8, %v1677_v40, %v6302_v59  ;;  %v2682_v59 = vld [vmem:[%s7102_s3 + $0x78] sm:$0xff]  ;;  %v1684_v3 = vsel %vm7840_vm11, %v1676_v13, %v6304_v18  ;;  %v2675_v40 = vld [vmem:[%s7102_s3 + $0x40] sm:$0xff]  ;;  %v2688_v13 = vld [vmem:[%s7102_s3 + $0xa8] sm:$0xff]  ;;  %vm2511_vm8 = vcmask 785408  }
 0x377   : > { %3240 = vmatpush3.msra.mxu1 %v2682_v59  ;;  %v2669_v59 = vld [vmem:[%s7102_s3 + $0x10] sm:$0xff] }
 0x379   : > { %v6306_v36 = vpop.permute.xlu1 %1527  ;;  %v6308_v15 = vpop.permute.xlu0 %1525 }
 0x37a   : > { %v1691_v26 = vsel %vm7834_vm5, %v1683_v58, %v6306_v36  ;;  %v1690_v39 = vsel %vm7835_vm6, %v1682_v35, %v6308_v15  ;;  %vm7848_vm5 = vmmov %vm7846_vm3  ;;  %v2676_v58 = vld [vmem:[%s7102_s3 + $0x48] sm:$0xff]  ;;  %vm2501_vm6 = vcmask 261120  }
 0x37d   : > { %v6312_v23 = vpop.permute.xlu0 %1529 }
 0x37e   : > { %v1692_v46 = vsel %vm7843_vm12, %v1684_v3, %v6312_v23 }
 0x380   : > { %v6310_v53 = vpop.permute.xlu1 %1531 }
 0x381   : > { %v6316_v52 = vpop.permute.xlu0 %1550  ;;  %v3381_v62 = vpop.f32.mrf.mxu0  ;;  %v1693_v37 = vsel %vm7841_vm0, %v1685_v44, %v6310_v53  ;;  %v2696_v53 = vld [vmem:[%s7102_s3 + $0xe8] sm:$0xff] }
 0x382   : > { %v2135_v25 = vadd.f32 %v3381_v62, %v6380_v60  ;;  %v1698_v57 = vsel %vm7838_vm9, %v1690_v39, %v6316_v52  ;;  %v2697_v52 = vld [vmem:[%s7102_s3 + $0xf0] sm:$0xff]  ;;  %v2674_v39 = vld [vmem:[%s7102_s3 + $0x38] sm:$0xff]  ;;  %v2672_v44 = vld [vmem:[%s7102_s3 + $0x28] sm:$0xff] }
 0x383   : > { %v2129_v49 = vpop.f32.mrf.mxu0  ;;  %3241 = vmatprep.subr.mxu1 %v2697_v52  ;;  %v2684_v52 = vld [vmem:[%s7102_s3 + $0x88] sm:$0xff] }
 0x384   : > { %v6314_v8 = vpop.permute.xlu1 %1552  ;;  %v2169_v6 = vmax.f32 %v2135_v25, 0.0  ;;  %v2130_v33 = vadd.f32 %v6380_v60, %v2129_v49  ;;  %3242 = vmatpush3.msra.mxu1 %v2681_v54  ;;  %v2690_v49 = vld [vmem:[%s7102_s3 + $0xb8] sm:$0xff] }
 0x385   : > { %v6338_v9 = vpop.permute.xlu0 %1554  ;;  %v1699_v50 = vsel %vm7836_vm7, %v1691_v26, %v6314_v8  ;;  %3243 = vmatprep.subr.mxu1 %v2696_v53  ;;  %vm2506_vm7 = vcmask 523264  }
 0x386   : > { %v2185_v63 = vcombine.high %v2169_v6, %v2169_v6  ;;  %2263 = vst.msk [vmem:[#allocation2 + $0x21] sm:$0xf] %vm2260_vm1, %v2169_v6  ;;  %v2168_v8 = vmax.f32 %v2130_v33, 0.0  ;;  %v1700_v11 = vsel %vm7845_vm2, %v1692_v46, %v6338_v9  ;;  %v2695_v9 = vld [vmem:[%s7102_s3 + $0xe0] sm:$0xff]  ;;  %v2689_v6 = vld [vmem:[%s7102_s3 + $0xb0] sm:$0xff] }
 0x387   : > { %v2673_v33 = vld [vmem:[%s7102_s3 + $0x30] sm:$0xff]  ;;  %v2683_v46 = vld [vmem:[%s7102_s3 + $0x80] sm:$0xff] }
 0x388   : > { %v6336_v42 = vpop.permute.xlu1 %1556  ;;  %2264 = vst.msk [vmem:[#allocation2 + $0x29] sm:$0xf] %vm2260_vm1, %v2185_v63  ;;  %v2184_v47 = vcombine.high %v2168_v8, %v2168_v8  ;;  %2261 = vst.msk [vmem:[#allocation2 + $0x11] sm:$0xf] %vm2260_vm1, %v2168_v8  ;;  %v2670_v63 = vld [vmem:[%s7102_s3 + $0x18] sm:$0xff]  ;;  %v2685_v8 = vld [vmem:[%s7102_s3 + $0x90] sm:$0xff] }
 0x389   : > { %v1575_v32 = vpop.permute.xlu0 %1574  ;;  %v1701_v12 = vsel %vm7844_vm14, %v1693_v37, %v6336_v42  ;;  %v2680_v42 = vld [vmem:[%s7102_s3 + $0x68] sm:$0xff] }
 0x38a   : > { %v1706_v15 = vsel %vm882_vm15, %v1698_v57, %v1575_v32  ;;  %2262 = vst.msk [vmem:[#allocation2 + $0x19] sm:$0xf] %vm2260_vm1, %v2184_v47  ;;  %3244 = vmatpush3.msra.mxu1 %v2680_v42  ;;  %v2687_v57 = vld [vmem:[%s7102_s3 + $0xa0] sm:$0xff] }
 0x38b   : > { %3245 = vmatprep.subr.mxu1 %v2695_v9 }
 0x38c   : > { %v1577_v17 = vpop.permute.xlu1 %1576  ;;  %3246 = vmatpush3.msra.mxu1 %v2679_v48 }
 0x38d   : > { %v1579_v43 = vpop.permute.xlu0 %1578  ;;  %v1707_v36 = vsel %vm882_vm15, %v1699_v50, %v1577_v17  ;;  %3247 = vmatprep.subr.mxu1 %v2694_v30 }
 0x38e   : > { %v1708_v34 = vsel %vm882_vm15, %v1700_v11, %v1579_v43  ;;  %3248 = vmatpush3.msra.mxu1 %v2678_v41  ;;  %v7851_v41 = vld [vmem:[#allocation199_spill] sm:$0xff] }
 0x38f   : > { %v6478_v10 = vld [vmem:[#allocation2 + $0x28] sm:$0x3f]  ;;  %3249 = vmatprep.subr.mxu1 %v2693_v28  ;;  %v6565_v37 = vld [vmem:[#allocation2 + $0x10] sm:$0x3f]  ;;  %v2351_v28 = vrot.slane %v7851_v41, 2 }
 0x390   : > { %v1581_v56 = vpop.permute.xlu1 %1580  ;;  %2367 = vrot.lane.b32.xlu0 %v6478_v10, %s3604_s14  ;;  %v2320_v47 = vrot.slane %v6565_v37, 1 }
 0x391   : > { %v1709_v61 = vsel %vm882_vm15, %v1701_v12, %v1581_v56  ;;  %vm7849_vm15 = vmmov %vm7847_vm4  ;;  %v6482_v21 = vld [vmem:[#allocation2 + $0x18] sm:$0x3f]  ;;  %v2677_v56 = vld [vmem:[%s7102_s3 + $0x50] sm:$0xff] }
 0x392   : > { %v1988_v2 = vpop.permute.xlu0 %1987  ;;  %2365 = vrot.lane.b32.xlu1 %v6482_v21, %s3604_s14  ;;  %3250 = vmatpush3.msra.mxu1 %v2677_v56  ;;  %v2667_v12 = vld [vmem:[%s7102_s3] sm:$0xff]  ;;  %v2392_v53 = vrot.slane %v6482_v21, 1 }
 0x393   : > { %v2007_v55 = vsel %vm7842_vm13, %v1706_v15, %v1988_v2  ;;  %3251 = vmatprep.subr.mxu1 %v2692_v19  ;;  %v2686_v15 = vld [vmem:[%s7102_s3 + $0x98] sm:$0xff]  ;;  %v6551_v2 = vld [vmem:[#allocation2 + $0x20] sm:$0x3f] }
 0x394   : > { %v1990_v5 = vpop.permute.xlu1 %1989  ;;  %3252 = vmatpush3.msra.mxu1 %v2676_v58  ;;  %v2321_v54 = vrot.slane %v6551_v2, 1 }
 0x395   : > { %v2008_v38 = vsel %vm7839_vm10, %v1707_v36, %v1990_v5  ;;  %3253 = vmatprep.subr.mxu1 %v2691_v31  ;;  %v2671_v5 = vld [vmem:[%s7102_s3 + $0x20] sm:$0xff] }
 0x396   : > { %v2040_v18 = vcombine.low %v2007_v55, %v2008_v38  ;;  %v1992_v17 = vpop.permute.xlu0 %1991  ;;  %3254 = vmatpush3.msra.mxu1 %v2675_v40  ;;  %v2668_v55 = vld [vmem:[%s7102_s3 + $0x8] sm:$0xff] }
 0x397   : > { %v2009_v32 = vsel %vm7848_vm5, %v1708_v34, %v1992_v17  ;;  %3255 = vmatprep.subr.mxu1 %v2690_v49  ;;  %v2714_v49 = vld [vmem:[%s7102_s3 + $0x178] sm:$0xff] }
 0x398   : > { %v1994_v23 = vpop.permute.xlu1 %1993  ;;  %3388 = vmatprep.mubr.msk.f32.mxu0 %vm7847_vm4, %v2040_v18  ;;  %3256 = vmatpush3.msra.mxu1 %v2674_v39  ;;  %v2393_v18 = vrot.slane %v6478_v10, 1 }
 0x399   : > { %v2010_v7 = vsel %vm7846_vm3, %v1709_v61, %v1994_v23  ;;  %3257 = vmatprep.subr.mxu1 %v2689_v6  ;;  %v7850_v23 = vld [vmem:[#allocation198_spill] sm:$0xff] }
 0x39a   : > { %v2041_v27 = vcombine.low %v2009_v32, %v2010_v7  ;;  %3258 = vmatpush3.msra.mxu1 %v2673_v33  ;;  %v2415_v42 = vrot.slane %v7850_v23, 2  ;;  %v2352_v7 = vrot.slane %v6565_v37, 2  ;;  %v2364_v17 = vpop.permute.xlu0 %2363  ;;  %v2729_v33 = vld [vmem:[%s7102_s3 + $0x1f0] sm:$0xff]  ;;  %v2726_v23 = vld [vmem:[%s7102_s3 + $0x1d8] sm:$0xff] }
 0x39b   : > { %3259 = vmatprep.subr.mxu1 %v2688_v13 }
 0x39c   : > { %3389 = vmatmul.mubr.msk.f32.gmra.mxu0 %vm7849_vm15, %v2041_v27  ;;  %3260 = vmatpush3.msra.mxu1 %v2672_v44 }
 0x39d   : > { %3261 = vmatprep.subr.mxu1 %v2687_v57 }
 0x39e   : > { %3262 = vmatpush3.msra.mxu1 %v2671_v5  ;;  %v2304_v9 = vpop.permute.xlu0 %2303  ;;  %v2713_v5 = vld [vmem:[%s7102_s3 + $0x170] sm:$0xff] }
 0x39f   : > { %3263 = vmatprep.subr.mxu1 %v2686_v15 }
 0x3a0   : > { %3264 = vmatpush3.msra.mxu1 %v2670_v63 }
 0x3a1   : > { %3265 = vmatprep.subr.mxu1 %v2685_v8  ;;  %v2728_v8 = vld [vmem:[%s7102_s3 + $0x1e8] sm:$0xff] }
 0x3a2   : > { %3266 = vmatpush3.msra.mxu1 %v2669_v59  ;;  %v2380_v32 = vpop.permute.xlu0 %2379  ;;  %v2712_v59 = vld [vmem:[%s7102_s3 + $0x168] sm:$0xff] }
 0x3a3   : > { %3267 = vmatprep.subr.mxu1 %v2684_v52 }
 0x3a4   : > { %3268 = vmatpush3.msra.mxu1 %v2668_v55 }
 0x3a5   : > { %3269 = vmatprep.subr.mxu1 %v2683_v46 }
 0x3a6   : > { %3270 = vmatpush3.msra.mxu1 %v2667_v12  ;;  %v2727_v12 = vld [vmem:[%s7102_s3 + $0x1e0] sm:$0xff] }
 0x3ab   : > { %v3384_v1 = vpop.f32.mrf.mxu0 }
 0x3ac   : > { %v2145_v4 = vadd.f32 %v3384_v1, %v6380_v60 }
 0x3ad   : > { %v2139_v20 = vpop.f32.mrf.mxu0 }
 0x3ae   : > { %v2171_v16 = vmax.f32 %v2145_v4, 0.0  ;;  %v2140_v14 = vadd.f32 %v6380_v60, %v2139_v20  ;;  %v2324_v4 = vpop.permute.xlu0 %2323 }
 0x3b0   : > { %v2187_v51 = vcombine.high %v2171_v16, %v2171_v16  ;;  %2267 = vst.msk [vmem:[#allocation2 + $0x41] sm:$0xf] %vm2260_vm1, %v2171_v16  ;;  %v2170_v24 = vmax.f32 %v2140_v14, 0.0 }
 0x3b2   : > { %2268 = vst.msk [vmem:[#allocation2 + $0x49] sm:$0xf] %vm2260_vm1, %v2187_v51  ;;  %v2186_v29 = vcombine.high %v2170_v24, %v2170_v24  ;;  %2265 = vst.msk [vmem:[#allocation2 + $0x31] sm:$0xf] %vm2260_vm1, %v2170_v24  ;;  %v2516_v24 = vsel %vm2501_vm6, %v2351_v28, %v2364_v17  ;;  %v2396_v19 = vpop.permute.xlu0 %2395  ;;  %v2725_v17 = vld [vmem:[%s7102_s3 + $0x1d0] sm:$0xff] }
 0x3b4   : > { %2266 = vst.msk [vmem:[#allocation2 + $0x39] sm:$0xf] %vm2260_vm1, %v2186_v29 }
 0x3b6   : > { %v2340_v39 = vpop.permute.xlu0 %2339 }
 0x3b9   : > { %v6661_v46 = vld [vmem:[#allocation2 + $0x30] sm:$0x3f] }
 0x3ba   : > { %v6706_v28 = vrot.slane %v6661_v46, 2 }
 0x3bb   : > { %v6599_v34 = vld [vmem:[#allocation2 + $0x38] sm:$0x3f] }
 0x3db   : > { %v3387_v0 = vpop.f32.mrf.mxu0 }
 0x3dc   : > { %v2155_v62 = vadd.f32 %v3387_v0, %v6380_v60 }
 0x3dd   : > { %v2149_v45 = vpop.f32.mrf.mxu0 }
 0x3de   : > { %v2173_v25 = vmax.f32 %v2155_v62, 0.0  ;;  %v2150_v43 = vadd.f32 %v6380_v60, %v2149_v45  ;;  %v2520_v62 = vsel %vm2506_vm7, %v2516_v24, %v2380_v32  ;;  %v2709_v32 = vld [vmem:[%s7102_s3 + $0x150] sm:$0xff]  ;;  %v2720_v24 = vld [vmem:[%s7102_s3 + $0x1a8] sm:$0xff] }
 0x3e0   : > { %v2189_v35 = vcombine.high %v2173_v25, %v2173_v25  ;;  %2271 = vst.msk [vmem:[#allocation2 + $0x81] sm:$0xf] %vm2260_vm1, %v2173_v25  ;;  %v2172_v26 = vmax.f32 %v2150_v43, 0.0  ;;  %v2524_v25 = vsel %vm2511_vm8, %v2520_v62, %v2396_v19  ;;  %v2702_v62 = vld [vmem:[%s7102_s3 + $0x118] sm:$0xff] }
 0x3e1   : > { %v2746_v19 = vld [vmem:[%s7102_s3 + $0x278] sm:$0xff] }
 0x3e2   : > { %2272 = vst.msk [vmem:[#allocation2 + $0x89] sm:$0xf] %vm2260_vm1, %v2189_v35  ;;  %v2188_v50 = vcombine.high %v2172_v26, %v2172_v26  ;;  %2269 = vst.msk [vmem:[#allocation2 + $0x71] sm:$0xf] %vm2260_vm1, %v2172_v26  ;;  %v2730_v35 = vld [vmem:[%s7102_s3 + $0x1f8] sm:$0xff] }
 0x3e3   : > { %3277 = vmatprep.subr.mxu0 %v2730_v35  ;;  %v2700_v35 = vld [vmem:[%s7102_s3 + $0x108] sm:$0xff] }
 0x3e4   : > { %2270 = vst.msk [vmem:[#allocation2 + $0x79] sm:$0xf] %vm2260_vm1, %v2188_v50  ;;  %3278 = vmatpush3.msra.mxu0 %v2714_v49  ;;  %v2715_v49 = vld [vmem:[%s7102_s3 + $0x180] sm:$0xff] }
 0x3e5   : > { %3279 = vmatprep.subr.mxu0 %v2729_v33 }
 0x3e6   : > { %3280 = vmatpush3.msra.mxu0 %v2713_v5  ;;  %v2757_v5 = vld [vmem:[%s7102_s3 + $0x2d0] sm:$0xff] }
 0x3e7   : > { %v6534_v36 = vld [vmem:[#allocation2 + $0x80] sm:$0x3f]  ;;  %3281 = vmatprep.subr.mxu0 %v2728_v8  ;;  %v2740_v8 = vld [vmem:[%s7102_s3 + $0x248] sm:$0xff] }
 0x3e8   : > { %2307 = vrot.lane.b32.xlu0 %v6534_v36, %s3604_s14  ;;  %v2337_v61 = vrot.slane %v6534_v36, 1  ;;  %3282 = vmatpush3.msra.mxu0 %v2712_v59  ;;  %v6837_v59 = vld [vmem:[#allocation2 + $0x40] sm:$0x3f] }
 0x3e9   : > { %v2290_v38 = vld [vmem:[#allocation2 + $0x70] sm:$0x3f]  ;;  %v6553_v22 = vld [vmem:[#allocation2 + $0x88] sm:$0x3f]  ;;  %3283 = vmatprep.subr.mxu0 %v2727_v12  ;;  %v2738_v12 = vld [vmem:[%s7102_s3 + $0x238] sm:$0xff] }
 0x3ea   : > { %2305 = vrot.lane.b32.xlu1 %v2290_v38, %s3604_s14  ;;  %v2336_v11 = vrot.slane %v2290_v38, 1 }
 0x3eb   : > { %v6563_v3 = vld [vmem:[#allocation2 + $0x78] sm:$0x3f] }
 0x3ec   : > { %2383 = vrot.lane.b32.xlu0 %v6553_v22, %s3605_s16 }
 0x3ee   : > { %2381 = vrot.lane.b32.xlu1 %v6563_v3, %s3605_s16 }
 0x3f0   : > { %2327 = vrot.lane.b32.xlu0 %v2321_v54, %s3605_s16 }
 0x3f2   : > { %2325 = vrot.lane.b32.xlu1 %v2320_v47, %s3605_s16 }
 0x3f4   : > { %2399 = vrot.lane.b32.xlu0 %v2393_v18, %s3606_s17 }
 0x3f6   : > { %2397 = vrot.lane.b32.xlu1 %v2392_v53, %s3606_s17 }
 0x3f8   : > { %2463 = vrot.lane.b32.xlu0 %v2336_v11, %s3604_s14 }
 0x3fa   : > { %2341 = vrot.lane.b32.xlu1 %v2336_v11, %s3606_s17  ;;  %v2711_v11 = vld [vmem:[%s7102_s3 + $0x160] sm:$0xff] }
 0x3fb   : > { %3284 = vmatpush3.msra.mxu0 %v2711_v11  ;;  %v2457_v11 = vrot.slane %v6837_v59, 1 }
 0x3fc   : > { %2343 = vrot.lane.b32.xlu0 %v2337_v61, %s3606_s17  ;;  %3285 = vmatprep.subr.mxu0 %v2726_v23  ;;  %v2753_v23 = vld [vmem:[%s7102_s3 + $0x2b0] sm:$0xff] }
 0x3fe   : > { %2369 = vrot.lane.b32.xlu1 %v6599_v34, %s3604_s14 }
 0x400   : > { %2419 = vrot.lane.b32.xlu0 %v2415_v42, %s3604_s14  ;;  %v2322_v42 = vrot.slane %v6661_v46, 1 }
 0x404   : > { %2476 = vrot.lane.b32.xlu0 %v2352_v7, %s3605_s16  ;;  %v2366_v48 = vpop.permute.xlu1 %2365 }
 0x405   : > { %v2517_v58 = vsel %vm2501_vm6, %v2352_v7, %v2366_v48  ;;  %v2710_v7 = vld [vmem:[%s7102_s3 + $0x158] sm:$0xff]  ;;  %v2724_v48 = vld [vmem:[%s7102_s3 + $0x1c8] sm:$0xff] }
 0x406   : > { %3286 = vmatpush3.msra.mxu0 %v2710_v7  ;;  %v2737_v7 = vld [vmem:[%s7102_s3 + $0x230] sm:$0xff] }
 0x407   : > { %3287 = vmatprep.subr.mxu0 %v2725_v17  ;;  %v2736_v17 = vld [vmem:[%s7102_s3 + $0x228] sm:$0xff] }
 0x408   : > { %2432 = vrot.lane.b32.xlu0 %v6565_v37, %s3605_s16  ;;  %3288 = vmatpush3.msra.mxu0 %v2709_v32 }
 0x409   : > { %3289 = vmatprep.subr.mxu0 %v2724_v48  ;;  %v2751_v48 = vld [vmem:[%s7102_s3 + $0x2a0] sm:$0xff] }
 0x40c   : > { %2489 = vrot.lane.b32.xlu0 %v6482_v21, %s3606_s17 }
 0x410   : > { %2445 = vrot.lane.b32.xlu0 %v2290_v38, %s3606_s17 }
 0x414   : > { %2553 = vrot.lane.b32.xlu0 %v2392_v53, %s3604_s14  ;;  %v2408_v53 = vrot.slane %v6563_v3, 1 }
 0x45c   : > { %v3390_v27 = vpop.f32.mrf.mxu0  ;;  %v2306_v30 = vpop.permute.xlu1 %2305 }
 0x45d   : > { %v2165_v1 = vadd.f32 %v3390_v27, %v6380_v60  ;;  %v2503_v44 = vsel %vm2501_vm6, %v6565_v37, %v2306_v30  ;;  %v2394_v27 = vrot.slane %v6599_v34, 1  ;;  %v2708_v30 = vld [vmem:[%s7102_s3 + $0x148] sm:$0xff] }
 0x45e   : > { %v2159_v20 = vpop.f32.mrf.mxu0  ;;  %3290 = vmatpush3.msra.mxu0 %v2708_v30 }
 0x45f   : > { %v2175_v16 = vmax.f32 %v2165_v1, 0.0  ;;  %v2160_v14 = vadd.f32 %v6380_v60, %v2159_v20  ;;  %v2502_v60 = vsel %vm2501_vm6, %v7851_v41, %v2304_v9  ;;  %v2417_v9 = vrot.slane %v6478_v10, 2  ;;  %v2723_v41 = vld [vmem:[%s7102_s3 + $0x1c0] sm:$0xff]  ;;  %v2706_v20 = vld [vmem:[%s7102_s3 + $0x138] sm:$0xff] }
 0x460   : > { %v2382_v51 = vpop.permute.xlu1 %2381  ;;  %v2507_v43 = vsel %vm2506_vm7, %v2502_v60, %v2324_v4  ;;  %3291 = vmatprep.subr.mxu0 %v2723_v41  ;;  %v2707_v1 = vld [vmem:[%s7102_s3 + $0x140] sm:$0xff]  ;;  %v2722_v4 = vld [vmem:[%s7102_s3 + $0x1b8] sm:$0xff]  ;;  %v2761_v60 = vld [vmem:[%s7102_s3 + $0x2f0] sm:$0xff] }
 0x461   : > { %v2191_v29 = vcombine.high %v2175_v16, %v2175_v16  ;;  %2275 = vst.msk [vmem:[#allocation2 + $0xa1] sm:$0xf] %vm2260_vm1, %v2175_v16  ;;  %v2174_v0 = vmax.f32 %v2160_v14, 0.0  ;;  %v2521_v31 = vsel %vm2506_vm7, %v2517_v58, %v2382_v51  ;;  %v2512_v13 = vsel %vm2511_vm8, %v2507_v43, %v2340_v39  ;;  %3292 = vmatpush3.msra.mxu0 %v2707_v1  ;;  %v2721_v16 = vld [vmem:[%s7102_s3 + $0x1b0] sm:$0xff]  ;;  %v2716_v43 = vld [vmem:[%s7102_s3 + $0x188] sm:$0xff]  ;;  %v2759_v39 = vld [vmem:[%s7102_s3 + $0x2e0] sm:$0xff] }
 0x462   : > { %3293 = vmatprep.subr.mxu0 %v2722_v4  ;;  %v2416_v14 = vrot.slane %v6482_v21, 2  ;;  %v2705_v51 = vld [vmem:[%s7102_s3 + $0x130] sm:$0xff]  ;;  %v2719_v21 = vld [vmem:[%s7102_s3 + $0x1a0] sm:$0xff]  ;;  %v2734_v41 = vld [vmem:[%s7102_s3 + $0x218] sm:$0xff] }
 0x463   : > { %2276 = vst.msk [vmem:[#allocation2 + $0xa9] sm:$0xf] %vm2260_vm1, %v2191_v29  ;;  %v2190_v56 = vcombine.high %v2174_v0, %v2174_v0  ;;  %2273 = vst.msk [vmem:[#allocation2 + $0x91] sm:$0xf] %vm2260_vm1, %v2174_v0  ;;  %3294 = vmatpush3.msra.mxu0 %v2706_v20  ;;  %v2704_v29 = vld [vmem:[%s7102_s3 + $0x128] sm:$0xff]  ;;  %v2718_v0 = vld [vmem:[%s7102_s3 + $0x198] sm:$0xff] }
 0x464   : > { %v2326_v45 = vpop.permute.xlu1 %2325  ;;  %3295 = vmatprep.subr.mxu0 %v2721_v16  ;;  %v2701_v58 = vld [vmem:[%s7102_s3 + $0x110] sm:$0xff]  ;;  %v2409_v20 = vrot.slane %v6553_v22, 1  ;;  %v2748_v16 = vld [vmem:[%s7102_s3 + $0x288] sm:$0xff] }
 0x465   : > { %2274 = vst.msk [vmem:[#allocation2 + $0x99] sm:$0xf] %vm2260_vm1, %v2190_v56  ;;  %v2508_v15 = vsel %vm2506_vm7, %v2503_v44, %v2326_v45  ;;  %3296 = vmatpush3.msra.mxu0 %v2705_v51  ;;  %v2762_v56 = vld [vmem:[%s7102_s3 + $0x2f8] sm:$0xff]  ;;  %v2717_v45 = vld [vmem:[%s7102_s3 + $0x190] sm:$0xff]  ;;  %v2418_v51 = vrot.slane %v6599_v34, 2 }
 0x466   : > { %3297 = vmatprep.subr.mxu0 %v2720_v24  ;;  %3315 = vmatprep.subr.mxu1 %v2762_v56  ;;  %v2758_v44 = vld [vmem:[%s7102_s3 + $0x2d8] sm:$0xff]  ;;  %v2749_v1 = vld [vmem:[%s7102_s3 + $0x290] sm:$0xff]  ;;  %v2747_v24 = vld [vmem:[%s7102_s3 + $0x280] sm:$0xff] }
 0x467   : > { %3298 = vmatpush3.msra.mxu0 %v2704_v29  ;;  %v2733_v4 = vld [vmem:[%s7102_s3 + $0x210] sm:$0xff]  ;;  %v2731_v29 = vld [vmem:[%s7102_s3 + $0x200] sm:$0xff] }
 0x468   : > { %v2398_v40 = vpop.permute.xlu1 %2397  ;;  %3299 = vmatprep.subr.mxu0 %v2719_v21  ;;  %v6803_v33 = vld [vmem:[#allocation2 + $0xa0] sm:$0x3f]  ;;  %v2475_v21 = vrot.slane %v6837_v59, 2 }
 0x469   : > { %v2525_v26 = vsel %vm2511_vm8, %v2521_v31, %v2398_v40  ;;  %v2760_v31 = vld [vmem:[%s7102_s3 + $0x2e8] sm:$0xff]  ;;  %v6782_v40 = vrot.slane %v6551_v2, 2  ;;  %v2462_v30 = vrot.slane %v6803_v33, 1 }
 0x46a   : > { %v6634_v50 = vld [vmem:[#allocation2 + $0x90] sm:$0x3f]  ;;  %v3202_v6 = vcombine.low %v2524_v25, %v2525_v26  ;;  %v2744_v26 = vld [vmem:[%s7102_s3 + $0x268] sm:$0xff] }
 0x46b   : > { %2309 = vrot.lane.b32.xlu1 %v6634_v50, %s3604_s14  ;;  %v2338_v57 = vrot.slane %v6634_v50, 1  ;;  %v2745_v25 = vld [vmem:[%s7102_s3 + $0x270] sm:$0xff] }
 0x46c   : > { %v2342_v63 = vpop.permute.xlu1 %2341  ;;  %2868 = vmatprep.mubr.f32.mxu1 %v3202_v6  ;;  %v6659_v55 = vld [vmem:[#allocation2 + $0x98] sm:$0x3f]  ;;  %v2699_v6 = vld [vmem:[%s7102_s3 + $0x100] sm:$0xff] }
 0x46d   : > { %v2513_v38 = vsel %vm2511_vm8, %v2508_v15, %v2342_v63  ;;  %2467 = vrot.lane.b32.xlu0 %v2338_v57, %s3604_s14  ;;  %v2741_v15 = vld [vmem:[%s7102_s3 + $0x250] sm:$0xff]  ;;  %v2756_v63 = vld [vmem:[%s7102_s3 + $0x2c8] sm:$0xff]  ;;  %v2410_v32 = vrot.slane %v6659_v55, 1 }
 0x46e   : > { %v3201_v52 = vcombine.low %v2512_v13, %v2513_v38  ;;  %v2743_v13 = vld [vmem:[%s7102_s3 + $0x260] sm:$0xff] }
 0x46f   : > { %2385 = vrot.lane.b32.xlu1 %v6659_v55, %s3605_s16  ;;  %v2755_v38 = vld [vmem:[%s7102_s3 + $0x2c0] sm:$0xff] }
 0x470   : > { %2869 = vmatmul.mubr.f32.vlgmr.msra.gmra.mxu1 %v3201_v52  ;;  %v2754_v52 = vld [vmem:[%s7102_s3 + $0x2b8] sm:$0xff] }
 0x471   : > { %2567 = vrot.lane.b32.xlu0 %v2408_v53, %s3605_s16  ;;  %3316 = vmatpush3.msra.mxu1 %v2746_v19  ;;  %v2298_v19 = vld [vmem:[#allocation2 + $0xb0] sm:$0x3f] }
 0x472   : > { %3317 = vmatprep.subr.mxu1 %v2761_v60 }
 0x473   : > { %2329 = vrot.lane.b32.xlu1 %v2322_v42, %s3605_s16  ;;  %3318 = vmatpush3.msra.mxu1 %v2745_v25  ;;  %v6939_v25 = vld [vmem:[#allocation2 + $0xa8] sm:$0x3f] }
 0x474   : > { %3319 = vmatprep.subr.mxu1 %v2760_v31  ;;  %v2566_v31 = vrot.slane %v6939_v25, 1 }
 0x475   : > { %2423 = vrot.lane.b32.xlu0 %v2417_v9, %s3604_s14  ;;  %3320 = vmatpush3.msra.mxu1 %v2744_v26 }
 0x476   : > { %3321 = vmatprep.subr.mxu1 %v2759_v39 }
 0x477   : > { %2401 = vrot.lane.b32.xlu1 %v2394_v27, %s3606_s17  ;;  %3322 = vmatpush3.msra.mxu1 %v2743_v13 }
 0x478   : > { %3323 = vmatprep.subr.mxu1 %v2758_v44 }
 0x479   : > { %2480 = vrot.lane.b32.xlu0 %v6706_v28, %s3605_s16 }
 0x47b   : > { %2465 = vrot.lane.b32.xlu1 %v2337_v61, %s3604_s14  ;;  %v2703_v61 = vld [vmem:[%s7102_s3 + $0x120] sm:$0xff] }
 0x47c   : > { %3300 = vmatpush3.msra.mxu0 %v2703_v61  ;;  %v6923_v61 = vld [vmem:[%s7102_s3 + $0x318] sm:$0xff] }
 0x47d   : > { %2580 = vrot.lane.b32.xlu0 %v2416_v14, %s3606_s17  ;;  %3301 = vmatprep.subr.mxu0 %v2718_v0 }
 0x47e   : > { %3302 = vmatpush3.msra.mxu0 %v2702_v62  ;;  %v2286_v62 = vld [vmem:[#allocation2 + $0x48] sm:$0x3f] }
 0x47f   : > { %2345 = vrot.lane.b32.xlu1 %v2338_v57, %s3606_s17  ;;  %3303 = vmatprep.subr.mxu0 %v2717_v45  ;;  %v2742_v57 = vld [vmem:[%s7102_s3 + $0x258] sm:$0xff] }
 0x480   : > { %3304 = vmatpush3.msra.mxu0 %v2701_v58  ;;  %3324 = vmatpush3.msra.mxu1 %v2742_v57  ;;  %v2552_v58 = vrot.slane %v2286_v62, 1 }
 0x481   : > { %2436 = vrot.lane.b32.xlu0 %v6661_v46, %s3605_s16  ;;  %3305 = vmatprep.subr.mxu0 %v2716_v43 }
 0x482   : > { %3306 = vmatpush3.msra.mxu0 %v2700_v35  ;;  %3325 = vmatprep.subr.mxu1 %v2757_v5  ;;  %v2607_v35 = vrot.slane %v2298_v19, 1 }
 0x483   : > { %2421 = vrot.lane.b32.xlu1 %v2416_v14, %s3604_s14  ;;  %3307 = vmatprep.subr.mxu0 %v2715_v49  ;;  %v2732_v14 = vld [vmem:[%s7102_s3 + $0x208] sm:$0xff]  ;;  %v2579_v49 = vrot.slane %v2286_v62, 2 }
 0x484   : > { %3308 = vmatpush3.msra.mxu0 %v2699_v6  ;;  %3326 = vmatpush3.msra.mxu1 %v2741_v15 }
 0x485   : > { %2493 = vrot.lane.b32.xlu0 %v6599_v34, %s3606_s17  ;;  %3327 = vmatprep.subr.mxu1 %v2756_v63  ;;  %v2368_v34 = vpop.permute.xlu0 %2367 }
 0x486   : > { %3328 = vmatpush3.msra.mxu1 %v2740_v8  ;;  %3391 = vmatprep.subr.mxu0 %v6923_v61  ;;  %v2518_v8 = vsel %vm2501_vm6, %v6782_v40, %v2368_v34 }
 0x487   : > { %2478 = vrot.lane.b32.xlu1 %v6782_v40, %s3605_s16  ;;  %3329 = vmatprep.subr.mxu1 %v2755_v38 }
 0x489   : > { %2593 = vrot.lane.b32.xlu0 %v6803_v33, %s3604_s14  ;;  %v2308_v0 = vpop.permute.xlu0 %2307 }
 0x48b   : > { %2434 = vrot.lane.b32.xlu1 %v6551_v2, %s3605_s16 }
 0x48d   : > { %2449 = vrot.lane.b32.xlu0 %v6634_v50, %s3606_s17  ;;  %v2739_v50 = vld [vmem:[%s7102_s3 + $0x240] sm:$0xff]  ;;  %v2384_v56 = vpop.permute.xlu0 %2383 }
 0x48e   : > { %3330 = vmatpush3.msra.mxu1 %v2739_v50  ;;  %v2522_v50 = vsel %vm2506_vm7, %v2518_v8, %v2384_v56 }
 0x48f   : > { %2491 = vrot.lane.b32.xlu1 %v6478_v10, %s3606_s17  ;;  %3331 = vmatprep.subr.mxu1 %v2754_v52  ;;  %v6935_v10 = vld [vmem:[#allocation2 + $0x50] sm:$0x3f] }
 0x490   : > { %3332 = vmatpush3.msra.mxu1 %v2738_v12 }
 0x491   : > { %2557 = vrot.lane.b32.xlu0 %v2394_v27, %s3604_s14  ;;  %3333 = vmatprep.subr.mxu1 %v2753_v23  ;;  %v2735_v27 = vld [vmem:[%s7102_s3 + $0x220] sm:$0xff]  ;;  %v2328_v45 = vpop.permute.xlu0 %2327 }
 0x492   : > { %3334 = vmatpush3.msra.mxu1 %v2737_v7 }
 0x493   : > { %2447 = vrot.lane.b32.xlu1 %v6534_v36, %s3606_s17  ;;  %v2752_v36 = vld [vmem:[%s7102_s3 + $0x2a8] sm:$0xff] }
 0x494   : > { %3335 = vmatprep.subr.mxu1 %v2752_v36 }
 0x495   : > { %2601 = vrot.lane.b32.xlu0 %v2457_v11, %s3605_s16  ;;  %3336 = vmatpush3.msra.mxu1 %v2736_v17  ;;  %v2400_v60 = vpop.permute.xlu0 %2399 }
 0x496   : > { %3337 = vmatprep.subr.mxu1 %v2751_v48  ;;  %v2526_v23 = vsel %vm2511_vm8, %v2522_v50, %v2400_v60 }
 0x497   : > { %2555 = vrot.lane.b32.xlu1 %v2393_v18, %s3604_s14  ;;  %v2750_v18 = vld [vmem:[%s7102_s3 + $0x298] sm:$0xff]  ;;  %3338 = vmatpush3.msra.mxu1 %v2735_v27  ;;  %v2504_v27 = vsel %vm2501_vm6, %v6551_v2, %v2308_v0 }
 0x498   : > { %3339 = vmatprep.subr.mxu1 %v2750_v18  ;;  %v2509_v18 = vsel %vm2506_vm7, %v2504_v27, %v2328_v45 }
 0x499   : > { %2571 = vrot.lane.b32.xlu0 %v2410_v32, %s3605_s16  ;;  %3340 = vmatpush3.msra.mxu1 %v2734_v41  ;;  %v2464_v43 = vpop.permute.xlu0 %2463 }
 0x49a   : > { %3341 = vmatprep.subr.mxu1 %v2749_v1  ;;  %v2540_v45 = vsel %vm2501_vm6, %v2320_v47, %v2464_v43 }
 0x49b   : > { %2469 = vrot.lane.b32.xlu1 %v2462_v30, %s3604_s14  ;;  %3342 = vmatpush3.msra.mxu1 %v2733_v4 }
 0x49c   : > { %3343 = vmatprep.subr.mxu1 %v2748_v16 }
 0x49d   : > { %2608 = vrot.lane.b32.xlu0 %v2462_v30, %s3606_s17  ;;  %3344 = vmatpush3.msra.mxu1 %v2732_v14  ;;  %v2344_v26 = vpop.permute.xlu0 %2343 }
 0x49e   : > { %3345 = vmatprep.subr.mxu1 %v2747_v24  ;;  %v2514_v16 = vsel %vm2511_vm8, %v2509_v18, %v2344_v26 }
 0x49f   : > { %2569 = vrot.lane.b32.xlu1 %v2409_v20, %s3605_s16  ;;  %3346 = vmatpush3.msra.mxu1 %v2731_v29 }
 0x4a1   : > { %2584 = vrot.lane.b32.xlu0 %v2418_v51, %s3606_s17  ;;  %v2420_v39 = vpop.permute.xlu0 %2419 }
 0x4a3   : > { %2425 = vrot.lane.b32.xlu1 %v2418_v51, %s3604_s14 }
 0x4a5   : > { %v2477_v6 = vpop.permute.xlu0 %2476 }
 0x4a7   : > { %2482 = vrot.lane.b32.xlu1 %v2475_v21, %s3605_s16 }
 0x4a9   : > { %v2433_v13 = vpop.permute.xlu0 %2432 }
 0x4ab   : > { %2582 = vrot.lane.b32.xlu1 %v2417_v9, %s3606_s17  ;;  %v2600_v9 = vrot.slane %v6935_v10, 1 }
 0x4ad   : > { %v2490_v57 = vpop.permute.xlu0 %2489 }
 0x4af   : > { %2438 = vrot.lane.b32.xlu1 %v6837_v59, %s3605_s16 }
 0x4b1   : > { %v2446_v63 = vpop.permute.xlu0 %2445 }
 0x4b3   : > { %2495 = vrot.lane.b32.xlu1 %v2286_v62, %s3606_s17  ;;  %v3524_v62 = vld [vmem:[#allocation2 + $0x68] sm:$0x3f] }
 0x4b5   : > { %v2554_v17 = vpop.permute.xlu0 %2553 }
 0x4b7   : > { %2595 = vrot.lane.b32.xlu1 %v2298_v19, %s3604_s14  ;;  %v2407_v19 = vrot.slane %v3524_v62, 1 }
 0x4bb   : > { %2451 = vrot.lane.b32.xlu1 %v6803_v33, %s3606_s17  ;;  %v2370_v33 = vpop.permute.xlu1 %2369 }
 0x4bc   : > { %v2519_v38 = vsel %vm2501_vm6, %v6706_v28, %v2370_v33 }
 0x4bf   : > { %2559 = vrot.lane.b32.xlu1 %v2552_v58, %s3604_s14  ;;  %v2544_v58 = vsel %vm2506_vm7, %v2540_v45, %v2477_v6  ;;  %s7059_s14 = scalar_lea.sflag [#allocation4], %s215_s7 }
 0x4c0   : > { %v2548_v26 = vsel %vm2511_vm8, %v2544_v58, %v2490_v57  ;;  %v2765_v57 = vld [vmem:[%s7102_s3 + $0x310] sm:$0xff] }
 0x4c3   : > { %2603 = vrot.lane.b32.xlu1 %v2600_v9, %s3605_s16 }
 0x4c7   : > { %2573 = vrot.lane.b32.xlu1 %v2566_v31, %s3605_s16  ;;  %s3525_s16 = scalar_lea.vmem %s7052_s12, 256 }
 0x4c8   : > { %p3526_p11 = scmp.ne.s32.totalorder %s7052_s12, %s3525_s16 }
 0x4ca   : > { %p3527_p12 = pnand %p3526_p11, %p3678_p5 }
 0x4cb   : > { %2610 = vrot.lane.b32.xlu1 %v2607_v35, %s3606_s17  ;;  %v2528_v35 = vsel %vm2501_vm6, %v2407_v19, %v2420_v39 }
 0x4cc   : > { %v2532_v2 = vsel %vm2506_vm7, %v2528_v35, %v2433_v13  ;;  %v2763_v13 = vld [vmem:[%s7102_s3 + $0x300] sm:$0xff]  ;;  %p3528_p13 = pneg %p3527_p12 }
 0x4cd   : > { %v2536_v43 = vsel %vm2511_vm8, %v2532_v2, %v2446_v63 }
 0x4cf   : > { %2586 = vrot.lane.b32.xlu1 %v2579_v49, %s3606_s17  ;;  %s3529_s17 = sshll.u32 %s3607_s22, 4  ;;  %s3530_s17 = int_to_ptr.vmem [resolvable:$false] %s3529_s17 }
 0x4d0   : > { %s3531_s23 = scalar_lea.vmem %s3530_s17, 512  ;;  %p3532_p0 = scmp.lt.s32.totalorder %s7052_s12, %s3530_s17 }
 0x4d1   : > { %p3533_p1 = scmp.lt.s32.totalorder %s3531_s23, %s3525_s16 }
 0x4d3   : > { %p3534_p2 = por %p3533_p1, %p3532_p0 }
 0x4d5   : > { %p3535_p3 = pnand %p3534_p2, %p3528_p13 }
 0x4dd   : > { %v2310_v44 = vpop.permute.xlu1 %2309 }
 0x4de   : > { %v2505_v30 = vsel %vm2501_vm6, %v6661_v46, %v2310_v44 }
 0x4df   : > { %v6959_v41 = vpop.permute.xlu0 %2467 }
 0x4e1   : > { %v2386_v5 = vpop.permute.xlu1 %2385 }
 0x4e2   : > { %v2523_v52 = vsel %vm2506_vm7, %v2519_v38, %v2386_v5 }
 0x4e3   : > { %v2568_v29 = vpop.permute.xlu0 %2567 }
 0x4e5   : > { %v2330_v15 = vpop.permute.xlu1 %2329 }
 0x4e6   : > { %v2510_v1 = vsel %vm2506_vm7, %v2505_v30, %v2330_v15 }
 0x4e7   : > { %v6964_v0 = vpop.permute.xlu0 %2423 }
 0x4e8   : > { %v2530_v46 = vsel %vm2501_vm6, %v2409_v20, %v6964_v0 }
 0x4e9   : > { %v2402_v12 = vpop.permute.xlu1 %2401 }
 0x4ea   : > { %v2527_v7 = vsel %vm2511_vm8, %v2523_v52, %v2402_v12 }
 0x4eb   : > { %v3208_v36 = vcombine.low %v2526_v23, %v2527_v7  ;;  %v2481_v33 = vpop.permute.xlu0 %2480  ;;  %v2615_v23 = vsel %vm2501_vm6, %v6563_v3, %v2554_v17  ;;  %v2542_v3 = vsel %vm2501_vm6, %v2322_v42, %v6959_v41 }
 0x4ed   : > { %v2466_v48 = vpop.permute.xlu1 %2465  ;;  %2873 = vmatprep.mubr.f32.mxu1 %v3208_v36  ;;  %v2619_v36 = vsel %vm2506_vm7, %v2615_v23, %v2568_v29 }
 0x4ee   : > { %v2541_v60 = vsel %vm2501_vm6, %v2321_v54, %v2466_v48 }
 0x4ef   : > { %v2581_v5 = vpop.permute.xlu0 %2580 }
 0x4f0   : > { %v2623_v30 = vsel %vm2511_vm8, %v2619_v36, %v2581_v5 }
 0x4f1   : > { %v2346_v4 = vpop.permute.xlu1 %2345 }
 0x4f2   : > { %v2515_v14 = vsel %vm2511_vm8, %v2510_v1, %v2346_v4 }
 0x4f3   : > { %v3206_v51 = vcombine.low %v2514_v16, %v2515_v14  ;;  %v2437_v8 = vpop.permute.xlu0 %2436  ;;  %v2546_v14 = vsel %vm2506_vm7, %v2542_v3, %v2481_v33 }
 0x4f5   : > { %v2422_v24 = vpop.permute.xlu1 %2421  ;;  %2874 = vmatmul.mubr.f32.gmra.mxu1 %v3206_v51 }
 0x4f6   : > { %3018 = vmatprep.mubr.f32.mxu1 %v3206_v51  ;;  %v2529_v37 = vsel %vm2501_vm6, %v2408_v53, %v2422_v24  ;;  %v2764_v53 = vld [vmem:[%s7102_s3 + $0x308] sm:$0xff] }
 0x4f7   : > { %v2494_v50 = vpop.permute.xlu0 %2493 }
 0x4f8   : > { %v2550_v29 = vsel %vm2511_vm8, %v2546_v14, %v2494_v50 }
 0x4f9   : > { %v2479_v34 = vpop.permute.xlu1 %2478 }
 0x4fa   : > { %v2545_v9 = vsel %vm2506_vm7, %v2541_v60, %v2479_v34 }
 0x4fb   : > { %v2594_v12 = vpop.permute.xlu0 %2593 }
 0x4fd   : > { %v2435_v56 = vpop.permute.xlu1 %2434 }
 0x4fe   : > { %v2533_v54 = vsel %vm2506_vm7, %v2529_v37, %v2435_v56 }
 0x4ff   : > { %v2450_v4 = vpop.permute.xlu0 %2449 }
 0x501   : > { %v2492_v31 = vpop.permute.xlu1 %2491 }
 0x502   : > { %v2549_v49 = vsel %vm2511_vm8, %v2545_v9, %v2492_v31  ;;  %v2614_v31 = vrot.slane %v6935_v10, 2 }
 0x503   : > { %v3204_v44 = vcombine.low %v2548_v26, %v2549_v49  ;;  %v2558_v56 = vpop.permute.xlu0 %2557 }
 0x505   : > { %v2448_v47 = vpop.permute.xlu1 %2447  ;;  %2943 = vmatprep.mubr.f32.mxu0 %v3204_v44  ;;  %v2627_v44 = vsel %vm2501_vm6, %v6837_v59, %v2594_v12 }
 0x506   : > { %v2537_v39 = vsel %vm2511_vm8, %v2533_v54, %v2448_v47 }
 0x507   : > { %v3203_v6 = vcombine.low %v2536_v43, %v2537_v39  ;;  %v2602_v41 = vpop.permute.xlu0 %2601  ;;  %v2617_v39 = vsel %vm2501_vm6, %v6659_v55, %v2558_v56 }
 0x509   : > { %v2556_v15 = vpop.permute.xlu1 %2555  ;;  %2944 = vmatmul.mubr.f32.vlgmr.msra.gmra.mxu0 %v3203_v6 }
 0x50a   : > { %3392 = vmatpush3.msra.mxu0 %v6923_v61  ;;  %v2616_v7 = vsel %vm2501_vm6, %v6553_v22, %v2556_v15  ;;  %v2780_v22 = vcombine.low %v6782_v40, %v6706_v28  ;;  %v2629_v28 = vsel %vm2506_vm7, %v2627_v44, %v2602_v41 }
 0x50b   : > { %3393 = vmatprep.subr.mxu0 %v2765_v57  ;;  %v2572_v0 = vpop.permute.xlu0 %2571 }
 0x50c   : > { %3394 = vmatpush3.msra.mxu0 %v2765_v57  ;;  %v2621_v6 = vsel %vm2506_vm7, %v2617_v39, %v2572_v0 }
 0x50d   : > { %v2470_v63 = vpop.permute.xlu1 %2469  ;;  %3395 = vmatprep.subr.mxu0 %v2764_v53 }
 0x50e   : > { %3396 = vmatpush3.msra.mxu0 %v2764_v53  ;;  %v2543_v17 = vsel %vm2501_vm6, %v2457_v11, %v2470_v63  ;;  %v2534_v11 = vsel %vm2506_vm7, %v2530_v46, %v2437_v8 }
 0x50f   : > { %3397 = vmatprep.subr.mxu0 %v2763_v13  ;;  %v2538_v58 = vsel %vm2511_vm8, %v2534_v11, %v2450_v4  ;;  %v2609_v49 = vpop.permute.xlu0 %2608 }
 0x510   : > { %3398 = vmatpush3.msra.mxu0 %v2763_v13  ;;  %v2631_v54 = vsel %vm2511_vm8, %v2629_v28, %v2609_v49 }
 0x511   : > { %v2570_v38 = vpop.permute.xlu1 %2569 }
 0x512   : > { %v2620_v48 = vsel %vm2506_vm7, %v2616_v7, %v2570_v38 }
 0x513   : > { %v2585_v47 = vpop.permute.xlu0 %2584 }
 0x514   : > { %v2625_v5 = vsel %vm2511_vm8, %v2621_v6, %v2585_v47 }
 0x515   : > { %v2426_v52 = vpop.permute.xlu1 %2425 }
 0x516   : > { %v2531_v42 = vsel %vm2501_vm6, %v2410_v32, %v2426_v52  ;;  %v2787_v32 = vcombine.low %v2475_v21, %v2614_v31 }
 0x519   : > { %v2483_v61 = vpop.permute.xlu1 %2482 }
 0x51a   : > { %v2547_v51 = vsel %vm2506_vm7, %v2543_v17, %v2483_v61  ;;  %v3200_v61 = vld [vmem:[%s7103_s4] ss:$0 sm:$0xff] }
 0x51d   : > { %v2583_v27 = vpop.permute.xlu1 %2582 }
 0x51e   : > { %v2624_v18 = vsel %vm2511_vm8, %v2620_v48, %v2583_v27 }
 0x51f   : > { %v3205_v1 = vcombine.low %v2623_v30, %v2624_v18 }
 0x521   : > { %v2439_v16 = vpop.permute.xlu1 %2438  ;;  %3019 = vmatmul.mubr.f32.vlgmr.msra.gmra.mxu1 %v3205_v1 }
 0x522   : > { %v2535_v45 = vsel %vm2506_vm7, %v2531_v42, %v2439_v16 }
 0x525   : > { %v2496_v24 = vpop.permute.xlu1 %2495 }
 0x526   : > { %v2551_v34 = vsel %vm2511_vm8, %v2547_v51, %v2496_v24 }
 0x527   : > { %v3210_v62 = vcombine.low %v2550_v29, %v2551_v34 }
 0x529   : > { %v2596_v19 = vpop.permute.xlu1 %2595  ;;  %2948 = vmatprep.mubr.f32.mxu0 %v3210_v62 }
 0x52a   : > { %v2628_v37 = vsel %vm2501_vm6, %v6935_v10, %v2596_v19 }
 0x52d   : > { %v2452_v60 = vpop.permute.xlu1 %2451 }
 0x52e   : > { %v2539_v9 = vsel %vm2511_vm8, %v2535_v45, %v2452_v60 }
 0x52f   : > { %v3209_v35 = vcombine.low %v2538_v58, %v2539_v9 }
 0x530   : > { %v3271_v13 = vpop.f32.mrf.mxu1 }
 0x531   : > { %v2560_v20 = vpop.permute.xlu1 %2559  ;;  %2949 = vmatmul.mubr.f32.gmra.mxu0 %v3209_v35 }
 0x532   : > { %3399 = vmatprep.mubr.msk.f32.mxu0 %vm2501_vm6, %v2780_v22  ;;  %v2618_v59 = vsel %vm2501_vm6, %v6939_v25, %v2560_v20  ;;  %v3272_v63 = vpop.f32.mrf.mxu1 }
 0x533   : > { %v3273_v52 = vadd.f32 %v3272_v63, %v3271_v13 }
 0x535   : > { %v2604_v26 = vpop.permute.xlu1 %2603  ;;  %3400 = vmatmul.mubr.msk.f32.vlgmr.msra.gmra.mxu0 %vm2501_vm6, %v2787_v32  ;;  %v2871_v36 = vadd.f32 %v3273_v52, %v3200_v61 }
 0x536   : > { %v2630_v40 = vsel %vm2506_vm7, %v2628_v37, %v2604_v26 }
 0x539   : > { %v2574_v33 = vpop.permute.xlu1 %2573 }
 0x53a   : > { %v2622_v10 = vsel %vm2506_vm7, %v2618_v59, %v2574_v33 }
 0x53d   : > { %v2611_v2 = vpop.permute.xlu1 %2610 }
 0x53e   : > { %v2632_v21 = vsel %vm2511_vm8, %v2630_v40, %v2611_v2 }
 0x53f   : > { %v3212_v43 = vcombine.low %v2631_v54, %v2632_v21 }
 0x541   : > { %v2587_v57 = vpop.permute.xlu1 %2586  ;;  %3023 = vmatprep.mubr.f32.mxu1 %v3212_v43 }
 0x542   : > { %v2626_v15 = vsel %vm2511_vm8, %v2622_v10, %v2587_v57 }
 0x543   : > { %v3211_v53 = vcombine.low %v2625_v5, %v2626_v15 }
 0x545   : > { %3024 = vmatmul.mubr.f32.gmra.mxu1 %v3211_v53 }
 0x5b5   : > { %v3274_v8 = vpop.f32.mrf.mxu1 }
 0x5b7   : > { %v3275_v55 = vpop.f32.mrf.mxu1 }
 0x5b8   : > { %v3276_v17 = vadd.f32 %v3275_v55, %v3274_v8 }
 0x5ba   : > { %v2876_v24 = vadd.f32 %v3276_v17, %v3200_v61 }
 0x5c9   : > { %v3309_v38 = vpop.f32.mrf.mxu0 }
 0x5cb   : > { %v3310_v25 = vpop.f32.mrf.mxu0 }
 0x5cc   : > { %v3311_v23 = vadd.f32 %v3310_v25, %v3309_v38 }
 0x5ce   : > { %v2946_v30 = vadd.f32 %v3311_v23, %v2871_v36 }
 0x5e1   : > { %v3347_v50 = vpop.f32.mrf.mxu1 }
 0x5e3   : > { %v3348_v12 = vpop.f32.mrf.mxu1 }
 0x5e4   : > { %v3349_v48 = vadd.f32 %v3348_v12, %v3347_v50 }
 0x5e6   : > { %v3021_v1 = vadd.f32 %v3349_v48, %v2946_v30 }
 0x5f1   : > { %v3312_v7 = vpop.f32.mrf.mxu0 }
 0x5f3   : > { %v3313_v27 = vpop.f32.mrf.mxu0 }
 0x5f4   : > { %v3314_v14 = vadd.f32 %v3313_v27, %v3312_v7 }
 0x5f5   : > { %v3401_v18 = vpop.f32.mrf.mxu0 }
 0x5f6   : > { %v2951_v34 = vadd.f32 %v3314_v14, %v2876_v24 }
 0x5f7   : > { %v3095_v4 = vpop.f32.mrf.mxu0 }
 0x5f8   : > { %v3096_v16 = vadd.f32 %v3095_v4, %v3021_v1 }
 0x5fa   : > { %v3104_v3 = vmax.f32 %v3096_v16, 0.0 }
 0x5fc   : > { %3106 = vst [vmem:[%s217_s11] sm:$0xff] %v3104_v3 }
 0x605   : > { %v3350_v51 = vpop.f32.mrf.mxu1 }
 0x607   : > { %v3351_v29 = vpop.f32.mrf.mxu1 }
 0x608   : > { %v3352_v56 = vadd.f32 %v3351_v29, %v3350_v51 }
 0x60a   : > { %v3026_v62 = vadd.f32 %v3352_v56, %v2951_v34 }
 0x60c   : > { %v3101_v19 = vadd.f32 %v3401_v18, %v3026_v62 }
 0x60e   : > { %v3105_v46 = vmax.f32 %v3101_v19, 0.0 }
 0x610   : > { %3107 = vst [vmem:[%s217_s11 + $0x8] sm:$0xff] %v3105_v46 }
 0x611   : > { %3538 = shalt.err (!%p3535_p3)
}
 0x612   : > { %s3539_s25 = scalar_lea.hbm %s7057_s9, 256  ;;  %s3543_s6 = scalar_lea.hbm %s7104_s5, 512 }
 0x613   : > { %p3540_p4 = scmp.ne.s32.totalorder %s7057_s9, %s3539_s25  ;;  %p3544_p9 = scmp.lt.s32.totalorder %s7057_s9, %s7104_s5 }
 0x614   : > { %p3545_p10 = scmp.lt.s32.totalorder %s3543_s6, %s3539_s25 }
 0x615   : > { %p3541_p7 = pnand %p3540_p4, %p3678_p5 }
 0x616   : > { %p3546_p11 = por %p3545_p10, %p3544_p9 }
 0x617   : > { %p3542_p8 = pneg %p3541_p7 }
 0x619   : > { %p3547_p12 = pnand %p3546_p11, %p3542_p8 }
 0x61b   : > { %3550 = shalt.err (!%p3547_p12)
}
 0x61c   : > { %s3608_s11 = smov 128   ;;  %s3609_s10 = smov 8  }
 0x61d   : > { %3403 = dma.vmem_to_hbm [thread:$0]  (%p3678_p5), %s7052_s12, 256, %s7057_s9, %s7059_s14, %s3608_s11, %s3608_s11, %s3609_s10  }
 0x61e PF: > { %p3409_p13 = scmp.ge.s32.totalorder %s3585_s21, 2  ;;  %s3137_s13 = sand.u32 1, %s3573_s18  }
 0x61f   : > { %s3138_s15 = scalar_lea.sflag [#allocation4], %s3137_s13 }
 0x620   : > { %p3406_p0 = pnand %p3409_p13, %p3682_p6 }
 0x622   : > { %p3407_p1 = pneg %p3406_p0 }
 0x624   : > { %3568 = dma.done.wait (%p3407_p1), %s3138_s15, 256  }
 0x625   : > { %3570 = vsyncadd (%p3407_p1), %s3138_s15, 4294967040  ;;  %p15_p2 = scmp.ge.s32.totalorder %s3665_s24, 4   ;;  %s7852_s18 = smov %s3577_s19 }
 0x626   : > { %s7853_s19 = smov %s3581_s20  ;;  %s7854_s20 = smov %s3676_s27 }
 0x627   : > { %s7855_s21 = smov %s3665_s24  ;;  %17 = sbr.rel (!%p15_p2) target bundleno = 3 (0x3), region = 77 }
 0x62c   :  { %3143 = vsyncpa [#allocation4], 1 }
 0x62d   :  { %3145 = vsyncpa [#allocation4 + $0x1], 1 }

</bundles_post_ra>
